<compile_context>
chip_gen: v7x
topology: tpu7x:2x2x1
jax: 0.10.0
libtpu: 0.0.40
codegen_flags: <defaults>
</compile_context>

<pallas_src>
import jax
import jax.numpy as jnp
import numpy as np
from jax import lax
from jax.experimental import pallas as pl
from jax.experimental.pallas import tpu as pltpu

CAPACITY = 4      # args.capacity
LATENT = 8        # args.latent
IMG = 28          # spatial size implied by the hard-coded 7*7 in the module
KSIZE = 4
STRIDE = 2
PAD = 1


# ----------------------------------------------------------------------------
# Constant selection matrices (numpy, built once).
# ----------------------------------------------------------------------------
def _conv_sel(hi, wi, k=KSIZE, s=STRIDE, p=PAD):
    """Row/col tap-selection matrices for a standard conv (stride s, pad p)."""
    ho = (hi + 2 * p - k) // s + 1
    wo = (wi + 2 * p - k) // s + 1
    S = np.zeros((k, ho, hi), np.float32)          # S[ki, ho, hi]
    R = np.zeros((k, wi, wo), np.float32)          # R[kj, wi, wo]
    for t in range(k):
        for r in range(ho):
            src = s * r + t - p
            if 0 <= src < hi:
                S[t, r, src] = 1.0
        for c in range(wo):
            src = s * c + t - p
            if 0 <= src < wi:
                R[t, src, c] = 1.0
    return S, R, ho, wo


def _convT_sel(hi, wi, k=KSIZE, s=STRIDE, p=PAD):
    """Tap-selection matrices for ConvTranspose (== stride-1 conv of the
    s-dilated, (k-1-p)-padded input with the flipped kernel), built directly
    from the *undilated* input so no zeros are ever materialised."""
    ho = (hi - 1) * s - 2 * p + k
    wo = (wi - 1) * s - 2 * p + k
    pp = k - 1 - p
    S = np.zeros((k, ho, hi), np.float32)
    R = np.zeros((k, wi, wo), np.float32)
    for t in range(k):
        for r in range(ho):
            q = r + t - pp
            if q >= 0 and q % s == 0 and q // s < hi:
                S[t, r, q // s] = 1.0
        for c in range(wo):
            q = c + t - pp
            if q >= 0 and q % s == 0 and q // s < wi:
                R[t, q // s, c] = 1.0
    return S, R, ho, wo


def _pack_conv(w, b, hi, wi, transposed=False):
    """Pack one (transposed) conv into (L, R, bias) for the fused kernel.

    L[kj]  : (Cout*Ho, Cin*Hi)  bf16  -- channel mix + row taps (kron)
    R[kj]  : (Wi, Wo)           f32   -- 0/1 column taps
    bias   : (Cout*Ho, 1)       f32
    """
    if transposed:
        S, R, ho, wo = _convT_sel(hi, wi)
        # PyTorch ConvTranspose2d weight is (Cin, Cout, k, k): swap + flip.
        w_eq = jnp.transpose(w, (1, 0, 2, 3))[:, :, ::-1, ::-1]
    else:
        S, R, ho, wo = _conv_sel(hi, wi)
        w_eq = w
    c_out, c_in, k, _ = w_eq.shape
    L = []
    for kj in range(k):
        lk = jnp.zeros((c_out * ho, c_in * hi), jnp.float32)
        for ki in range(k):
            lk = lk + jnp.kron(w_eq[:, :, ki, kj], jnp.asarray(S[ki]))
        L.append(lk)
    L = jnp.stack(L, axis=0).astype(jnp.bfloat16)          # (4, Cout*Ho, Cin*Hi)
    Rj = jnp.asarray(R, jnp.float32)                       # (4, Wi, Wo)
    bias = jnp.repeat(b.astype(jnp.float32), ho).reshape(c_out * ho, 1)
    return L, Rj, bias, ho, wo


def pack_params(params, c=CAPACITY, latent=LATENT):
    """One-time weight re-packing (the 'at init' work)."""
    c2 = 2 * c
    l1, r1, b1, h1, w1 = _pack_conv(params["e_conv1_w"], params["e_conv1_b"],
                                    IMG, IMG)
    l2, r2, b2, h2, w2 = _pack_conv(params["e_conv2_w"], params["e_conv2_b"],
                                    h1, w1)
    # encoder fc (latent, c2*7*7), PyTorch flatten order (c, h, w):
    #   afc[w][l, c*7+h] = W[l, c*49 + h*7 + w]
    afc = (params["e_fc_w"].reshape(latent, c2, h2, w2)
           .transpose(3, 0, 1, 2).reshape(w2, latent, c2 * h2)
           .astype(jnp.bfloat16))
    bfc = params["e_fc_b"].reshape(latent, 1).astype(jnp.float32)
    # decoder fc (c2*7*7, latent):
    #   bdw[w][c*7+h, l] = W[c*49 + h*7 + w, l]
    bdw = (params["d_fc_w"].reshape(c2, h2, w2, latent)
           .transpose(2, 0, 1, 3).reshape(w2, c2 * h2, latent)
           .astype(jnp.bfloat16))
    bdb = params["d_fc_b"].reshape(c2 * h2, w2).astype(jnp.float32)
    l3, r3, b3, h3, w3 = _pack_conv(params["d_conv2_w"], params["d_conv2_b"],
                                    h2, w2, transposed=True)
    l4, r4, b4, h4, w4 = _pack_conv(params["d_conv1_w"], params["d_conv1_b"],
                                    h3, w3, transposed=True)
    assert (h4, w4) == (IMG, IMG)
    return (l1, r1, b1, l2, r2, b2, afc, bfc, bdw, bdb,
            l3, r3, b3, l4, r4, b4)


# ----------------------------------------------------------------------------
# The fused Pallas kernel: one batch element per grid step.
# ----------------------------------------------------------------------------
def _autoencoder_kernel(x_ref,
                        l1_ref, r1_ref, b1_ref,
                        l2_ref, r2_ref, b2_ref,
                        afc_ref, bfc_ref,
                        bdw_ref, bdb_ref,
                        l3_ref, r3_ref, b3_ref,
                        l4_ref, r4_ref, b4_ref,
                        o_ref):
    f32 = jnp.float32
    bf16 = jnp.bfloat16

    def conv_block(act, l_ref, r_ref, b_ref):
        # act: (Cin*Hi, Wi).  out = sum_kj L[kj] @ act @ R[kj] + bias.
        # bf16 operands on the weight-carrying matmul, f32 accumulation.
        a = act.astype(bf16)
        out = None
        for kj in range(l_ref.shape[0]):
            y = jnp.dot(l_ref[kj], a, preferred_element_type=f32)   # (Co*Ho, Wi)
            y = jnp.dot(y, r_ref[kj], preferred_element_type=f32)   # (Co*Ho, Wo)
            out = y if out is None else out + y
        return out + b_ref[...]

    # ---------------- encoder ----------------
    h = jnp.maximum(conv_block(x_ref[...], l1_ref, r1_ref, b1_ref), 0.0)  # (c*14, 14)
    h = jnp.maximum(conv_block(h, l2_ref, r2_ref, b2_ref), 0.0)           # (2c*7, 7)

    # fc: latent = b + sum_w A[w] @ h[:, w]
    hb = h.astype(bf16)
    n_w = afc_ref.shape[0]
    lat = bfc_ref[...]                                                    # (latent, 1)
    for w in range(n_w):
        lat = lat + jnp.dot(afc_ref[w], hb[:, w:w + 1],
                            preferred_element_type=f32)

    # ---------------- decoder ----------------
    latb = lat.astype(bf16)
    rows = bdw_ref.shape[1]                                               # 2c*7
    lane_id = lax.broadcasted_iota(jnp.int32, (rows, n_w), 1)
    d = bdb_ref[...]                                                      # (2c*7, 7)
    for w in range(n_w):
        col = jnp.dot(bdw_ref[w], latb, preferred_element_type=f32)       # (2c*7, 1)
        d = d + col * (lane_id == w).astype(f32)

    d = jnp.maximum(conv_block(d, l3_ref, r3_ref, b3_ref), 0.0)           # (c*14, 14)
    d = jnp.tanh(conv_block(d, l4_ref, r4_ref, b4_ref))                   # (28, 28)
    o_ref[...] = d


def _const_spec(a):
    if a.ndim == 2:
        return pl.BlockSpec(a.shape, lambda i: (0, 0))
    return pl.BlockSpec(a.shape, lambda i: (0, 0, 0))


def autoencoder_forward(packed, x):
    """x: (N, 1, 28, 28) f32 -> (N, 1, 28, 28) f32, single fused pallas_call."""
    n = x.shape[0]
    x2d = x.reshape(n, IMG, IMG).astype(jnp.bfloat16)        # Cin == 1
    const_bytes = sum(int(np.prod(a.shape)) * a.dtype.itemsize for a in packed)
    out2d = pl.pallas_call(
        _autoencoder_kernel,
        out_shape=jax.ShapeDtypeStruct((n, IMG, IMG), jnp.float32),
        grid=(n,),
        in_specs=[pl.BlockSpec((None, IMG, IMG), lambda i: (i, 0, 0))]
                 + [_const_spec(a) for a in packed],
        out_specs=pl.BlockSpec((None, IMG, IMG), lambda i: (i, 0, 0)),
        compiler_params=pltpu.CompilerParams(
            dimension_semantics=("parallel",)),
        cost_estimate=pl.CostEstimate(
            flops=2 * 800_000 * n,
            transcendentals=IMG * IMG * n,
            bytes_accessed=const_bytes + 6 * IMG * IMG * n),
    )(x2d, *packed)
    return out2d.reshape(n, 1, IMG, IMG)


# ----------------------------------------------------------------------------
# Parameters (deterministic, synthetic; PyTorch layouts)
# ----------------------------------------------------------------------------
def init_params(key, c=CAPACITY, latent=LATENT):
    ks = jax.random.split(key, 12)
    s = 0.1
    return {
        # encoder
        "e_conv1_w": s * jax.random.normal(ks[0], (c, 1, 4, 4), jnp.float32),
        "e_conv1_b": s * jax.random.normal(ks[1], (c,), jnp.float32),
        "e_conv2_w": s * jax.random.normal(ks[2], (2 * c, c, 4, 4), jnp.float32),
        "e_conv2_b": s * jax.random.normal(ks[3], (2 * c,), jnp.float32),
        "e_fc_w": s * jax.random.normal(ks[4], (latent, 2 * c * 7 * 7), jnp.float32),
        "e_fc_b": s * jax.random.normal(ks[5], (latent,), jnp.float32),
        # decoder
        "d_fc_w": s * jax.random.normal(ks[6], (2 * c * 7 * 7, latent), jnp.float32),
        "d_fc_b": s * jax.random.normal(ks[7], (2 * c * 7 * 7,), jnp.float32),
        "d_conv2_w": s * jax.random.normal(ks[8], (2 * c, c, 4, 4), jnp.float32),  # (Cin, Cout, k, k)
        "d_conv2_b": s * jax.random.normal(ks[9], (c,), jnp.float32),
        "d_conv1_w": s * jax.random.normal(ks[10], (c, 1, 4, 4), jnp.float32),     # (Cin, Cout, k, k)
        "d_conv1_b": s * jax.random.normal(ks[11], (1,), jnp.float32),
    }


# ----------------------------------------------------------------------------
# Pure-lax reference for verification
# ----------------------------------------------------------------------------
def reference_forward(params, x, c=CAPACITY):
    dn = ("NCHW", "OIHW", "NCHW")
    N = x.shape[0]
    h = lax.conv_general_dilated(x, params["e_conv1_w"], (2, 2), ((1, 1), (1, 1)),
                                 dimension_numbers=dn)
    h = jax.nn.relu(h + params["e_conv1_b"][None, :, None, None])
    h = lax.conv_general_dilated(h, params["e_conv2_w"], (2, 2), ((1, 1), (1, 1)),
                                 dimension_numbers=dn)
    h = jax.nn.relu(h + params["e_conv2_b"][None, :, None, None])
    latent = h.reshape(N, -1) @ params["e_fc_w"].T + params["e_fc_b"]
    d = latent @ params["d_fc_w"].T + params["d_fc_b"]
    d = d.reshape(N, 2 * c, 7, 7)

    def convT(z, w_iohw, b, stride, pad):
        w_eq = jnp.transpose(w_iohw, (1, 0, 2, 3))[:, :, ::-1, ::-1]
        k = w_iohw.shape[-1]
        pp = k - 1 - pad
        y = lax.conv_general_dilated(z, w_eq, (1, 1), ((pp, pp), (pp, pp)),
                                     lhs_dilation=(stride, stride),
                                     dimension_numbers=dn)
        return y + b[None, :, None, None]

    d = jax.nn.relu(convT(d, params["d_conv2_w"], params["d_conv2_b"], 2, 1))
    d = jnp.tanh(convT(d, params["d_conv1_w"], params["d_conv1_b"], 2, 1))
    return d


if __name__ == "__main__":
    key = jax.random.PRNGKey(0)
    pkey, xkey = jax.random.split(key)
    params = init_params(pkey)
    packed = pack_params(params)          # one-time "at init" weight packing

    # small MNIST-like batch: N=2, 1 channel, 28x28 (28 forced by the 7*7 fc)
    x = jax.random.normal(xkey, (2, 1, IMG, IMG), jnp.float32)

    fwd = jax.jit(autoencoder_forward)
    out = jax.block_until_ready(fwd(packed, x))
    assert out.shape == (2, 1, IMG, IMG), out.shape

    ref = jax.block_until_ready(reference_forward(params, x))
    # bf16 MXU operands (f32 accumulation) => loosened tolerance vs f32 ref.
    np.testing.assert_allclose(np.asarray(out), np.asarray(ref),
                               rtol=5e-2, atol=3e-2)

    print("KERNEL_OK")
</pallas_src>

<mosaic_0001>
module attributes {stable_mosaic.version = 11 : i64} {
  func.func @_autoencoder_kernel(%arg0: i32, %arg1: memref<1x28x28xbf16, #tpu.memory_space<vmem>>, %arg2: memref<4x56x28xbf16, #tpu.memory_space<vmem>>, %arg3: memref<4x28x14xf32, #tpu.memory_space<vmem>>, %arg4: memref<56x1xf32, #tpu.memory_space<vmem>>, %arg5: memref<4x56x56xbf16, #tpu.memory_space<vmem>>, %arg6: memref<4x14x7xf32, #tpu.memory_space<vmem>>, %arg7: memref<56x1xf32, #tpu.memory_space<vmem>>, %arg8: memref<7x8x56xbf16, #tpu.memory_space<vmem>>, %arg9: memref<8x1xf32, #tpu.memory_space<vmem>>, %arg10: memref<7x56x8xbf16, #tpu.memory_space<vmem>>, %arg11: memref<56x7xf32, #tpu.memory_space<vmem>>, %arg12: memref<4x56x56xbf16, #tpu.memory_space<vmem>>, %arg13: memref<4x7x14xf32, #tpu.memory_space<vmem>>, %arg14: memref<56x1xf32, #tpu.memory_space<vmem>>, %arg15: memref<4x28x56xbf16, #tpu.memory_space<vmem>>, %arg16: memref<4x14x28xf32, #tpu.memory_space<vmem>>, %arg17: memref<28x1xf32, #tpu.memory_space<vmem>>, %arg18: memref<1x28x28xf32, #tpu.memory_space<vmem>>) attributes {dimension_semantics = [#tpu.dimension_semantics<parallel>], iteration_bounds = array<i64: 2>, scalar_prefetch = 0 : i64, scratch_operands = 0 : i64, tpu.core_type = #tpu.core_type<tc>, window_params = [{transform_indices = @transform_0, window_bounds = array<i64: 1, 28, 28>}, {pipeline_mode = #tpu.pipeline_mode<synchronous>, transform_indices = @transform_1, window_bounds = array<i64: 4, 56, 28>}, {pipeline_mode = #tpu.pipeline_mode<synchronous>, transform_indices = @transform_2, window_bounds = array<i64: 4, 28, 14>}, {pipeline_mode = #tpu.pipeline_mode<synchronous>, transform_indices = @transform_3, window_bounds = array<i64: 56, 1>}, {pipeline_mode = #tpu.pipeline_mode<synchronous>, transform_indices = @transform_4, window_bounds = array<i64: 4, 56, 56>}, {pipeline_mode = #tpu.pipeline_mode<synchronous>, transform_indices = @transform_5, window_bounds = array<i64: 4, 14, 7>}, {pipeline_mode = #tpu.pipeline_mode<synchronous>, transform_indices = @transform_6, window_bounds = array<i64: 56, 1>}, {pipeline_mode = #tpu.pipeline_mode<synchronous>, transform_indices = @transform_7, window_bounds = array<i64: 7, 8, 56>}, {pipeline_mode = #tpu.pipeline_mode<synchronous>, transform_indices = @transform_8, window_bounds = array<i64: 8, 1>}, {pipeline_mode = #tpu.pipeline_mode<synchronous>, transform_indices = @transform_9, window_bounds = array<i64: 7, 56, 8>}, {pipeline_mode = #tpu.pipeline_mode<synchronous>, transform_indices = @transform_10, window_bounds = array<i64: 56, 7>}, {pipeline_mode = #tpu.pipeline_mode<synchronous>, transform_indices = @transform_11, window_bounds = array<i64: 4, 56, 56>}, {pipeline_mode = #tpu.pipeline_mode<synchronous>, transform_indices = @transform_12, window_bounds = array<i64: 4, 7, 14>}, {pipeline_mode = #tpu.pipeline_mode<synchronous>, transform_indices = @transform_13, window_bounds = array<i64: 56, 1>}, {pipeline_mode = #tpu.pipeline_mode<synchronous>, transform_indices = @transform_14, window_bounds = array<i64: 4, 28, 56>}, {pipeline_mode = #tpu.pipeline_mode<synchronous>, transform_indices = @transform_15, window_bounds = array<i64: 4, 14, 28>}, {pipeline_mode = #tpu.pipeline_mode<synchronous>, transform_indices = @transform_16, window_bounds = array<i64: 28, 1>}, {transform_indices = @transform_17, window_bounds = array<i64: 1, 28, 28>}]} {
    %c0 = arith.constant 0 : index
    %c0_0 = arith.constant 0 : index
    %c0_1 = arith.constant 0 : index
    %0 = vector.load %arg1[%c0, %c0_0, %c0_1] : memref<1x28x28xbf16, #tpu.memory_space<vmem>>, vector<1x28x28xbf16>
    %1 = vector.shape_cast %0 : vector<1x28x28xbf16> to vector<28x28xbf16>
    %c0_2 = arith.constant 0 : index
    %c0_3 = arith.constant 0 : index
    %c0_4 = arith.constant 0 : index
    %2 = vector.load %arg2[%c0_2, %c0_3, %c0_4] : memref<4x56x28xbf16, #tpu.memory_space<vmem>>, vector<1x56x28xbf16>
    %3 = vector.shape_cast %2 : vector<1x56x28xbf16> to vector<56x28xbf16>
    %cst = arith.constant dense<0.000000e+00> : vector<56x28xf32>
    %4 = tpu.matmul %3, %1, %cst {dimension_numbers = #tpu.dot_dimension_numbers<[1], [0], [0], [1], [0, 0, 1, 1], [], []>} : vector<56x28xbf16>, vector<28x28xbf16>, vector<56x28xf32> -> vector<56x28xf32>
    %c0_5 = arith.constant 0 : index
    %c0_6 = arith.constant 0 : index
    %c0_7 = arith.constant 0 : index
    %5 = vector.load %arg3[%c0_5, %c0_6, %c0_7] : memref<4x28x14xf32, #tpu.memory_space<vmem>>, vector<1x28x14xf32>
    %6 = vector.shape_cast %5 : vector<1x28x14xf32> to vector<28x14xf32>
    %cst_8 = arith.constant dense<0.000000e+00> : vector<56x14xf32>
    %7 = tpu.matmul %4, %6, %cst_8 {dimension_numbers = #tpu.dot_dimension_numbers<[1], [0], [0], [1], [0, 0, 1, 1], [], []>} : vector<56x28xf32>, vector<28x14xf32>, vector<56x14xf32> -> vector<56x14xf32>
    %c1 = arith.constant 1 : index
    %c0_9 = arith.constant 0 : index
    %c0_10 = arith.constant 0 : index
    %8 = vector.load %arg2[%c1, %c0_9, %c0_10] : memref<4x56x28xbf16, #tpu.memory_space<vmem>>, vector<1x56x28xbf16>
    %9 = vector.shape_cast %8 : vector<1x56x28xbf16> to vector<56x28xbf16>
    %cst_11 = arith.constant dense<0.000000e+00> : vector<56x28xf32>
    %10 = tpu.matmul %9, %1, %cst_11 {dimension_numbers = #tpu.dot_dimension_numbers<[1], [0], [0], [1], [0, 0, 1, 1], [], []>} : vector<56x28xbf16>, vector<28x28xbf16>, vector<56x28xf32> -> vector<56x28xf32>
    %c1_12 = arith.constant 1 : index
    %c0_13 = arith.constant 0 : index
    %c0_14 = arith.constant 0 : index
    %11 = vector.load %arg3[%c1_12, %c0_13, %c0_14] : memref<4x28x14xf32, #tpu.memory_space<vmem>>, vector<1x28x14xf32>
    %12 = vector.shape_cast %11 : vector<1x28x14xf32> to vector<28x14xf32>
    %cst_15 = arith.constant dense<0.000000e+00> : vector<56x14xf32>
    %13 = tpu.matmul %10, %12, %cst_15 {dimension_numbers = #tpu.dot_dimension_numbers<[1], [0], [0], [1], [0, 0, 1, 1], [], []>} : vector<56x28xf32>, vector<28x14xf32>, vector<56x14xf32> -> vector<56x14xf32>
    %14 = arith.addf %7, %13 : vector<56x14xf32>
    %c2 = arith.constant 2 : index
    %c0_16 = arith.constant 0 : index
    %c0_17 = arith.constant 0 : index
    %15 = vector.load %arg2[%c2, %c0_16, %c0_17] : memref<4x56x28xbf16, #tpu.memory_space<vmem>>, vector<1x56x28xbf16>
    %16 = vector.shape_cast %15 : vector<1x56x28xbf16> to vector<56x28xbf16>
    %cst_18 = arith.constant dense<0.000000e+00> : vector<56x28xf32>
    %17 = tpu.matmul %16, %1, %cst_18 {dimension_numbers = #tpu.dot_dimension_numbers<[1], [0], [0], [1], [0, 0, 1, 1], [], []>} : vector<56x28xbf16>, vector<28x28xbf16>, vector<56x28xf32> -> vector<56x28xf32>
    %c2_19 = arith.constant 2 : index
    %c0_20 = arith.constant 0 : index
    %c0_21 = arith.constant 0 : index
    %18 = vector.load %arg3[%c2_19, %c0_20, %c0_21] : memref<4x28x14xf32, #tpu.memory_space<vmem>>, vector<1x28x14xf32>
    %19 = vector.shape_cast %18 : vector<1x28x14xf32> to vector<28x14xf32>
    %cst_22 = arith.constant dense<0.000000e+00> : vector<56x14xf32>
    %20 = tpu.matmul %17, %19, %cst_22 {dimension_numbers = #tpu.dot_dimension_numbers<[1], [0], [0], [1], [0, 0, 1, 1], [], []>} : vector<56x28xf32>, vector<28x14xf32>, vector<56x14xf32> -> vector<56x14xf32>
    %21 = arith.addf %14, %20 : vector<56x14xf32>
    %c3 = arith.constant 3 : index
    %c0_23 = arith.constant 0 : index
    %c0_24 = arith.constant 0 : index
    %22 = vector.load %arg2[%c3, %c0_23, %c0_24] : memref<4x56x28xbf16, #tpu.memory_space<vmem>>, vector<1x56x28xbf16>
    %23 = vector.shape_cast %22 : vector<1x56x28xbf16> to vector<56x28xbf16>
    %cst_25 = arith.constant dense<0.000000e+00> : vector<56x28xf32>
    %24 = tpu.matmul %23, %1, %cst_25 {dimension_numbers = #tpu.dot_dimension_numbers<[1], [0], [0], [1], [0, 0, 1, 1], [], []>} : vector<56x28xbf16>, vector<28x28xbf16>, vector<56x28xf32> -> vector<56x28xf32>
    %c3_26 = arith.constant 3 : index
    %c0_27 = arith.constant 0 : index
    %c0_28 = arith.constant 0 : index
    %25 = vector.load %arg3[%c3_26, %c0_27, %c0_28] : memref<4x28x14xf32, #tpu.memory_space<vmem>>, vector<1x28x14xf32>
    %26 = vector.shape_cast %25 : vector<1x28x14xf32> to vector<28x14xf32>
    %cst_29 = arith.constant dense<0.000000e+00> : vector<56x14xf32>
    %27 = tpu.matmul %24, %26, %cst_29 {dimension_numbers = #tpu.dot_dimension_numbers<[1], [0], [0], [1], [0, 0, 1, 1], [], []>} : vector<56x28xf32>, vector<28x14xf32>, vector<56x14xf32> -> vector<56x14xf32>
    %28 = arith.addf %21, %27 : vector<56x14xf32>
    %c0_30 = arith.constant 0 : index
    %c0_31 = arith.constant 0 : index
    %29 = vector.load %arg4[%c0_30, %c0_31] : memref<56x1xf32, #tpu.memory_space<vmem>>, vector<56x1xf32>
    %30 = vector.broadcast %29 : vector<56x1xf32> to vector<56x14xf32>
    %31 = arith.addf %28, %30 : vector<56x14xf32>
    %cst_32 = arith.constant 0.000000e+00 : f32
    %32 = vector.broadcast %cst_32 : f32 to vector<56x14xf32>
    %33 = arith.maximumf %31, %32 : vector<56x14xf32>
    %34 = arith.truncf %33 : vector<56x14xf32> to vector<56x14xbf16>
    %c0_33 = arith.constant 0 : index
    %c0_34 = arith.constant 0 : index
    %c0_35 = arith.constant 0 : index
    %35 = vector.load %arg5[%c0_33, %c0_34, %c0_35] : memref<4x56x56xbf16, #tpu.memory_space<vmem>>, vector<1x56x56xbf16>
    %36 = vector.shape_cast %35 : vector<1x56x56xbf16> to vector<56x56xbf16>
    %cst_36 = arith.constant dense<0.000000e+00> : vector<56x14xf32>
    %37 = tpu.matmul %36, %34, %cst_36 {dimension_numbers = #tpu.dot_dimension_numbers<[1], [0], [0], [1], [0, 0, 1, 1], [], []>} : vector<56x56xbf16>, vector<56x14xbf16>, vector<56x14xf32> -> vector<56x14xf32>
    %c0_37 = arith.constant 0 : index
    %c0_38 = arith.constant 0 : index
    %c0_39 = arith.constant 0 : index
    %38 = vector.load %arg6[%c0_37, %c0_38, %c0_39] : memref<4x14x7xf32, #tpu.memory_space<vmem>>, vector<1x14x7xf32>
    %39 = vector.shape_cast %38 : vector<1x14x7xf32> to vector<14x7xf32>
    %cst_40 = arith.constant dense<0.000000e+00> : vector<56x7xf32>
    %40 = tpu.matmul %37, %39, %cst_40 {dimension_numbers = #tpu.dot_dimension_numbers<[1], [0], [0], [1], [0, 0, 1, 1], [], []>} : vector<56x14xf32>, vector<14x7xf32>, vector<56x7xf32> -> vector<56x7xf32>
    %c1_41 = arith.constant 1 : index
    %c0_42 = arith.constant 0 : index
    %c0_43 = arith.constant 0 : index
    %41 = vector.load %arg5[%c1_41, %c0_42, %c0_43] : memref<4x56x56xbf16, #tpu.memory_space<vmem>>, vector<1x56x56xbf16>
    %42 = vector.shape_cast %41 : vector<1x56x56xbf16> to vector<56x56xbf16>
    %cst_44 = arith.constant dense<0.000000e+00> : vector<56x14xf32>
    %43 = tpu.matmul %42, %34, %cst_44 {dimension_numbers = #tpu.dot_dimension_numbers<[1], [0], [0], [1], [0, 0, 1, 1], [], []>} : vector<56x56xbf16>, vector<56x14xbf16>, vector<56x14xf32> -> vector<56x14xf32>
    %c1_45 = arith.constant 1 : index
    %c0_46 = arith.constant 0 : index
    %c0_47 = arith.constant 0 : index
    %44 = vector.load %arg6[%c1_45, %c0_46, %c0_47] : memref<4x14x7xf32, #tpu.memory_space<vmem>>, vector<1x14x7xf32>
    %45 = vector.shape_cast %44 : vector<1x14x7xf32> to vector<14x7xf32>
    %cst_48 = arith.constant dense<0.000000e+00> : vector<56x7xf32>
    %46 = tpu.matmul %43, %45, %cst_48 {dimension_numbers = #tpu.dot_dimension_numbers<[1], [0], [0], [1], [0, 0, 1, 1], [], []>} : vector<56x14xf32>, vector<14x7xf32>, vector<56x7xf32> -> vector<56x7xf32>
    %47 = arith.addf %40, %46 : vector<56x7xf32>
    %c2_49 = arith.constant 2 : index
    %c0_50 = arith.constant 0 : index
    %c0_51 = arith.constant 0 : index
    %48 = vector.load %arg5[%c2_49, %c0_50, %c0_51] : memref<4x56x56xbf16, #tpu.memory_space<vmem>>, vector<1x56x56xbf16>
    %49 = vector.shape_cast %48 : vector<1x56x56xbf16> to vector<56x56xbf16>
    %cst_52 = arith.constant dense<0.000000e+00> : vector<56x14xf32>
    %50 = tpu.matmul %49, %34, %cst_52 {dimension_numbers = #tpu.dot_dimension_numbers<[1], [0], [0], [1], [0, 0, 1, 1], [], []>} : vector<56x56xbf16>, vector<56x14xbf16>, vector<56x14xf32> -> vector<56x14xf32>
    %c2_53 = arith.constant 2 : index
    %c0_54 = arith.constant 0 : index
    %c0_55 = arith.constant 0 : index
    %51 = vector.load %arg6[%c2_53, %c0_54, %c0_55] : memref<4x14x7xf32, #tpu.memory_space<vmem>>, vector<1x14x7xf32>
    %52 = vector.shape_cast %51 : vector<1x14x7xf32> to vector<14x7xf32>
    %cst_56 = arith.constant dense<0.000000e+00> : vector<56x7xf32>
    %53 = tpu.matmul %50, %52, %cst_56 {dimension_numbers = #tpu.dot_dimension_numbers<[1], [0], [0], [1], [0, 0, 1, 1], [], []>} : vector<56x14xf32>, vector<14x7xf32>, vector<56x7xf32> -> vector<56x7xf32>
    %54 = arith.addf %47, %53 : vector<56x7xf32>
    %c3_57 = arith.constant 3 : index
    %c0_58 = arith.constant 0 : index
    %c0_59 = arith.constant 0 : index
    %55 = vector.load %arg5[%c3_57, %c0_58, %c0_59] : memref<4x56x56xbf16, #tpu.memory_space<vmem>>, vector<1x56x56xbf16>
    %56 = vector.shape_cast %55 : vector<1x56x56xbf16> to vector<56x56xbf16>
    %cst_60 = arith.constant dense<0.000000e+00> : vector<56x14xf32>
    %57 = tpu.matmul %56, %34, %cst_60 {dimension_numbers = #tpu.dot_dimension_numbers<[1], [0], [0], [1], [0, 0, 1, 1], [], []>} : vector<56x56xbf16>, vector<56x14xbf16>, vector<56x14xf32> -> vector<56x14xf32>
    %c3_61 = arith.constant 3 : index
    %c0_62 = arith.constant 0 : index
    %c0_63 = arith.constant 0 : index
    %58 = vector.load %arg6[%c3_61, %c0_62, %c0_63] : memref<4x14x7xf32, #tpu.memory_space<vmem>>, vector<1x14x7xf32>
    %59 = vector.shape_cast %58 : vector<1x14x7xf32> to vector<14x7xf32>
    %cst_64 = arith.constant dense<0.000000e+00> : vector<56x7xf32>
    %60 = tpu.matmul %57, %59, %cst_64 {dimension_numbers = #tpu.dot_dimension_numbers<[1], [0], [0], [1], [0, 0, 1, 1], [], []>} : vector<56x14xf32>, vector<14x7xf32>, vector<56x7xf32> -> vector<56x7xf32>
    %61 = arith.addf %54, %60 : vector<56x7xf32>
    %c0_65 = arith.constant 0 : index
    %c0_66 = arith.constant 0 : index
    %62 = vector.load %arg7[%c0_65, %c0_66] : memref<56x1xf32, #tpu.memory_space<vmem>>, vector<56x1xf32>
    %63 = vector.broadcast %62 : vector<56x1xf32> to vector<56x7xf32>
    %64 = arith.addf %61, %63 : vector<56x7xf32>
    %cst_67 = arith.constant 0.000000e+00 : f32
    %65 = vector.broadcast %cst_67 : f32 to vector<56x7xf32>
    %66 = arith.maximumf %64, %65 : vector<56x7xf32>
    %67 = arith.truncf %66 : vector<56x7xf32> to vector<56x7xbf16>
    %c0_68 = arith.constant 0 : index
    %c0_69 = arith.constant 0 : index
    %68 = vector.load %arg9[%c0_68, %c0_69] : memref<8x1xf32, #tpu.memory_space<vmem>>, vector<8x1xf32>
    %c0_70 = arith.constant 0 : index
    %c0_71 = arith.constant 0 : index
    %c0_72 = arith.constant 0 : index
    %69 = vector.load %arg8[%c0_70, %c0_71, %c0_72] : memref<7x8x56xbf16, #tpu.memory_space<vmem>>, vector<1x8x56xbf16>
    %70 = vector.shape_cast %69 : vector<1x8x56xbf16> to vector<8x56xbf16>
    %71 = vector.extract_strided_slice %67 {offsets = [0, 0], sizes = [56, 1], strides = [1, 1]} : vector<56x7xbf16> to vector<56x1xbf16>
    %cst_73 = arith.constant dense<0.000000e+00> : vector<8x1xf32>
    %72 = tpu.matmul %70, %71, %cst_73 {dimension_numbers = #tpu.dot_dimension_numbers<[1], [0], [0], [1], [0, 0, 1, 1], [], []>} : vector<8x56xbf16>, vector<56x1xbf16>, vector<8x1xf32> -> vector<8x1xf32>
    %73 = arith.addf %68, %72 : vector<8x1xf32>
    %c1_74 = arith.constant 1 : index
    %c0_75 = arith.constant 0 : index
    %c0_76 = arith.constant 0 : index
    %74 = vector.load %arg8[%c1_74, %c0_75, %c0_76] : memref<7x8x56xbf16, #tpu.memory_space<vmem>>, vector<1x8x56xbf16>
    %75 = vector.shape_cast %74 : vector<1x8x56xbf16> to vector<8x56xbf16>
    %76 = vector.extract_strided_slice %67 {offsets = [0, 1], sizes = [56, 1], strides = [1, 1]} : vector<56x7xbf16> to vector<56x1xbf16>
    %cst_77 = arith.constant dense<0.000000e+00> : vector<8x1xf32>
    %77 = tpu.matmul %75, %76, %cst_77 {dimension_numbers = #tpu.dot_dimension_numbers<[1], [0], [0], [1], [0, 0, 1, 1], [], []>} : vector<8x56xbf16>, vector<56x1xbf16>, vector<8x1xf32> -> vector<8x1xf32>
    %78 = arith.addf %73, %77 : vector<8x1xf32>
    %c2_78 = arith.constant 2 : index
    %c0_79 = arith.constant 0 : index
    %c0_80 = arith.constant 0 : index
    %79 = vector.load %arg8[%c2_78, %c0_79, %c0_80] : memref<7x8x56xbf16, #tpu.memory_space<vmem>>, vector<1x8x56xbf16>
    %80 = vector.shape_cast %79 : vector<1x8x56xbf16> to vector<8x56xbf16>
    %81 = vector.extract_strided_slice %67 {offsets = [0, 2], sizes = [56, 1], strides = [1, 1]} : vector<56x7xbf16> to vector<56x1xbf16>
    %cst_81 = arith.constant dense<0.000000e+00> : vector<8x1xf32>
    %82 = tpu.matmul %80, %81, %cst_81 {dimension_numbers = #tpu.dot_dimension_numbers<[1], [0], [0], [1], [0, 0, 1, 1], [], []>} : vector<8x56xbf16>, vector<56x1xbf16>, vector<8x1xf32> -> vector<8x1xf32>
    %83 = arith.addf %78, %82 : vector<8x1xf32>
    %c3_82 = arith.constant 3 : index
    %c0_83 = arith.constant 0 : index
    %c0_84 = arith.constant 0 : index
    %84 = vector.load %arg8[%c3_82, %c0_83, %c0_84] : memref<7x8x56xbf16, #tpu.memory_space<vmem>>, vector<1x8x56xbf16>
    %85 = vector.shape_cast %84 : vector<1x8x56xbf16> to vector<8x56xbf16>
    %86 = vector.extract_strided_slice %67 {offsets = [0, 3], sizes = [56, 1], strides = [1, 1]} : vector<56x7xbf16> to vector<56x1xbf16>
    %cst_85 = arith.constant dense<0.000000e+00> : vector<8x1xf32>
    %87 = tpu.matmul %85, %86, %cst_85 {dimension_numbers = #tpu.dot_dimension_numbers<[1], [0], [0], [1], [0, 0, 1, 1], [], []>} : vector<8x56xbf16>, vector<56x1xbf16>, vector<8x1xf32> -> vector<8x1xf32>
    %88 = arith.addf %83, %87 : vector<8x1xf32>
    %c4 = arith.constant 4 : index
    %c0_86 = arith.constant 0 : index
    %c0_87 = arith.constant 0 : index
    %89 = vector.load %arg8[%c4, %c0_86, %c0_87] : memref<7x8x56xbf16, #tpu.memory_space<vmem>>, vector<1x8x56xbf16>
    %90 = vector.shape_cast %89 : vector<1x8x56xbf16> to vector<8x56xbf16>
    %91 = vector.extract_strided_slice %67 {offsets = [0, 4], sizes = [56, 1], strides = [1, 1]} : vector<56x7xbf16> to vector<56x1xbf16>
    %cst_88 = arith.constant dense<0.000000e+00> : vector<8x1xf32>
    %92 = tpu.matmul %90, %91, %cst_88 {dimension_numbers = #tpu.dot_dimension_numbers<[1], [0], [0], [1], [0, 0, 1, 1], [], []>} : vector<8x56xbf16>, vector<56x1xbf16>, vector<8x1xf32> -> vector<8x1xf32>
    %93 = arith.addf %88, %92 : vector<8x1xf32>
    %c5 = arith.constant 5 : index
    %c0_89 = arith.constant 0 : index
    %c0_90 = arith.constant 0 : index
    %94 = vector.load %arg8[%c5, %c0_89, %c0_90] : memref<7x8x56xbf16, #tpu.memory_space<vmem>>, vector<1x8x56xbf16>
    %95 = vector.shape_cast %94 : vector<1x8x56xbf16> to vector<8x56xbf16>
    %96 = vector.extract_strided_slice %67 {offsets = [0, 5], sizes = [56, 1], strides = [1, 1]} : vector<56x7xbf16> to vector<56x1xbf16>
    %cst_91 = arith.constant dense<0.000000e+00> : vector<8x1xf32>
    %97 = tpu.matmul %95, %96, %cst_91 {dimension_numbers = #tpu.dot_dimension_numbers<[1], [0], [0], [1], [0, 0, 1, 1], [], []>} : vector<8x56xbf16>, vector<56x1xbf16>, vector<8x1xf32> -> vector<8x1xf32>
    %98 = arith.addf %93, %97 : vector<8x1xf32>
    %c6 = arith.constant 6 : index
    %c0_92 = arith.constant 0 : index
    %c0_93 = arith.constant 0 : index
    %99 = vector.load %arg8[%c6, %c0_92, %c0_93] : memref<7x8x56xbf16, #tpu.memory_space<vmem>>, vector<1x8x56xbf16>
    %100 = vector.shape_cast %99 : vector<1x8x56xbf16> to vector<8x56xbf16>
    %101 = vector.extract_strided_slice %67 {offsets = [0, 6], sizes = [56, 1], strides = [1, 1]} : vector<56x7xbf16> to vector<56x1xbf16>
    %cst_94 = arith.constant dense<0.000000e+00> : vector<8x1xf32>
    %102 = tpu.matmul %100, %101, %cst_94 {dimension_numbers = #tpu.dot_dimension_numbers<[1], [0], [0], [1], [0, 0, 1, 1], [], []>} : vector<8x56xbf16>, vector<56x1xbf16>, vector<8x1xf32> -> vector<8x1xf32>
    %103 = arith.addf %98, %102 : vector<8x1xf32>
    %104 = arith.truncf %103 : vector<8x1xf32> to vector<8x1xbf16>
    %105 = tpu.iota {dimensions = array<i32: 1>} : vector<56x7xi32>
    %c0_95 = arith.constant 0 : index
    %c0_96 = arith.constant 0 : index
    %106 = vector.load %arg11[%c0_95, %c0_96] : memref<56x7xf32, #tpu.memory_space<vmem>>, vector<56x7xf32>
    %c0_97 = arith.constant 0 : index
    %c0_98 = arith.constant 0 : index
    %c0_99 = arith.constant 0 : index
    %107 = vector.load %arg10[%c0_97, %c0_98, %c0_99] : memref<7x56x8xbf16, #tpu.memory_space<vmem>>, vector<1x56x8xbf16>
    %108 = vector.shape_cast %107 : vector<1x56x8xbf16> to vector<56x8xbf16>
    %cst_100 = arith.constant dense<0.000000e+00> : vector<56x1xf32>
    %109 = tpu.matmul %108, %104, %cst_100 {dimension_numbers = #tpu.dot_dimension_numbers<[1], [0], [0], [1], [0, 0, 1, 1], [], []>} : vector<56x8xbf16>, vector<8x1xbf16>, vector<56x1xf32> -> vector<56x1xf32>
    %c0_i32 = arith.constant 0 : i32
    %110 = vector.broadcast %c0_i32 : i32 to vector<56x7xi32>
    %111 = arith.cmpi eq, %105, %110 : vector<56x7xi32>
    %112 = arith.extui %111 : vector<56x7xi1> to vector<56x7xi32>
    %113 = arith.sitofp %112 : vector<56x7xi32> to vector<56x7xf32>
    %114 = vector.broadcast %109 : vector<56x1xf32> to vector<56x7xf32>
    %115 = arith.mulf %114, %113 : vector<56x7xf32>
    %116 = arith.addf %106, %115 : vector<56x7xf32>
    %c1_101 = arith.constant 1 : index
    %c0_102 = arith.constant 0 : index
    %c0_103 = arith.constant 0 : index
    %117 = vector.load %arg10[%c1_101, %c0_102, %c0_103] : memref<7x56x8xbf16, #tpu.memory_space<vmem>>, vector<1x56x8xbf16>
    %118 = vector.shape_cast %117 : vector<1x56x8xbf16> to vector<56x8xbf16>
    %cst_104 = arith.constant dense<0.000000e+00> : vector<56x1xf32>
    %119 = tpu.matmul %118, %104, %cst_104 {dimension_numbers = #tpu.dot_dimension_numbers<[1], [0], [0], [1], [0, 0, 1, 1], [], []>} : vector<56x8xbf16>, vector<8x1xbf16>, vector<56x1xf32> -> vector<56x1xf32>
    %c1_i32 = arith.constant 1 : i32
    %120 = vector.broadcast %c1_i32 : i32 to vector<56x7xi32>
    %121 = arith.cmpi eq, %105, %120 : vector<56x7xi32>
    %122 = arith.extui %121 : vector<56x7xi1> to vector<56x7xi32>
    %123 = arith.sitofp %122 : vector<56x7xi32> to vector<56x7xf32>
    %124 = vector.broadcast %119 : vector<56x1xf32> to vector<56x7xf32>
    %125 = arith.mulf %124, %123 : vector<56x7xf32>
    %126 = arith.addf %116, %125 : vector<56x7xf32>
    %c2_105 = arith.constant 2 : index
    %c0_106 = arith.constant 0 : index
    %c0_107 = arith.constant 0 : index
    %127 = vector.load %arg10[%c2_105, %c0_106, %c0_107] : memref<7x56x8xbf16, #tpu.memory_space<vmem>>, vector<1x56x8xbf16>
    %128 = vector.shape_cast %127 : vector<1x56x8xbf16> to vector<56x8xbf16>
    %cst_108 = arith.constant dense<0.000000e+00> : vector<56x1xf32>
    %129 = tpu.matmul %128, %104, %cst_108 {dimension_numbers = #tpu.dot_dimension_numbers<[1], [0], [0], [1], [0, 0, 1, 1], [], []>} : vector<56x8xbf16>, vector<8x1xbf16>, vector<56x1xf32> -> vector<56x1xf32>
    %c2_i32 = arith.constant 2 : i32
    %130 = vector.broadcast %c2_i32 : i32 to vector<56x7xi32>
    %131 = arith.cmpi eq, %105, %130 : vector<56x7xi32>
    %132 = arith.extui %131 : vector<56x7xi1> to vector<56x7xi32>
    %133 = arith.sitofp %132 : vector<56x7xi32> to vector<56x7xf32>
    %134 = vector.broadcast %129 : vector<56x1xf32> to vector<56x7xf32>
    %135 = arith.mulf %134, %133 : vector<56x7xf32>
    %136 = arith.addf %126, %135 : vector<56x7xf32>
    %c3_109 = arith.constant 3 : index
    %c0_110 = arith.constant 0 : index
    %c0_111 = arith.constant 0 : index
    %137 = vector.load %arg10[%c3_109, %c0_110, %c0_111] : memref<7x56x8xbf16, #tpu.memory_space<vmem>>, vector<1x56x8xbf16>
    %138 = vector.shape_cast %137 : vector<1x56x8xbf16> to vector<56x8xbf16>
    %cst_112 = arith.constant dense<0.000000e+00> : vector<56x1xf32>
    %139 = tpu.matmul %138, %104, %cst_112 {dimension_numbers = #tpu.dot_dimension_numbers<[1], [0], [0], [1], [0, 0, 1, 1], [], []>} : vector<56x8xbf16>, vector<8x1xbf16>, vector<56x1xf32> -> vector<56x1xf32>
    %c3_i32 = arith.constant 3 : i32
    %140 = vector.broadcast %c3_i32 : i32 to vector<56x7xi32>
    %141 = arith.cmpi eq, %105, %140 : vector<56x7xi32>
    %142 = arith.extui %141 : vector<56x7xi1> to vector<56x7xi32>
    %143 = arith.sitofp %142 : vector<56x7xi32> to vector<56x7xf32>
    %144 = vector.broadcast %139 : vector<56x1xf32> to vector<56x7xf32>
    %145 = arith.mulf %144, %143 : vector<56x7xf32>
    %146 = arith.addf %136, %145 : vector<56x7xf32>
    %c4_113 = arith.constant 4 : index
    %c0_114 = arith.constant 0 : index
    %c0_115 = arith.constant 0 : index
    %147 = vector.load %arg10[%c4_113, %c0_114, %c0_115] : memref<7x56x8xbf16, #tpu.memory_space<vmem>>, vector<1x56x8xbf16>
    %148 = vector.shape_cast %147 : vector<1x56x8xbf16> to vector<56x8xbf16>
    %cst_116 = arith.constant dense<0.000000e+00> : vector<56x1xf32>
    %149 = tpu.matmul %148, %104, %cst_116 {dimension_numbers = #tpu.dot_dimension_numbers<[1], [0], [0], [1], [0, 0, 1, 1], [], []>} : vector<56x8xbf16>, vector<8x1xbf16>, vector<56x1xf32> -> vector<56x1xf32>
    %c4_i32 = arith.constant 4 : i32
    %150 = vector.broadcast %c4_i32 : i32 to vector<56x7xi32>
    %151 = arith.cmpi eq, %105, %150 : vector<56x7xi32>
    %152 = arith.extui %151 : vector<56x7xi1> to vector<56x7xi32>
    %153 = arith.sitofp %152 : vector<56x7xi32> to vector<56x7xf32>
    %154 = vector.broadcast %149 : vector<56x1xf32> to vector<56x7xf32>
    %155 = arith.mulf %154, %153 : vector<56x7xf32>
    %156 = arith.addf %146, %155 : vector<56x7xf32>
    %c5_117 = arith.constant 5 : index
    %c0_118 = arith.constant 0 : index
    %c0_119 = arith.constant 0 : index
    %157 = vector.load %arg10[%c5_117, %c0_118, %c0_119] : memref<7x56x8xbf16, #tpu.memory_space<vmem>>, vector<1x56x8xbf16>
    %158 = vector.shape_cast %157 : vector<1x56x8xbf16> to vector<56x8xbf16>
    %cst_120 = arith.constant dense<0.000000e+00> : vector<56x1xf32>
    %159 = tpu.matmul %158, %104, %cst_120 {dimension_numbers = #tpu.dot_dimension_numbers<[1], [0], [0], [1], [0, 0, 1, 1], [], []>} : vector<56x8xbf16>, vector<8x1xbf16>, vector<56x1xf32> -> vector<56x1xf32>
    %c5_i32 = arith.constant 5 : i32
    %160 = vector.broadcast %c5_i32 : i32 to vector<56x7xi32>
    %161 = arith.cmpi eq, %105, %160 : vector<56x7xi32>
    %162 = arith.extui %161 : vector<56x7xi1> to vector<56x7xi32>
    %163 = arith.sitofp %162 : vector<56x7xi32> to vector<56x7xf32>
    %164 = vector.broadcast %159 : vector<56x1xf32> to vector<56x7xf32>
    %165 = arith.mulf %164, %163 : vector<56x7xf32>
    %166 = arith.addf %156, %165 : vector<56x7xf32>
    %c6_121 = arith.constant 6 : index
    %c0_122 = arith.constant 0 : index
    %c0_123 = arith.constant 0 : index
    %167 = vector.load %arg10[%c6_121, %c0_122, %c0_123] : memref<7x56x8xbf16, #tpu.memory_space<vmem>>, vector<1x56x8xbf16>
    %168 = vector.shape_cast %167 : vector<1x56x8xbf16> to vector<56x8xbf16>
    %cst_124 = arith.constant dense<0.000000e+00> : vector<56x1xf32>
    %169 = tpu.matmul %168, %104, %cst_124 {dimension_numbers = #tpu.dot_dimension_numbers<[1], [0], [0], [1], [0, 0, 1, 1], [], []>} : vector<56x8xbf16>, vector<8x1xbf16>, vector<56x1xf32> -> vector<56x1xf32>
    %c6_i32 = arith.constant 6 : i32
    %170 = vector.broadcast %c6_i32 : i32 to vector<56x7xi32>
    %171 = arith.cmpi eq, %105, %170 : vector<56x7xi32>
    %172 = arith.extui %171 : vector<56x7xi1> to vector<56x7xi32>
    %173 = arith.sitofp %172 : vector<56x7xi32> to vector<56x7xf32>
    %174 = vector.broadcast %169 : vector<56x1xf32> to vector<56x7xf32>
    %175 = arith.mulf %174, %173 : vector<56x7xf32>
    %176 = arith.addf %166, %175 : vector<56x7xf32>
    %177 = arith.truncf %176 : vector<56x7xf32> to vector<56x7xbf16>
    %c0_125 = arith.constant 0 : index
    %c0_126 = arith.constant 0 : index
    %c0_127 = arith.constant 0 : index
    %178 = vector.load %arg12[%c0_125, %c0_126, %c0_127] : memref<4x56x56xbf16, #tpu.memory_space<vmem>>, vector<1x56x56xbf16>
    %179 = vector.shape_cast %178 : vector<1x56x56xbf16> to vector<56x56xbf16>
    %cst_128 = arith.constant dense<0.000000e+00> : vector<56x7xf32>
    %180 = tpu.matmul %179, %177, %cst_128 {dimension_numbers = #tpu.dot_dimension_numbers<[1], [0], [0], [1], [0, 0, 1, 1], [], []>} : vector<56x56xbf16>, vector<56x7xbf16>, vector<56x7xf32> -> vector<56x7xf32>
    %c0_129 = arith.constant 0 : index
    %c0_130 = arith.constant 0 : index
    %c0_131 = arith.constant 0 : index
    %181 = vector.load %arg13[%c0_129, %c0_130, %c0_131] : memref<4x7x14xf32, #tpu.memory_space<vmem>>, vector<1x7x14xf32>
    %182 = vector.shape_cast %181 : vector<1x7x14xf32> to vector<7x14xf32>
    %cst_132 = arith.constant dense<0.000000e+00> : vector<56x14xf32>
    %183 = tpu.matmul %180, %182, %cst_132 {dimension_numbers = #tpu.dot_dimension_numbers<[1], [0], [0], [1], [0, 0, 1, 1], [], []>} : vector<56x7xf32>, vector<7x14xf32>, vector<56x14xf32> -> vector<56x14xf32>
    %c1_133 = arith.constant 1 : index
    %c0_134 = arith.constant 0 : index
    %c0_135 = arith.constant 0 : index
    %184 = vector.load %arg12[%c1_133, %c0_134, %c0_135] : memref<4x56x56xbf16, #tpu.memory_space<vmem>>, vector<1x56x56xbf16>
    %185 = vector.shape_cast %184 : vector<1x56x56xbf16> to vector<56x56xbf16>
    %cst_136 = arith.constant dense<0.000000e+00> : vector<56x7xf32>
    %186 = tpu.matmul %185, %177, %cst_136 {dimension_numbers = #tpu.dot_dimension_numbers<[1], [0], [0], [1], [0, 0, 1, 1], [], []>} : vector<56x56xbf16>, vector<56x7xbf16>, vector<56x7xf32> -> vector<56x7xf32>
    %c1_137 = arith.constant 1 : index
    %c0_138 = arith.constant 0 : index
    %c0_139 = arith.constant 0 : index
    %187 = vector.load %arg13[%c1_137, %c0_138, %c0_139] : memref<4x7x14xf32, #tpu.memory_space<vmem>>, vector<1x7x14xf32>
    %188 = vector.shape_cast %187 : vector<1x7x14xf32> to vector<7x14xf32>
    %cst_140 = arith.constant dense<0.000000e+00> : vector<56x14xf32>
    %189 = tpu.matmul %186, %188, %cst_140 {dimension_numbers = #tpu.dot_dimension_numbers<[1], [0], [0], [1], [0, 0, 1, 1], [], []>} : vector<56x7xf32>, vector<7x14xf32>, vector<56x14xf32> -> vector<56x14xf32>
    %190 = arith.addf %183, %189 : vector<56x14xf32>
    %c2_141 = arith.constant 2 : index
    %c0_142 = arith.constant 0 : index
    %c0_143 = arith.constant 0 : index
    %191 = vector.load %arg12[%c2_141, %c0_142, %c0_143] : memref<4x56x56xbf16, #tpu.memory_space<vmem>>, vector<1x56x56xbf16>
    %192 = vector.shape_cast %191 : vector<1x56x56xbf16> to vector<56x56xbf16>
    %cst_144 = arith.constant dense<0.000000e+00> : vector<56x7xf32>
    %193 = tpu.matmul %192, %177, %cst_144 {dimension_numbers = #tpu.dot_dimension_numbers<[1], [0], [0], [1], [0, 0, 1, 1], [], []>} : vector<56x56xbf16>, vector<56x7xbf16>, vector<56x7xf32> -> vector<56x7xf32>
    %c2_145 = arith.constant 2 : index
    %c0_146 = arith.constant 0 : index
    %c0_147 = arith.constant 0 : index
    %194 = vector.load %arg13[%c2_145, %c0_146, %c0_147] : memref<4x7x14xf32, #tpu.memory_space<vmem>>, vector<1x7x14xf32>
    %195 = vector.shape_cast %194 : vector<1x7x14xf32> to vector<7x14xf32>
    %cst_148 = arith.constant dense<0.000000e+00> : vector<56x14xf32>
    %196 = tpu.matmul %193, %195, %cst_148 {dimension_numbers = #tpu.dot_dimension_numbers<[1], [0], [0], [1], [0, 0, 1, 1], [], []>} : vector<56x7xf32>, vector<7x14xf32>, vector<56x14xf32> -> vector<56x14xf32>
    %197 = arith.addf %190, %196 : vector<56x14xf32>
    %c3_149 = arith.constant 3 : index
    %c0_150 = arith.constant 0 : index
    %c0_151 = arith.constant 0 : index
    %198 = vector.load %arg12[%c3_149, %c0_150, %c0_151] : memref<4x56x56xbf16, #tpu.memory_space<vmem>>, vector<1x56x56xbf16>
    %199 = vector.shape_cast %198 : vector<1x56x56xbf16> to vector<56x56xbf16>
    %cst_152 = arith.constant dense<0.000000e+00> : vector<56x7xf32>
    %200 = tpu.matmul %199, %177, %cst_152 {dimension_numbers = #tpu.dot_dimension_numbers<[1], [0], [0], [1], [0, 0, 1, 1], [], []>} : vector<56x56xbf16>, vector<56x7xbf16>, vector<56x7xf32> -> vector<56x7xf32>
    %c3_153 = arith.constant 3 : index
    %c0_154 = arith.constant 0 : index
    %c0_155 = arith.constant 0 : index
    %201 = vector.load %arg13[%c3_153, %c0_154, %c0_155] : memref<4x7x14xf32, #tpu.memory_space<vmem>>, vector<1x7x14xf32>
    %202 = vector.shape_cast %201 : vector<1x7x14xf32> to vector<7x14xf32>
    %cst_156 = arith.constant dense<0.000000e+00> : vector<56x14xf32>
    %203 = tpu.matmul %200, %202, %cst_156 {dimension_numbers = #tpu.dot_dimension_numbers<[1], [0], [0], [1], [0, 0, 1, 1], [], []>} : vector<56x7xf32>, vector<7x14xf32>, vector<56x14xf32> -> vector<56x14xf32>
    %204 = arith.addf %197, %203 : vector<56x14xf32>
    %c0_157 = arith.constant 0 : index
    %c0_158 = arith.constant 0 : index
    %205 = vector.load %arg14[%c0_157, %c0_158] : memref<56x1xf32, #tpu.memory_space<vmem>>, vector<56x1xf32>
    %206 = vector.broadcast %205 : vector<56x1xf32> to vector<56x14xf32>
    %207 = arith.addf %204, %206 : vector<56x14xf32>
    %cst_159 = arith.constant 0.000000e+00 : f32
    %208 = vector.broadcast %cst_159 : f32 to vector<56x14xf32>
    %209 = arith.maximumf %207, %208 : vector<56x14xf32>
    %210 = arith.truncf %209 : vector<56x14xf32> to vector<56x14xbf16>
    %c0_160 = arith.constant 0 : index
    %c0_161 = arith.constant 0 : index
    %c0_162 = arith.constant 0 : index
    %211 = vector.load %arg15[%c0_160, %c0_161, %c0_162] : memref<4x28x56xbf16, #tpu.memory_space<vmem>>, vector<1x28x56xbf16>
    %212 = vector.shape_cast %211 : vector<1x28x56xbf16> to vector<28x56xbf16>
    %cst_163 = arith.constant dense<0.000000e+00> : vector<28x14xf32>
    %213 = tpu.matmul %212, %210, %cst_163 {dimension_numbers = #tpu.dot_dimension_numbers<[1], [0], [0], [1], [0, 0, 1, 1], [], []>} : vector<28x56xbf16>, vector<56x14xbf16>, vector<28x14xf32> -> vector<28x14xf32>
    %c0_164 = arith.constant 0 : index
    %c0_165 = arith.constant 0 : index
    %c0_166 = arith.constant 0 : index
    %214 = vector.load %arg16[%c0_164, %c0_165, %c0_166] : memref<4x14x28xf32, #tpu.memory_space<vmem>>, vector<1x14x28xf32>
    %215 = vector.shape_cast %214 : vector<1x14x28xf32> to vector<14x28xf32>
    %cst_167 = arith.constant dense<0.000000e+00> : vector<28x28xf32>
    %216 = tpu.matmul %213, %215, %cst_167 {dimension_numbers = #tpu.dot_dimension_numbers<[1], [0], [0], [1], [0, 0, 1, 1], [], []>} : vector<28x14xf32>, vector<14x28xf32>, vector<28x28xf32> -> vector<28x28xf32>
    %c1_168 = arith.constant 1 : index
    %c0_169 = arith.constant 0 : index
    %c0_170 = arith.constant 0 : index
    %217 = vector.load %arg15[%c1_168, %c0_169, %c0_170] : memref<4x28x56xbf16, #tpu.memory_space<vmem>>, vector<1x28x56xbf16>
    %218 = vector.shape_cast %217 : vector<1x28x56xbf16> to vector<28x56xbf16>
    %cst_171 = arith.constant dense<0.000000e+00> : vector<28x14xf32>
    %219 = tpu.matmul %218, %210, %cst_171 {dimension_numbers = #tpu.dot_dimension_numbers<[1], [0], [0], [1], [0, 0, 1, 1], [], []>} : vector<28x56xbf16>, vector<56x14xbf16>, vector<28x14xf32> -> vector<28x14xf32>
    %c1_172 = arith.constant 1 : index
    %c0_173 = arith.constant 0 : index
    %c0_174 = arith.constant 0 : index
    %220 = vector.load %arg16[%c1_172, %c0_173, %c0_174] : memref<4x14x28xf32, #tpu.memory_space<vmem>>, vector<1x14x28xf32>
    %221 = vector.shape_cast %220 : vector<1x14x28xf32> to vector<14x28xf32>
    %cst_175 = arith.constant dense<0.000000e+00> : vector<28x28xf32>
    %222 = tpu.matmul %219, %221, %cst_175 {dimension_numbers = #tpu.dot_dimension_numbers<[1], [0], [0], [1], [0, 0, 1, 1], [], []>} : vector<28x14xf32>, vector<14x28xf32>, vector<28x28xf32> -> vector<28x28xf32>
    %223 = arith.addf %216, %222 : vector<28x28xf32>
    %c2_176 = arith.constant 2 : index
    %c0_177 = arith.constant 0 : index
    %c0_178 = arith.constant 0 : index
    %224 = vector.load %arg15[%c2_176, %c0_177, %c0_178] : memref<4x28x56xbf16, #tpu.memory_space<vmem>>, vector<1x28x56xbf16>
    %225 = vector.shape_cast %224 : vector<1x28x56xbf16> to vector<28x56xbf16>
    %cst_179 = arith.constant dense<0.000000e+00> : vector<28x14xf32>
    %226 = tpu.matmul %225, %210, %cst_179 {dimension_numbers = #tpu.dot_dimension_numbers<[1], [0], [0], [1], [0, 0, 1, 1], [], []>} : vector<28x56xbf16>, vector<56x14xbf16>, vector<28x14xf32> -> vector<28x14xf32>
    %c2_180 = arith.constant 2 : index
    %c0_181 = arith.constant 0 : index
    %c0_182 = arith.constant 0 : index
    %227 = vector.load %arg16[%c2_180, %c0_181, %c0_182] : memref<4x14x28xf32, #tpu.memory_space<vmem>>, vector<1x14x28xf32>
    %228 = vector.shape_cast %227 : vector<1x14x28xf32> to vector<14x28xf32>
    %cst_183 = arith.constant dense<0.000000e+00> : vector<28x28xf32>
    %229 = tpu.matmul %226, %228, %cst_183 {dimension_numbers = #tpu.dot_dimension_numbers<[1], [0], [0], [1], [0, 0, 1, 1], [], []>} : vector<28x14xf32>, vector<14x28xf32>, vector<28x28xf32> -> vector<28x28xf32>
    %230 = arith.addf %223, %229 : vector<28x28xf32>
    %c3_184 = arith.constant 3 : index
    %c0_185 = arith.constant 0 : index
    %c0_186 = arith.constant 0 : index
    %231 = vector.load %arg15[%c3_184, %c0_185, %c0_186] : memref<4x28x56xbf16, #tpu.memory_space<vmem>>, vector<1x28x56xbf16>
    %232 = vector.shape_cast %231 : vector<1x28x56xbf16> to vector<28x56xbf16>
    %cst_187 = arith.constant dense<0.000000e+00> : vector<28x14xf32>
    %233 = tpu.matmul %232, %210, %cst_187 {dimension_numbers = #tpu.dot_dimension_numbers<[1], [0], [0], [1], [0, 0, 1, 1], [], []>} : vector<28x56xbf16>, vector<56x14xbf16>, vector<28x14xf32> -> vector<28x14xf32>
    %c3_188 = arith.constant 3 : index
    %c0_189 = arith.constant 0 : index
    %c0_190 = arith.constant 0 : index
    %234 = vector.load %arg16[%c3_188, %c0_189, %c0_190] : memref<4x14x28xf32, #tpu.memory_space<vmem>>, vector<1x14x28xf32>
    %235 = vector.shape_cast %234 : vector<1x14x28xf32> to vector<14x28xf32>
    %cst_191 = arith.constant dense<0.000000e+00> : vector<28x28xf32>
    %236 = tpu.matmul %233, %235, %cst_191 {dimension_numbers = #tpu.dot_dimension_numbers<[1], [0], [0], [1], [0, 0, 1, 1], [], []>} : vector<28x14xf32>, vector<14x28xf32>, vector<28x28xf32> -> vector<28x28xf32>
    %237 = arith.addf %230, %236 : vector<28x28xf32>
    %c0_192 = arith.constant 0 : index
    %c0_193 = arith.constant 0 : index
    %238 = vector.load %arg17[%c0_192, %c0_193] : memref<28x1xf32, #tpu.memory_space<vmem>>, vector<28x1xf32>
    %239 = vector.broadcast %238 : vector<28x1xf32> to vector<28x28xf32>
    %240 = arith.addf %237, %239 : vector<28x28xf32>
    %241 = math.tanh %240 : vector<28x28xf32>
    %c0_194 = arith.constant 0 : index
    %c0_195 = arith.constant 0 : index
    %c0_196 = arith.constant 0 : index
    %242 = vector.load %arg18[%c0_194, %c0_195, %c0_196] : memref<1x28x28xf32, #tpu.memory_space<vmem>>, vector<1x28x28xf32>
    %243 = vector.shape_cast %242 : vector<1x28x28xf32> to vector<28x28xf32>
    %244 = vector.shape_cast %241 : vector<28x28xf32> to vector<1x28x28xf32>
    tpu.vector_store %arg18[%c0_194, %c0_195, %c0_196], %244 {strides = array<i32>} : memref<1x28x28xf32, #tpu.memory_space<vmem>>, vector<1x28x28xf32>,
    return
  }
  func.func @transform_0(%arg0: i32) -> (i32, i32, i32) {
    %c0_i32 = arith.constant 0 : i32
    %c0_i32_0 = arith.constant 0 : i32
    %c0_i32_1 = arith.constant 0 : i32
    return %arg0, %c0_i32, %c0_i32_0 : i32, i32, i32
  }
  func.func @transform_1(%arg0: i32) -> (i32, i32, i32) {
    %c0_i32 = arith.constant 0 : i32
    %c0_i32_0 = arith.constant 0 : i32
    %c0_i32_1 = arith.constant 0 : i32
    %c0_i32_2 = arith.constant 0 : i32
    return %c0_i32, %c0_i32_0, %c0_i32_1 : i32, i32, i32
  }
  func.func @transform_2(%arg0: i32) -> (i32, i32, i32) {
    %c0_i32 = arith.constant 0 : i32
    %c0_i32_0 = arith.constant 0 : i32
    %c0_i32_1 = arith.constant 0 : i32
    %c0_i32_2 = arith.constant 0 : i32
    return %c0_i32, %c0_i32_0, %c0_i32_1 : i32, i32, i32
  }
  func.func @transform_3(%arg0: i32) -> (i32, i32) {
    %c0_i32 = arith.constant 0 : i32
    %c0_i32_0 = arith.constant 0 : i32
    %c0_i32_1 = arith.constant 0 : i32
    return %c0_i32, %c0_i32_0 : i32, i32
  }
  func.func @transform_4(%arg0: i32) -> (i32, i32, i32) {
    %c0_i32 = arith.constant 0 : i32
    %c0_i32_0 = arith.constant 0 : i32
    %c0_i32_1 = arith.constant 0 : i32
    %c0_i32_2 = arith.constant 0 : i32
    return %c0_i32, %c0_i32_0, %c0_i32_1 : i32, i32, i32
  }
  func.func @transform_5(%arg0: i32) -> (i32, i32, i32) {
    %c0_i32 = arith.constant 0 : i32
    %c0_i32_0 = arith.constant 0 : i32
    %c0_i32_1 = arith.constant 0 : i32
    %c0_i32_2 = arith.constant 0 : i32
    return %c0_i32, %c0_i32_0, %c0_i32_1 : i32, i32, i32
  }
  func.func @transform_6(%arg0: i32) -> (i32, i32) {
    %c0_i32 = arith.constant 0 : i32
    %c0_i32_0 = arith.constant 0 : i32
    %c0_i32_1 = arith.constant 0 : i32
    return %c0_i32, %c0_i32_0 : i32, i32
  }
  func.func @transform_7(%arg0: i32) -> (i32, i32, i32) {
    %c0_i32 = arith.constant 0 : i32
    %c0_i32_0 = arith.constant 0 : i32
    %c0_i32_1 = arith.constant 0 : i32
    %c0_i32_2 = arith.constant 0 : i32
    return %c0_i32, %c0_i32_0, %c0_i32_1 : i32, i32, i32
  }
  func.func @transform_8(%arg0: i32) -> (i32, i32) {
    %c0_i32 = arith.constant 0 : i32
    %c0_i32_0 = arith.constant 0 : i32
    %c0_i32_1 = arith.constant 0 : i32
    return %c0_i32, %c0_i32_0 : i32, i32
  }
  func.func @transform_9(%arg0: i32) -> (i32, i32, i32) {
    %c0_i32 = arith.constant 0 : i32
    %c0_i32_0 = arith.constant 0 : i32
    %c0_i32_1 = arith.constant 0 : i32
    %c0_i32_2 = arith.constant 0 : i32
    return %c0_i32, %c0_i32_0, %c0_i32_1 : i32, i32, i32
  }
  func.func @transform_10(%arg0: i32) -> (i32, i32) {
    %c0_i32 = arith.constant 0 : i32
    %c0_i32_0 = arith.constant 0 : i32
    %c0_i32_1 = arith.constant 0 : i32
    return %c0_i32, %c0_i32_0 : i32, i32
  }
  func.func @transform_11(%arg0: i32) -> (i32, i32, i32) {
    %c0_i32 = arith.constant 0 : i32
    %c0_i32_0 = arith.constant 0 : i32
    %c0_i32_1 = arith.constant 0 : i32
    %c0_i32_2 = arith.constant 0 : i32
    return %c0_i32, %c0_i32_0, %c0_i32_1 : i32, i32, i32
  }
  func.func @transform_12(%arg0: i32) -> (i32, i32, i32) {
    %c0_i32 = arith.constant 0 : i32
    %c0_i32_0 = arith.constant 0 : i32
    %c0_i32_1 = arith.constant 0 : i32
    %c0_i32_2 = arith.constant 0 : i32
    return %c0_i32, %c0_i32_0, %c0_i32_1 : i32, i32, i32
  }
  func.func @transform_13(%arg0: i32) -> (i32, i32) {
    %c0_i32 = arith.constant 0 : i32
    %c0_i32_0 = arith.constant 0 : i32
    %c0_i32_1 = arith.constant 0 : i32
    return %c0_i32, %c0_i32_0 : i32, i32
  }
  func.func @transform_14(%arg0: i32) -> (i32, i32, i32) {
    %c0_i32 = arith.constant 0 : i32
    %c0_i32_0 = arith.constant 0 : i32
    %c0_i32_1 = arith.constant 0 : i32
    %c0_i32_2 = arith.constant 0 : i32
    return %c0_i32, %c0_i32_0, %c0_i32_1 : i32, i32, i32
  }
  func.func @transform_15(%arg0: i32) -> (i32, i32, i32) {
    %c0_i32 = arith.constant 0 : i32
    %c0_i32_0 = arith.constant 0 : i32
    %c0_i32_1 = arith.constant 0 : i32
    %c0_i32_2 = arith.constant 0 : i32
    return %c0_i32, %c0_i32_0, %c0_i32_1 : i32, i32, i32
  }
  func.func @transform_16(%arg0: i32) -> (i32, i32) {
    %c0_i32 = arith.constant 0 : i32
    %c0_i32_0 = arith.constant 0 : i32
    %c0_i32_1 = arith.constant 0 : i32
    return %c0_i32, %c0_i32_0 : i32, i32
  }
  func.func @transform_17(%arg0: i32) -> (i32, i32, i32) {
    %c0_i32 = arith.constant 0 : i32
    %c0_i32_0 = arith.constant 0 : i32
    %c0_i32_1 = arith.constant 0 : i32
    return %arg0, %c0_i32, %c0_i32_0 : i32, i32, i32
  }
}

</mosaic_0001>

<bundles_post_ra>
// kernel: autoencoder_forward.1
= control target key start
LH: loop header
LB: loop body
LE: loop exit
PB: predicated region body
PF: predicated region fallthrough
CT: control target
= control target key end

     0   :  { %s7711_s24 = smov 0   ;;  %s9041_s0 = inlined_call_operand.vmem [shape: bf16[2,28,28], index: 0, kind: input, shape index: {}]   ;;  %s9042_s1 = inlined_call_operand.vmem [shape: bf16[4,56,28], index: 1, kind: input, shape index: {}]   ;;  %s9043_s2 = inlined_call_operand.vmem [shape: f32[4,28,14], index: 2, kind: input, shape index: {}]   ;;  %s9044_s3 = inlined_call_operand.vmem [shape: f32[56,1], index: 3, kind: input, shape index: {}]   ;;  %s9045_s4 = inlined_call_operand.vmem [shape: bf16[4,56,56], index: 4, kind: input, shape index: {}]   ;;  %s9046_s5 = inlined_call_operand.vmem [shape: f32[4,14,7], index: 5, kind: input, shape index: {}]   ;;  %s9047_s6 = inlined_call_operand.vmem [shape: f32[56,1], index: 6, kind: input, shape index: {}]   ;;  %s9048_s7 = inlined_call_operand.vmem [shape: bf16[7,8,56], index: 7, kind: input, shape index: {}]   ;;  %s9049_s8 = inlined_call_operand.vmem [shape: f32[8,1], index: 8, kind: input, shape index: {}]   ;;  %s9050_s9 = inlined_call_operand.vmem [shape: bf16[7,56,8], index: 9, kind: input, shape index: {}]   ;;  %s9051_s10 = inlined_call_operand.vmem [shape: f32[56,7], index: 10, kind: input, shape index: {}]   ;;  %s9052_s11 = inlined_call_operand.vmem [shape: bf16[4,56,56], index: 11, kind: input, shape index: {}]   ;;  %s9053_s12 = inlined_call_operand.vmem [shape: f32[4,7,14], index: 12, kind: input, shape index: {}]   ;;  %s9054_s13 = inlined_call_operand.vmem [shape: f32[56,1], index: 13, kind: input, shape index: {}]   ;;  %s9055_s14 = inlined_call_operand.vmem [shape: bf16[4,28,56], index: 14, kind: input, shape index: {}]   ;;  %s9056_s15 = inlined_call_operand.vmem [shape: f32[4,14,28], index: 15, kind: input, shape index: {}]   ;;  %s9057_s16 = inlined_call_operand.vmem [shape: f32[28,1], index: 16, kind: input, shape index: {}]   ;;  %s9058_s17 = inlined_call_operand.vmem [shape: f32[2,28,28], index: 17, kind: output, shape index: {}]  }
   0x1   :  { %9060 = sst [smem:[#allocation2_spill]] %s9041_s0 }
   0x2   :  { %9061 = sst [smem:[#allocation3_spill]] %s9042_s1 }
   0x3 LB: > { %s5850_s25 = sadd.s32 4294967295, %s7608_s24   ;;  %p5854_p0 = scmp.ge.s32.totalorder %s7608_s24, 1  ;;  %s7608_s24 = sphi %s7711_s24, %s27_s24  }
   0x4   : > { %p487_p1 = scmp.lt.s32.totalorder %s7608_s24, 3 }
   0x6   : > { %p488_p2 = pnand %p5854_p0, %p487_p1 }
   0x7   : > { %p539_p3 = scmp.lt.s32.totalorder (!%p488_p2), %s5850_s25, 1  ;;  %s9062_s28 = sld [smem:[#allocation3_spill]] (!%p488_p2)  ;;  %vm590_vm0 = vcmask (!%p488_p2), 228352   ;;  %vm603_vm1 = vcmask (!%p488_p2), 1045504   ;;  %vm803_vm2 = vcmask (!%p488_p2), 1043456   ;;  %v5884_v7 = vld [vmem:[%s9043_s2 + $0x20] sm:$0xff] (!%p488_p2) }
   0x8   : > { %491 = sbr.rel (%p488_p2) target bundleno = 3566 (0xdee), region = 88  ;;  %s9063_s1 = sld [smem:[#allocation2_spill]] (!%p488_p2)  ;;  %v5885_v8 = vld [vmem:[%s9043_s2 + $0x28] sm:$0xff] (!%p488_p2)  ;;  %v671_v9 = vld [vmem:[%s9043_s2] sm:$0xff] (!%p488_p2)  ;;  %vm7610_vm3 = vmmov (!%p488_p2), 1   ;;  %v5886_v14 = vld [vmem:[%s9043_s2 + $0x30] sm:$0xff] (!%p488_p2) }
   0x9   : > { %v672_v10 = vld [vmem:[%s9043_s2 + $0x8] sm:$0xff] (!%p488_p2)  ;;  %vm7775_vm4 = vmpackc.low (!%p488_p2), %vm803_vm2, %vm7610_vm3  ;;  %v5887_v15 = vld [vmem:[%s9043_s2 + $0x38] sm:$0xf] (!%p488_p2)  ;;  %v7611_v18 = vmov (!%p488_p2), 0.0|0.0   ;;  %v7358_v19 = vpack.c.bf16 (!%p488_p2), %v5885_v8, %v5884_v7  ;;  %vm7612_vm5 = vmmov (!%p488_p2), 0   ;;  %v7613_v25 = vmov (!%p488_p2), 0.0  }
   0xa   : > { %v673_v16 = vld [vmem:[%s9043_s2 + $0x10] sm:$0xff] (!%p488_p2)  ;;  %v674_v17 = vld [vmem:[%s9043_s2 + $0x18] sm:$0xf] (!%p488_p2)  ;;  %v7365_v20 = vpack.c.bf16 (!%p488_p2), %v672_v10, %v671_v9  ;;  %v7361_v23 = vpack.c.bf16 (!%p488_p2), %v5887_v15, %v5886_v14  ;;  %v5919_v50 = vld [vmem:[%s9043_s2 + $0x40] sm:$0xff] (!%p488_p2)  ;;  %v7614_v58 = vmov (!%p488_p2), 0   ;;  %vm1592_vm7 = vcmask (!%p488_p2), 457728  }
   0xb   : > { %v7368_v24 = vpack.c.bf16 (!%p488_p2), %v674_v17, %v673_v16  ;;  %v5920_v51 = vld [vmem:[%s9043_s2 + $0x48] sm:$0xff] (!%p488_p2)  ;;  %v5921_v53 = vld [vmem:[%s9043_s2 + $0x50] sm:$0xff] (!%p488_p2)  ;;  %v5922_v54 = vld [vmem:[%s9043_s2 + $0x58] sm:$0xf] (!%p488_p2)  ;;  %7506 = vset.pattern.permute.xlu0 (!%p488_p2), %v7614_v58  ;;  %7507 = vset.pattern.permute.xlu1 (!%p488_p2), %v7614_v58  ;;  %vm1779_vm8 = vcmask (!%p488_p2), 113664   ;;  %s7615_s27 = smov (!%p488_p2), 127  }
   0xc   : > { %v7372_v52 = vpack.c.bf16 (!%p488_p2), %v5920_v51, %v5919_v50  ;;  %v7375_v55 = vpack.c.bf16 (!%p488_p2), %v5922_v54, %v5921_v53  ;;  %v1507_v56 = vld [vmem:[%s9044_s3] sm:$0xff] (!%p488_p2)  ;;  %v1509_v57 = vld [vmem:[%s9044_s3 + $0x10] sm:$0xff] (!%p488_p2)  ;;  %v1508_v59 = vld [vmem:[%s9044_s3 + $0x8] sm:$0xff] (!%p488_p2)  ;;  %s7616_s29 = smov (!%p488_p2), 126   ;;  %s7617_s18 = smov (!%p488_p2), 125   ;;  %vm3008_vm9 = vcmask (!%p488_p2), 64512  }
   0xd   : > { %v7510_v0 = vld [vmem:[%s9062_s28] sm:$0xff] (!%p488_p2)   ;;  %v7512_v5 = vld [vmem:[%s9062_s28 + $0x8] sm:$0xff] (!%p488_p2)   ;;  %v7516_v12 = vld [vmem:[%s9062_s28 + $0x10] sm:$0xff] (!%p488_p2)   ;;  %1516 = vperm.xlu0 (!%p488_p2), %7506, %v1507_v56   ;;  %1526 = vperm.xlu1 (!%p488_p2), %7507, %v1509_v57   ;;  %s7618_s19 = smov (!%p488_p2), 124  }
   0xe   : > { %v7511_v1 = vld [vmem:[%s9062_s28 + $0x1c] sm:$0xff] (!%p488_p2)   ;;  %6635 = vmatprep.mubr.msk.bf16.mxu0 (!%p488_p2), %vm590_vm0, %v7510_v0  ;;  %v7513_v6 = vld [vmem:[%s9062_s28 + $0x24] sm:$0xff] (!%p488_p2)   ;;  %v7514_v11 = vld [vmem:[%s9062_s28 + $0x2c] sm:$0xff] (!%p488_p2)  }
   0xf   : > { %s9069_s25 = smov (!%p539_p3, %s5850_s25), 1  ;;  %6647 = vmatprep.mubr.msk.bf16.mxu1 %vm590_vm0, %v7511_v1  ;;  %v7515_v21 = vld [vmem:[%s9062_s28 + $0x34] ss:$0 sps:$4 sm:$0xff]   ;;  %v7517_v22 = vld [vmem:[%s9062_s28 + $0x18] ss:$0 sps:$4 sm:$0xff]   ;;  %v7519_v43 = vld [vmem:[%s9062_s28 + $0x40] sm:$0xff]  }
  0x10   : > { %s6311_s30 = sshll.u32 %s9069_s25, 4  ;;  %v7518_v42 = vld [vmem:[%s9062_s28 + $0x38] sm:$0xff]   ;;  %v7520_v44 = vld [vmem:[%s9062_s28 + $0x48] sm:$0xff]   ;;  %v7521_v45 = vld [vmem:[%s9062_s28 + $0x50] ss:$0 sps:$4 sm:$0xff]  }
  0x11   : > { %s543_s20 = scalar_lea.vmem %s9063_s1, %s6311_s30  ;;  %v7522_v46 = vld [vmem:[%s9062_s28 + $0x54] sm:$0xff]   ;;  %v7523_v47 = vld [vmem:[%s9062_s28 + $0x5c] sm:$0xff]   ;;  %v7524_v48 = vld [vmem:[%s9062_s28 + $0x64] sm:$0xff]   ;;  %1521 = vperm.xlu0 %7506, %v1508_v59   ;;  %s7619_s1 = smov 123  }
  0x12   : > { %v7733_v2 = vld [vmem:[%s543_s20] sm:$0xff]   ;;  %v7735_v3 = vld [vmem:[%s543_s20 + $0x8] sm:$0x3f]   ;;  %v1510_v60 = vld [vmem:[%s9044_s3 + $0x18] sm:$0xff]  ;;  %s7620_s20 = smov 122  }
  0x13   : > { %6631 = vmatprep.subr.bf16.mxu0 %v7733_v2  ;;  %6643 = vmatprep.subr.bf16.mxu1 %v7733_v2  ;;  %v7747_v4 = vsel %vm603_vm1, %v7735_v3, 0  ;;  %v7525_v49 = vld [vmem:[%s9062_s28 + $0x6c] ss:$0 sps:$4 sm:$0xff]   ;;  %v1511_v61 = vld [vmem:[%s9044_s3 + $0x20] sm:$0xff]  ;;  %v1513_v63 = vld [vmem:[%s9044_s3 + $0x30] sm:$0xff] }
  0x14   : > { %6632 = vmatpush3.bf16.msra.mxu0 %v7733_v2  ;;  %6644 = vmatpush3.bf16.msra.mxu1 %v7733_v2  ;;  %v1512_v62 = vld [vmem:[%s9044_s3 + $0x28] sm:$0xff]  ;;  %v2500_v0 = vld [vmem:[%s9047_s6] sm:$0xff]  ;;  %v5949_v50 = vld [vmem:[%s9043_s2 + $0x78] sm:$0xf] }
  0x15   : > { %7464 = vmatprep.subr.msk.bf16.mxu0 %vm603_vm1, %v7735_v3  ;;  %7465 = vmatprep.subr.msk.bf16.mxu1 %vm603_vm1, %v7735_v3  ;;  %v2501_v1 = vld [vmem:[%s9047_s6 + $0x8] sm:$0xff]  ;;  %vm8032_vm6 = vmpackc.low %vm603_vm1, %vm7610_vm3  ;;  %vm4299_vm3 = vcmask 1046528  }
  0x16   : > { %1531 = vperm.xlu1 %7507, %v1510_v60   ;;  %1536 = vperm.xlu0 %7506, %v1511_v61  }
  0x18   : > { %6634 = vmatpush3.bf16.msra.mxu0 %v7747_v4  ;;  %6646 = vmatpush3.bf16.msra.mxu1 %v7747_v4 }
  0x19   : > { %7357 = vmatprep.subr.bf16.mxu0 %v7611_v18  ;;  %7364 = vmatprep.subr.bf16.mxu1 %v7611_v18 }
  0x1a   : > { %1541 = vperm.xlu1 %7507, %v1512_v62   ;;  %1546 = vperm.xlu0 %7506, %v1513_v63  }
  0x1b   : > { %6636 = vmatmul.mubr.msk.bf16.vlgmr.msra.gmra.mrb[0].mxu0 %vm590_vm0, %v7512_v5  ;;  %6648 = vmatmul.mubr.msk.bf16.vlgmr.msra.gmra.mrb[0].mxu1 %vm590_vm0, %v7513_v6  ;;  %v2505_v5 = vld [vmem:[%s9047_s6 + $0x28] sm:$0xff]  ;;  %v2506_v6 = vld [vmem:[%s9047_s6 + $0x30] sm:$0xff] }
  0x1c   : > { %6651 = vmatprep.mubr.msk.bf16.mxu1 %vm590_vm0, %v7514_v11  ;;  %6639 = vmatprep.mubr.msk.bf16.mxu0 %vm590_vm0, %v7516_v12 }
  0x1d   : > { %7359 = vmatpush3.bf16.msra.mxu0 %v7358_v19  ;;  %7366 = vmatpush3.bf16.msra.mxu1 %v7365_v20 }
  0x1e   : > { %7360 = vmatprep.subr.bf16.mxu0 %v7611_v18  ;;  %7367 = vmatprep.subr.bf16.mxu1 %v7611_v18 }
  0x1f   : > { %2509 = vperm.xlu1 %7507, %v2500_v0   ;;  %2514 = vperm.xlu0 %7506, %v2501_v1  }
  0x21   : > { %7363 = vmatpush3.bf16.msk.msra.mxu0 %vm7775_vm4, %v7361_v23  ;;  %7370 = vmatpush3.bf16.msk.msra.mxu1 %vm7775_vm4, %v7368_v24 }
  0x22   : > { %6713 = vmatprep.subr.bf16.mxu0 %v7733_v2  ;;  %7371 = vmatprep.subr.bf16.mxu1 %v7611_v18 }
  0x23   : > { %6652 = vmatmul.mubr.msk.bf16.gmra.mrb[4].mxu1 %vm590_vm0, %v7515_v21  ;;  %6640 = vmatmul.mubr.msk.bf16.gmra.mrb[4].mxu0 %vm590_vm0, %v7517_v22 }
  0x24   : > { %6663 = vmatprep.mubr.msk.f32.mxu0 %vm7612_vm5, %v7613_v25  ;;  %6692 = vmatprep.mubr.msk.f32.mxu1 %vm7612_vm5, %v7613_v25 }
  0xee   : > { %v6637_v26 = vpop.f32.mrb[0].mxu0  ;;  %v6649_v27 = vpop.f32.mrb[0].mxu1 }
  0xef   : > { %v641_v28 = vpop.f32.mrb[1].mxu0  ;;  %v747_v29 = vpop.f32.mrb[1].mxu1 }
  0xf0   : > { %v6650_v30 = vpop.f32.mrb[2].mxu1  ;;  %6664 = vmatmul.mubr.msk.f32.vlgmr.msra.gmra.mrb[8].mxu0 %vm590_vm0, %v747_v29  ;;  %6693 = vmatmul.mubr.msk.f32.vlgmr.msra.gmra.mrb[8].mxu1 %vm590_vm0, %v641_v28  ;;  %v6638_v31 = vpop.f32.mrb[2].mxu0 }
  0xf1   : > { %v750_v32 = vpop.f32.mrb[3].mxu1  ;;  %v644_v33 = vpop.f32.mrb[3].mxu0  ;;  %6666 = vmatprep.mubr.msk.f32.mxu0 %vm7612_vm5, %v7613_v25  ;;  %6695 = vmatprep.mubr.msk.f32.mxu1 %vm7612_vm5, %v7613_v25 }
  0xf2   : > { %6714 = vmatpush3.bf16.msra.mxu0 %v7733_v2  ;;  %7373 = vmatpush3.bf16.msra.mxu1 %v7372_v52 }
  0xf3   : > { %7466 = vmatprep.subr.msk.bf16.mxu0 %vm603_vm1, %v7735_v3  ;;  %7374 = vmatprep.subr.bf16.mxu1 %v7611_v18 }
  0xf4   : > { %6667 = vmatmul.mubr.msk.f32.gmra.mrb[10].mxu0 %vm590_vm0, %v750_v32  ;;  %6696 = vmatmul.mubr.msk.f32.gmra.mrb[10].mxu1 %vm590_vm0, %v644_v33 }
  0xf5   : > { %6669 = vmatprep.mubr.msk.f32.mxu0 %vm7612_vm5, %v7613_v25  ;;  %6698 = vmatprep.mubr.msk.f32.mxu1 %vm7612_vm5, %v7613_v25 }
  0xf6   : > { %v6653_v34 = vpop.f32.mrb[4].mxu1  ;;  %v6641_v35 = vpop.f32.mrb[4].mxu0  ;;  %6716 = vmatpush3.bf16.msra.mxu0 %v7747_v4  ;;  %7377 = vmatpush3.bf16.msk.msra.mxu1 %vm7775_vm4, %v7375_v55 }
  0xf7   : > { %v763_v36 = vpop.f32.mrb[5].mxu1  ;;  %v657_v37 = vpop.f32.mrb[5].mxu0  ;;  %6754 = vmatprep.subr.bf16.mxu0 %v7733_v2  ;;  %7378 = vmatprep.subr.bf16.mxu1 %v7611_v18 }
  0xf8   : > { %6670 = vmatmul.mubr.msk.f32.gmra.mrb[12].mxu0 %vm590_vm0, %v6649_v27  ;;  %6699 = vmatmul.mubr.msk.f32.gmra.mrb[12].mxu1 %vm590_vm0, %v6637_v26  ;;  %v6654_v38 = vpop.f32.mrb[6].mxu1  ;;  %v6642_v39 = vpop.f32.mrb[6].mxu0 }
  0xf9   : > { %6672 = vmatprep.mubr.msk.f32.mxu0 %vm7612_vm5, %v7613_v25  ;;  %6701 = vmatprep.mubr.msk.f32.mxu1 %vm7612_vm5, %v7613_v25  ;;  %v766_v40 = vpop.f32.mrb[7].mxu1  ;;  %v660_v41 = vpop.f32.mrb[7].mxu0 }
  0xfc   : > { %6673 = vmatmul.mubr.msk.f32.gmra.mrb[14].mxu0 %vm590_vm0, %v6650_v30  ;;  %6702 = vmatmul.mubr.msk.f32.gmra.mrb[14].mxu1 %vm590_vm0, %v6638_v31 }
  0xfd   : > { %6675 = vmatprep.mubr.msk.f32.mxu0 %vm7612_vm5, %v7613_v25  ;;  %6704 = vmatprep.mubr.msk.f32.mxu1 %vm7612_vm5, %v7613_v25 }
 0x100   : > { %6676 = vmatmul.mubr.msk.f32.gmra.mrb[16].mxu0 %vm590_vm0, %v763_v36  ;;  %6705 = vmatmul.mubr.msk.f32.gmra.mrb[16].mxu1 %vm590_vm0, %v657_v37 }
 0x101   : > { %6678 = vmatprep.mubr.msk.f32.mxu0 %vm7612_vm5, %v7613_v25  ;;  %6707 = vmatprep.mubr.msk.f32.mxu1 %vm7612_vm5, %v7613_v25 }
 0x104   : > { %6679 = vmatmul.mubr.msk.f32.gmra.mrb[18].mxu0 %vm590_vm0, %v766_v40  ;;  %6708 = vmatmul.mubr.msk.f32.gmra.mrb[18].mxu1 %vm590_vm0, %v660_v41 }
 0x105   : > { %6681 = vmatprep.mubr.msk.f32.mxu0 %vm7612_vm5, %v7613_v25  ;;  %6710 = vmatprep.mubr.msk.f32.mxu1 %vm7612_vm5, %v7613_v25 }
 0x108   : > { %6682 = vmatmul.mubr.msk.f32.gmra.mrb[20].mxu0 %vm590_vm0, %v6653_v34  ;;  %6711 = vmatmul.mubr.msk.f32.gmra.mrb[20].mxu1 %vm590_vm0, %v6641_v35 }
 0x109   : > { %6717 = vmatprep.mubr.msk.bf16.mxu0 %vm590_vm0, %v7518_v42  ;;  %6733 = vmatprep.mubr.msk.f32.mxu1 %vm7612_vm5, %v7613_v25  ;;  %v5946_v42 = vld [vmem:[%s9043_s2 + $0x60] sm:$0xff] }
 0x10c   : > { %6718 = vmatmul.mubr.msk.bf16.vlgmr.msra.gmra.mrb[24].mxu0 %vm590_vm0, %v7519_v43  ;;  %v5947_v43 = vld [vmem:[%s9043_s2 + $0x68] sm:$0xff] }
 0x10d   : > { %6721 = vmatprep.mubr.msk.bf16.mxu0 %vm590_vm0, %v7520_v44  ;;  %6755 = vmatpush3.bf16.msra.mxu0 %v7733_v2  ;;  %v2502_v2 = vld [vmem:[%s9047_s6 + $0x10] sm:$0xff] }
 0x10e   : > { %7467 = vmatprep.subr.msk.bf16.mxu0 %vm603_vm1, %v7735_v3  ;;  %2519 = vperm.xlu1 %7507, %v2502_v2   ;;  %v2503_v3 = vld [vmem:[%s9047_s6 + $0x18] sm:$0xff] }
 0x10f   : > { %2524 = vperm.xlu0 %7506, %v2503_v3   ;;  %v5981_v3 = vld [vmem:[%s9046_s5 + $0x10] sm:$0xff] }
 0x111   : > { %6757 = vmatpush3.bf16.msra.mxu0 %v7747_v4  ;;  %v2504_v4 = vld [vmem:[%s9047_s6 + $0x20] sm:$0xff] }
 0x112   : > { %2529 = vperm.xlu1 %7507, %v2504_v4   ;;  %v5982_v4 = vld [vmem:[%s9046_s5 + $0x18] sm:$0x3f] }
 0x113   : > { %2534 = vperm.xlu0 %7506, %v2505_v5   ;;  %v7386_v5 = vpack.c.bf16 %v5982_v4, %v5981_v3 }
 0x114   : > { %6722 = vmatmul.mubr.msk.bf16.gmra.mrb[28].mxu0 %vm590_vm0, %v7521_v45 }
 0x115   : > { %6758 = vmatprep.mubr.msk.bf16.mxu0 %vm590_vm0, %v7522_v46 }
 0x116   : > { %2539 = vperm.xlu1 %7507, %v2506_v6   ;;  %v7526_v6 = vld [vmem:[%s9045_s4] sm:$0xff]  }
 0x11c   : > { %6759 = vmatmul.mubr.msk.bf16.vlgmr.msra.gmra.mrb[32].mxu0 %vm590_vm0, %v7523_v47  ;;  %v7379_v47 = vpack.c.bf16 %v5947_v43, %v5946_v42 }
 0x11d   : > { %6762 = vmatprep.mubr.msk.bf16.mxu0 %vm590_vm0, %v7524_v48 }
 0x124   : > { %6763 = vmatmul.mubr.msk.bf16.gmra.mrb[36].mxu0 %vm590_vm0, %v7525_v49  ;;  %v5948_v49 = vld [vmem:[%s9043_s2 + $0x70] sm:$0xff] }
 0x125   : > { %v7382_v54 = vpack.c.bf16 %v5949_v50, %v5948_v49  ;;  %6803 = vmatprep.mubr.msk.bf16.mxu0 %vm1592_vm7, %v7526_v6 }
 0x1c3   : > { %v873_v7 = vpop.f32.mrb[8].mxu0  ;;  %v997_v8 = vpop.f32.mrb[8].mxu1 }
 0x1c4   : > { %v7958_v9 = vadd.f32 %v997_v8, %v873_v7  ;;  %v6665_v10 = vpop.f32.mrb[9].mxu0  ;;  %v6694_v11 = vpop.f32.mrb[9].mxu1 }
 0x1c7   : > { %v878_v12 = vpop.f32.mrb[10].mxu0  ;;  %v1002_v14 = vpop.f32.mrb[10].mxu1 }
 0x1c8   : > { %v7960_v15 = vadd.f32 %v1002_v14, %v878_v12  ;;  %v6668_v16 = vpop.f32.mrb[11].mxu0  ;;  %v6697_v17 = vpop.f32.mrb[11].mxu1 }
 0x1cb   : > { %v883_v19 = vpop.f32.mrb[12].mxu0  ;;  %v1007_v20 = vpop.f32.mrb[12].mxu1 }
 0x1cc   : > { %v7962_v21 = vadd.f32 %v1007_v20, %v883_v19  ;;  %v6671_v22 = vpop.f32.mrb[13].mxu0  ;;  %v6700_v23 = vpop.f32.mrb[13].mxu1 }
 0x1cf   : > { %v888_v24 = vpop.f32.mrb[14].mxu0  ;;  %v1012_v26 = vpop.f32.mrb[14].mxu1 }
 0x1d0   : > { %v7964_v27 = vadd.f32 %v1012_v26, %v888_v24  ;;  %v6674_v28 = vpop.f32.mrb[15].mxu0  ;;  %v6703_v29 = vpop.f32.mrb[15].mxu1 }
 0x1d3   : > { %v893_v30 = vpop.f32.mrb[16].mxu0  ;;  %v1017_v31 = vpop.f32.mrb[16].mxu1 }
 0x1d4   : > { %v7966_v32 = vadd.f32 %v1017_v31, %v893_v30  ;;  %v6677_v33 = vpop.f32.mrb[17].mxu0  ;;  %v6706_v34 = vpop.f32.mrb[17].mxu1 }
 0x1d5   : > { %v1517_v34 = vpop.permute.xlu0 %1516 }
 0x1d7   : > { %v898_v35 = vpop.f32.mrb[18].mxu0  ;;  %v1022_v36 = vpop.f32.mrb[18].mxu1 }
 0x1d8   : > { %v7968_v37 = vadd.f32 %v1022_v36, %v898_v35  ;;  %v6680_v38 = vpop.f32.mrb[19].mxu0  ;;  %v6709_v39 = vpop.f32.mrb[19].mxu1 }
 0x1db   : > { %v903_v40 = vpop.f32.mrb[20].mxu0  ;;  %v1027_v41 = vpop.f32.mrb[20].mxu1 }
 0x1dc   : > { %v7976_v44 = vadd.f32 %v1027_v41, %v903_v40  ;;  %v6683_v45 = vpop.f32.mrb[21].mxu0  ;;  %v6712_v46 = vpop.f32.mrb[21].mxu1 }
 0x1dd   : > { %v1522_v41 = vpop.permute.xlu0 %1521 }
 0x1df   : > { %v6719_v48 = vpop.f32.mrb[24].mxu0 }
 0x1e0   : > { %v1103_v51 = vpop.f32.mrb[25].mxu0 }
 0x1e1   : > { %v6720_v52 = vpop.f32.mrb[26].mxu0  ;;  %6734 = vmatmul.mubr.msk.f32.vlgmr.msra.gmra.mrb[22].mxu1 %vm590_vm0, %v1103_v51 }
 0x1e2   : > { %v1106_v53 = vpop.f32.mrb[27].mxu0  ;;  %6736 = vmatprep.mubr.msk.f32.mxu1 %vm7612_vm5, %v7613_v25  ;;  %7380 = vmatpush3.bf16.msra.mxu1 %v7379_v47 }
 0x1e3   : > { %7381 = vmatprep.subr.bf16.mxu1 %v7611_v18 }
 0x1e5   : > { %6737 = vmatmul.mubr.msk.f32.gmra.mrb[24].mxu1 %vm590_vm0, %v1106_v53 }
 0x1e6   : > { %6739 = vmatprep.mubr.msk.f32.mxu1 %vm7612_vm5, %v7613_v25  ;;  %7384 = vmatpush3.bf16.msk.msra.mxu1 %vm7775_vm4, %v7382_v54  ;;  %vm4277_vm4 = vcmask 56320  }
 0x1e7   : > { %v6723_v55 = vpop.f32.mrb[28].mxu0  ;;  %7385 = vmatprep.subr.bf16.mxu1 %v7611_v18 }
 0x1e8   : > { %v1119_v56 = vpop.f32.mrb[29].mxu0 }
 0x1e9   : > { %6740 = vmatmul.mubr.msk.f32.gmra.mrb[26].mxu1 %vm590_vm0, %v6719_v48  ;;  %v6724_v57 = vpop.f32.mrb[30].mxu0 }
 0x1ea   : > { %6742 = vmatprep.mubr.msk.f32.mxu1 %vm7612_vm5, %v7613_v25  ;;  %v1122_v58 = vpop.f32.mrb[31].mxu0 }
 0x1ed   : > { %6743 = vmatmul.mubr.msk.f32.gmra.mrb[28].mxu1 %vm590_vm0, %v6720_v52 }
 0x1ee   : > { %6745 = vmatprep.mubr.msk.f32.mxu1 %vm7612_vm5, %v7613_v25 }
 0x1ef   : > { %v6760_v59 = vpop.f32.mrb[32].mxu0 }
 0x1f0   : > { %v1341_v60 = vpop.f32.mrb[33].mxu0 }
 0x1f1   : > { %6746 = vmatmul.mubr.msk.f32.gmra.mrb[30].mxu1 %vm590_vm0, %v1119_v56  ;;  %v6761_v13 = vpop.f32.mrb[34].mxu0 }
 0x1f2   : > { %6748 = vmatprep.mubr.msk.f32.mxu1 %vm7612_vm5, %v7613_v25  ;;  %v1344_v61 = vpop.f32.mrb[35].mxu0 }
 0x1f5   : > { %6749 = vmatmul.mubr.msk.f32.gmra.mrb[32].mxu1 %vm590_vm0, %v1122_v58 }
 0x1f6   : > { %6751 = vmatprep.mubr.msk.f32.mxu1 %vm7612_vm5, %v7613_v25 }
 0x1f7   : > { %v6764_v62 = vpop.f32.mrb[36].mxu0 }
 0x1f8   : > { %v1357_v63 = vpop.f32.mrb[37].mxu0 }
 0x1f9   : > { %6752 = vmatmul.mubr.msk.f32.gmra.mrb[34].mxu1 %vm590_vm0, %v6723_v55  ;;  %v6765_v0 = vpop.f32.mrb[38].mxu0 }
 0x1fa   : > { %6774 = vmatprep.mubr.msk.f32.mxu1 %vm7612_vm5, %v7613_v25  ;;  %v1360_v1 = vpop.f32.mrb[39].mxu0 }
 0x1fd   : > { %6775 = vmatmul.mubr.msk.f32.vlgmr.msra.gmra.mrb[36].mxu1 %vm590_vm0, %v1341_v60  ;;  %v1537_v60 = vpop.permute.xlu0 %1536 }
 0x1fe   : > { %6777 = vmatprep.mubr.msk.f32.mxu1 %vm7612_vm5, %v7613_v25  ;;  %7388 = vmatpush3.bf16.msk.msra.mxu1 %vm8032_vm6, %v7386_v5 }
 0x201   : > { %6778 = vmatmul.mubr.msk.f32.gmra.mrb[38].mxu1 %vm590_vm0, %v1344_v61 }
 0x202   : > { %6780 = vmatprep.mubr.msk.f32.mxu1 %vm7612_vm5, %v7613_v25 }
 0x205   : > { %6781 = vmatmul.mubr.msk.f32.gmra.mrb[40].mxu1 %vm590_vm0, %v6760_v59 }
 0x206   : > { %6783 = vmatprep.mubr.msk.f32.mxu1 %vm7612_vm5, %v7613_v25 }
 0x209   : > { %6784 = vmatmul.mubr.msk.f32.gmra.mrb[42].mxu1 %vm590_vm0, %v6761_v13 }
 0x20a   : > { %6786 = vmatprep.mubr.msk.f32.mxu1 %vm7612_vm5, %v7613_v25 }
 0x20d   : > { %6787 = vmatmul.mubr.msk.f32.gmra.mrb[44].mxu1 %vm590_vm0, %v1357_v63 }
 0x20e   : > { %6789 = vmatprep.mubr.msk.f32.mxu1 %vm7612_vm5, %v7613_v25 }
 0x211   : > { %6790 = vmatmul.mubr.msk.f32.gmra.mrb[46].mxu1 %vm590_vm0, %v1360_v1 }
 0x212   : > { %6792 = vmatprep.mubr.msk.f32.mxu1 %vm7612_vm5, %v7613_v25 }
 0x215   : > { %6793 = vmatmul.mubr.msk.f32.gmra.mrb[48].mxu1 %vm590_vm0, %v6764_v62 }
 0x216   : > { %6831 = vmatprep.mubr.msk.f32.mxu1 %vm7612_vm5, %v7613_v25 }
 0x2b4   : > { %v1228_v7 = vpop.f32.mrb[22].mxu1 }
 0x2b5   : > { %v1262_v8 = vadd.f32 %v1228_v7, %v7958_v9  ;;  %v6735_v10 = vpop.f32.mrb[23].mxu1 }
 0x2b8   : > { %v1233_v11 = vpop.f32.mrb[24].mxu1 }
 0x2b9   : > { %v1263_v12 = vadd.f32 %v1233_v11, %v7960_v15  ;;  %v6738_v14 = vpop.f32.mrb[25].mxu1 }
 0x2bc   : > { %v1238_v16 = vpop.f32.mrb[26].mxu1 }
 0x2bd   : > { %v1264_v17 = vadd.f32 %v1238_v16, %v7962_v21  ;;  %v6741_v19 = vpop.f32.mrb[27].mxu1 }
 0x2be   : > { %v7528_v19 = vld [vmem:[%s9045_s4 + $0x10] sm:$0xff]  }
 0x2c0   : > { %v1243_v20 = vpop.f32.mrb[28].mxu1 }
 0x2c1   : > { %v1265_v22 = vadd.f32 %v1243_v20, %v7964_v27  ;;  %v6744_v23 = vpop.f32.mrb[29].mxu1  ;;  %v7529_v20 = vld [vmem:[%s9045_s4 + $0x18] ss:$0 sps:$4 sm:$0xff]  }
 0x2c2   : > { %v1672_v23 = vld [vmem:[%s9046_s5] sm:$0xff] }
 0x2c4   : > { %v1248_v24 = vpop.f32.mrb[30].mxu1 }
 0x2c5   : > { %v1266_v26 = vadd.f32 %v1248_v24, %v7966_v32  ;;  %v6747_v28 = vpop.f32.mrb[31].mxu1  ;;  %v1527_v32 = vpop.permute.xlu1 %1526  ;;  %v1673_v24 = vld [vmem:[%s9046_s5 + $0x8] sm:$0x3f] }
 0x2c6   : > { %v7532_v28 = vld [vmem:[%s9045_s4 + $0x2c] sm:$0xff]  }
 0x2c8   : > { %v1253_v29 = vpop.f32.mrb[32].mxu1 }
 0x2c9   : > { %v1267_v9 = vadd.f32 %v1253_v29, %v7968_v37  ;;  %v6750_v30 = vpop.f32.mrb[33].mxu1  ;;  %v1532_v52 = vpop.permute.xlu1 %1531  ;;  %v7390_v29 = vpack.c.bf16 %v1673_v24, %v1672_v23 }
 0x2cc   : > { %v1258_v31 = vpop.f32.mrb[34].mxu1 }
 0x2cd   : > { %v1268_v15 = vadd.f32 %v1258_v31, %v7976_v44  ;;  %v6753_v33 = vpop.f32.mrb[35].mxu1  ;;  %v1542_v0 = vpop.permute.xlu1 %1541 }
 0x2d0   : > { %v1466_v35 = vpop.f32.mrb[36].mxu1 }
 0x2d1   : > { %v1500_v21 = vadd.f32 %v1466_v35, %v1262_v8  ;;  %v6776_v36 = vpop.f32.mrb[37].mxu1  ;;  %v1547_v8 = vpop.permute.xlu0 %1546 }
 0x2d3   : > { %v1549_v39 = vadd.f32 %v1517_v34, %v1500_v21 }
 0x2d4   : > { %v1471_v38 = vpop.f32.mrb[38].mxu1 }
 0x2d5   : > { %v1501_v27 = vadd.f32 %v1471_v38, %v1263_v12  ;;  %v6779_v40 = vpop.f32.mrb[39].mxu1  ;;  %v1556_v45 = vmax.f32 %v1549_v39, 0.0 }
 0x2d7   : > { %v1550_v42 = vadd.f32 %v1522_v41, %v1501_v27 }
 0x2d8   : > { %v1476_v43 = vpop.f32.mrb[40].mxu1 }
 0x2d9   : > { %v1557_v46 = vmax.f32 %v1550_v42, 0.0  ;;  %v1502_v37 = vadd.f32 %v1476_v43, %v1264_v17  ;;  %v6782_v47 = vpop.f32.mrb[41].mxu1  ;;  %v7527_v17 = vld [vmem:[%s9045_s4 + $0x8] sm:$0xff]  }
 0x2da   : > { %v7537_v47 = vld [vmem:[%s9045_s4 + $0x50] ss:$0 sps:$4 sm:$0xff]  }
 0x2db   : > { %v8055_v48 = vpack.c.bf16 %v1557_v46, %v1556_v45  ;;  %v1551_v49 = vadd.f32 %v1527_v32, %v1502_v37  ;;  %v7534_v45 = vld [vmem:[%s9045_s4 + $0x38] sm:$0xff]   ;;  %v7535_v46 = vld [vmem:[%s9045_s4 + $0x40] sm:$0xff]   ;;  %v7536_v37 = vld [vmem:[%s9045_s4 + $0x48] sm:$0xff]  }
 0x2dc   : > { %v1481_v44 = vpop.f32.mrb[42].mxu1 }
 0x2dd   : > { %v1503_v50 = vadd.f32 %v1481_v44, %v1265_v22  ;;  %v6785_v51 = vpop.f32.mrb[43].mxu1  ;;  %6795 = vmatprep.subr.bf16.mxu0 %v8055_v48  ;;  %6877 = vmatprep.subr.bf16.mxu1 %v8055_v48  ;;  %v1558_v55 = vmax.f32 %v1551_v49, 0.0  ;;  %v7530_v22 = vld [vmem:[%s9045_s4 + $0x1c] sm:$0xff]   ;;  %v7538_v44 = vld [vmem:[%s9045_s4 + $0x54] sm:$0xff]   ;;  %v7540_v49 = vld [vmem:[%s9045_s4 + $0x64] sm:$0xff]  }
 0x2de   : > { %6796 = vmatpush3.bf16.msra.mxu0 %v8055_v48  ;;  %v6014_v51 = vld [vmem:[%s9046_s5 + $0x20] sm:$0xff] }
 0x2df   : > { %v1552_v53 = vadd.f32 %v1532_v52, %v1503_v50  ;;  %v7541_v50 = vld [vmem:[%s9045_s4 + $0x6c] ss:$0 sps:$4 sm:$0xff]  }
 0x2e0   : > { %v1486_v54 = vpop.f32.mrb[44].mxu1 }
 0x2e1   : > { %v1559_v56 = vmax.f32 %v1552_v53, 0.0  ;;  %v1504_v57 = vadd.f32 %v1486_v54, %v1266_v26  ;;  %v6788_v58 = vpop.f32.mrb[45].mxu1  ;;  %v7531_v26 = vld [vmem:[%s9045_s4 + $0x24] sm:$0xff]   ;;  %v6039_v53 = vld [vmem:[%s9046_s5 + $0x30] sm:$0xff]  ;;  %v6040_v54 = vld [vmem:[%s9046_s5 + $0x38] sm:$0x3f] }
 0x2e3   : > { %v8060_v59 = vpack.c.bf16 %v1559_v56, %v1558_v55  ;;  %v1553_v61 = vadd.f32 %v1537_v60, %v1504_v57  ;;  %v7398_v55 = vpack.c.bf16 %v6040_v54, %v6039_v53 }
 0x2e4   : > { %v1491_v13 = vpop.f32.mrb[46].mxu1 }
 0x2e5   : > { %v1505_v62 = vadd.f32 %v1491_v13, %v1267_v9  ;;  %v6791_v63 = vpop.f32.mrb[47].mxu1  ;;  %6797 = vmatprep.subr.bf16.mxu0 %v8060_v59  ;;  %v1560_v4 = vmax.f32 %v1553_v61, 0.0  ;;  %v7533_v9 = vld [vmem:[%s9045_s4 + $0x34] ss:$0 sps:$4 sm:$0xff]  }
 0x2e6   : > { %6798 = vmatpush3.bf16.msra.mxu0 %v8060_v59 }
 0x2e7   : > { %v1554_v1 = vadd.f32 %v1542_v0, %v1505_v62 }
 0x2e8   : > { %v1496_v3 = vpop.f32.mrb[48].mxu1 }
 0x2e9   : > { %v1561_v5 = vmax.f32 %v1554_v1, 0.0  ;;  %v1506_v6 = vadd.f32 %v1496_v3, %v1268_v15  ;;  %v6794_v7 = vpop.f32.mrb[49].mxu1 }
 0x2eb   : > { %v8064_v10 = vpack.c.bf16 %v1561_v5, %v1560_v4  ;;  %v1555_v11 = vadd.f32 %v1547_v8, %v1506_v6 }
 0x2ed   : > { %v1562_v12 = vmax.f32 %v1555_v11, 0.0  ;;  %6799 = vmatprep.subr.bf16.mxu0 %v8064_v10 }
 0x2ee   : > { %6800 = vmatpush3.bf16.msra.mxu0 %v8064_v10 }
 0x2ef   : > { %v8068_v14 = vpack.c.bf16 %v1562_v12, %v1562_v12 }
 0x2f1   : > { %7468 = vmatprep.subr.msk.bf16.mxu0 %vm803_vm2, %v8068_v14  ;;  %v8074_v16 = vsel %vm803_vm2, %v8068_v14, 0 }
 0x2f2   : > { %6802 = vmatpush3.bf16.msra.mxu0 %v8074_v16 }
 0x2f3   : > { %6811 = vmatprep.subr.bf16.mxu0 %v8055_v48 }
 0x2f5   : > { %6804 = vmatmul.mubr.msk.bf16.vlgmr.msra.gmra.mrb[40].mxu0 %vm1592_vm7, %v7527_v17 }
 0x2f6   : > { %6812 = vmatpush3.bf16.msra.mxu0 %v8055_v48  ;;  %6807 = vmatprep.mubr.msk.bf16.mxu0 %vm1592_vm7, %v7528_v19 }
 0x2f7   : > { %6813 = vmatprep.subr.bf16.mxu0 %v8060_v59 }
 0x2fa   : > { %6814 = vmatpush3.bf16.msra.mxu0 %v8060_v59 }
 0x2fb   : > { %6815 = vmatprep.subr.bf16.mxu0 %v8064_v10 }
 0x2fd   : > { %6808 = vmatmul.mubr.msk.bf16.gmra.mrb[44].mxu0 %vm1592_vm7, %v7529_v20 }
 0x2fe   : > { %6816 = vmatpush3.bf16.msra.mxu0 %v8064_v10  ;;  %6819 = vmatprep.mubr.msk.bf16.mxu0 %vm1592_vm7, %v7530_v22 }
 0x2ff   : > { %7469 = vmatprep.subr.msk.bf16.mxu0 %vm803_vm2, %v8068_v14 }
 0x302   : > { %6818 = vmatpush3.bf16.msra.mxu0 %v8074_v16 }
 0x303   : > { %7389 = vmatprep.subr.bf16.mxu0 %v7611_v18 }
 0x305   : > { %6820 = vmatmul.mubr.msk.bf16.vlgmr.msra.gmra.mrb[48].mxu0 %vm1592_vm7, %v7531_v26 }
 0x306   : > { %6823 = vmatprep.mubr.msk.bf16.mxu0 %vm1592_vm7, %v7532_v28  ;;  %7392 = vmatpush3.bf16.msk.msra.mxu0 %vm8032_vm6, %v7390_v29 }
 0x307   : > { %7393 = vmatprep.subr.bf16.mxu0 %v7611_v18 }
 0x30d   : > { %6824 = vmatmul.mubr.msk.bf16.gmra.mrb[52].mxu0 %vm1592_vm7, %v7533_v9 }
 0x30e   : > { %6856 = vmatprep.mubr.msk.f32.mxu0 %vm7612_vm5, %v7613_v25 }
 0x3c8   : > { %v6805_v30 = vpop.f32.mrb[40].mxu0 }
 0x3c9   : > { %v1642_v31 = vpop.f32.mrb[41].mxu0 }
 0x3ca   : > { %v6806_v15 = vpop.f32.mrb[42].mxu0  ;;  %6857 = vmatmul.mubr.msk.f32.vlgmr.msra.gmra.mrb[22].mxu0 %vm1779_vm8, %v1642_v31 }
 0x3cb   : > { %v1645_v33 = vpop.f32.mrb[43].mxu0  ;;  %6859 = vmatprep.mubr.msk.f32.mxu0 %vm7612_vm5, %v7613_v25 }
 0x3ce   : > { %6860 = vmatmul.mubr.msk.f32.gmra.mrb[56].mxu0 %vm1779_vm8, %v1645_v33 }
 0x3cf   : > { %6862 = vmatprep.mubr.msk.f32.mxu0 %vm7612_vm5, %v7613_v25 }
 0x3d0   : > { %v6809_v34 = vpop.f32.mrb[44].mxu0 }
 0x3d1   : > { %v1658_v35 = vpop.f32.mrb[45].mxu0 }
 0x3d2   : > { %v6810_v21 = vpop.f32.mrb[46].mxu0  ;;  %6863 = vmatmul.mubr.msk.f32.gmra.mrb[58].mxu0 %vm1779_vm8, %v6805_v30 }
 0x3d3   : > { %v1661_v36 = vpop.f32.mrb[47].mxu0  ;;  %6865 = vmatprep.mubr.msk.f32.mxu0 %vm7612_vm5, %v7613_v25 }
 0x3d6   : > { %6866 = vmatmul.mubr.msk.f32.gmra.mrb[60].mxu0 %vm1779_vm8, %v6806_v15 }
 0x3d7   : > { %6868 = vmatprep.mubr.msk.f32.mxu0 %vm7612_vm5, %v7613_v25 }
 0x3d8   : > { %v6821_v38 = vpop.f32.mrb[48].mxu0 }
 0x3d9   : > { %v1746_v39 = vpop.f32.mrb[49].mxu0 }
 0x3da   : > { %v6822_v27 = vpop.f32.mrb[50].mxu0  ;;  %6832 = vmatmul.mubr.msk.f32.vlgmr.msra.gmra.mrb[50].mxu1 %vm1779_vm8, %v1746_v39  ;;  %6869 = vmatmul.mubr.msk.f32.gmra.mrb[62].mxu0 %vm1779_vm8, %v1658_v35 }
 0x3db   : > { %6878 = vmatpush3.bf16.msra.mxu1 %v8055_v48  ;;  %v1749_v40 = vpop.f32.mrb[51].mxu0  ;;  %6834 = vmatprep.mubr.msk.f32.mxu1 %vm7612_vm5, %v7613_v25 }
 0x3dc   : > { %6879 = vmatprep.subr.bf16.mxu1 %v8060_v59  ;;  %6871 = vmatprep.mubr.msk.f32.mxu0 %vm7612_vm5, %v7613_v25 }
 0x3de   : > { %6835 = vmatmul.mubr.msk.f32.gmra.mrb[52].mxu1 %vm1779_vm8, %v1749_v40  ;;  %6872 = vmatmul.mubr.msk.f32.gmra.mrb[64].mxu0 %vm1779_vm8, %v1661_v36 }
 0x3df   : > { %6880 = vmatpush3.bf16.msra.mxu1 %v8060_v59  ;;  %6837 = vmatprep.mubr.msk.f32.mxu1 %vm7612_vm5, %v7613_v25 }
 0x3e0   : > { %6881 = vmatprep.subr.bf16.mxu1 %v8064_v10  ;;  %6874 = vmatprep.mubr.msk.f32.mxu0 %vm7612_vm5, %v7613_v25  ;;  %v6825_v41 = vpop.f32.mrb[52].mxu0 }
 0x3e1   : > { %v1762_v42 = vpop.f32.mrb[53].mxu0 }
 0x3e2   : > { %6838 = vmatmul.mubr.msk.f32.gmra.mrb[54].mxu1 %vm1779_vm8, %v6821_v38  ;;  %6875 = vmatmul.mubr.msk.f32.gmra.mrb[66].mxu0 %vm1779_vm8, %v6809_v34  ;;  %v6826_v32 = vpop.f32.mrb[54].mxu0 }
 0x3e3   : > { %6882 = vmatpush3.bf16.msra.mxu1 %v8064_v10  ;;  %6840 = vmatprep.mubr.msk.f32.mxu1 %vm7612_vm5, %v7613_v25  ;;  %v1765_v43 = vpop.f32.mrb[55].mxu0 }
 0x3e4   : > { %7470 = vmatprep.subr.msk.bf16.mxu1 %vm803_vm2, %v8068_v14  ;;  %6897 = vmatprep.mubr.msk.f32.mxu0 %vm7612_vm5, %v7613_v25 }
 0x3e6   : > { %6841 = vmatmul.mubr.msk.f32.gmra.mrb[56].mxu1 %vm1779_vm8, %v6822_v27 }
 0x3e7   : > { %6884 = vmatpush3.bf16.msra.mxu1 %v8074_v16  ;;  %6843 = vmatprep.mubr.msk.f32.mxu1 %vm7612_vm5, %v7613_v25 }
 0x3e8   : > { %6918 = vmatprep.subr.bf16.mxu1 %v8055_v48 }
 0x3ea   : > { %6844 = vmatmul.mubr.msk.f32.gmra.mrb[58].mxu1 %vm1779_vm8, %v1762_v42 }
 0x3eb   : > { %6846 = vmatprep.mubr.msk.f32.mxu1 %vm7612_vm5, %v7613_v25 }
 0x3ee   : > { %6847 = vmatmul.mubr.msk.f32.gmra.mrb[60].mxu1 %vm1779_vm8, %v1765_v43 }
 0x3ef   : > { %6849 = vmatprep.mubr.msk.f32.mxu1 %vm7612_vm5, %v7613_v25 }
 0x3f2   : > { %6850 = vmatmul.mubr.msk.f32.gmra.mrb[62].mxu1 %vm1779_vm8, %v6825_v41 }
 0x3f3   : > { %6885 = vmatprep.mubr.msk.bf16.mxu1 %vm1592_vm7, %v7534_v45 }
 0x3f6   : > { %6886 = vmatmul.mubr.msk.bf16.vlgmr.msra.gmra.mrb[64].mxu1 %vm1592_vm7, %v7535_v46 }
 0x3f7   : > { %6919 = vmatpush3.bf16.msra.mxu1 %v8055_v48  ;;  %6889 = vmatprep.mubr.msk.bf16.mxu1 %vm1592_vm7, %v7536_v37  ;;  %v7539_v48 = vld [vmem:[%s9045_s4 + $0x5c] sm:$0xff]  }
 0x3f8   : > { %6920 = vmatprep.subr.bf16.mxu1 %v8060_v59 }
 0x3fb   : > { %6921 = vmatpush3.bf16.msra.mxu1 %v8060_v59 }
 0x3fc   : > { %6922 = vmatprep.subr.bf16.mxu1 %v8064_v10 }
 0x3fe   : > { %6890 = vmatmul.mubr.msk.bf16.gmra.mrb[68].mxu1 %vm1592_vm7, %v7537_v47 }
 0x3ff   : > { %6923 = vmatpush3.bf16.msra.mxu1 %v8064_v10  ;;  %6926 = vmatprep.mubr.msk.bf16.mxu1 %vm1592_vm7, %v7538_v44 }
 0x400   : > { %7471 = vmatprep.subr.msk.bf16.mxu1 %vm803_vm2, %v8068_v14 }
 0x403   : > { %6925 = vmatpush3.bf16.msra.mxu1 %v8074_v16 }
 0x404   : > { %7397 = vmatprep.subr.bf16.mxu1 %v7611_v18  ;;  %v6015_v18 = vld [vmem:[%s9046_s5 + $0x28] sm:$0x3f] }
 0x405   : > { %v7394_v52 = vpack.c.bf16 %v6015_v18, %v6014_v51 }
 0x406   : > { %6927 = vmatmul.mubr.msk.bf16.vlgmr.msra.gmra.mrb[72].mxu1 %vm1592_vm7, %v7539_v48 }
 0x407   : > { %6930 = vmatprep.mubr.msk.bf16.mxu1 %vm1592_vm7, %v7540_v49  ;;  %7396 = vmatpush3.bf16.msk.msra.mxu0 %vm8032_vm6, %v7394_v52 }
 0x408   : > { %6959 = vmatprep.subr.bf16.mxu0 %v7613_v25  ;;  %7400 = vmatpush3.bf16.msk.msra.mxu1 %vm8032_vm6, %v7398_v55 }
 0x40e   : > { %6931 = vmatmul.mubr.msk.bf16.gmra.mrb[76].mxu1 %vm1592_vm7, %v7541_v50 }
 0x40f   : > { %6938 = vmatprep.mubr.msk.f32.mxu1 %vm7612_vm5, %v7613_v25 }
 0x49d   : > { %v1994_v56 = vpop.f32.mrb[22].mxu0 }
 0x49e   : > { %v6858_v57 = vpop.f32.mrb[23].mxu0 }
 0x4a1   : > { %v1999_v58 = vpop.f32.mrb[56].mxu0 }
 0x4a2   : > { %v6861_v59 = vpop.f32.mrb[57].mxu0 }
 0x4a5   : > { %v2004_v60 = vpop.f32.mrb[58].mxu0 }
 0x4a6   : > { %v6864_v13 = vpop.f32.mrb[59].mxu0 }
 0x4a9   : > { %v2009_v61 = vpop.f32.mrb[60].mxu0 }
 0x4aa   : > { %v6867_v62 = vpop.f32.mrb[61].mxu0 }
 0x4ab   : > { %v2510_v62 = vpop.permute.xlu1 %2509 }
 0x4ad   : > { %v1870_v63 = vpop.f32.mrb[50].mxu1  ;;  %v2014_v0 = vpop.f32.mrb[62].mxu0 }
 0x4ae   : > { %v8235_v1 = vadd.f32 %v1994_v56, %v1870_v63  ;;  %v6833_v3 = vpop.f32.mrb[51].mxu1  ;;  %v6870_v4 = vpop.f32.mrb[63].mxu0 }
 0x4b1   : > { %v1875_v5 = vpop.f32.mrb[52].mxu1  ;;  %v2019_v6 = vpop.f32.mrb[64].mxu0 }
 0x4b2   : > { %v8237_v7 = vadd.f32 %v1999_v58, %v1875_v5  ;;  %v6836_v8 = vpop.f32.mrb[53].mxu1  ;;  %v6873_v10 = vpop.f32.mrb[65].mxu0 }
 0x4b5   : > { %v1880_v11 = vpop.f32.mrb[54].mxu1  ;;  %v2024_v12 = vpop.f32.mrb[66].mxu0 }
 0x4b6   : > { %v8239_v14 = vadd.f32 %v2004_v60, %v1880_v11  ;;  %v6839_v16 = vpop.f32.mrb[55].mxu1  ;;  %v6876_v17 = vpop.f32.mrb[67].mxu0 }
 0x4b9   : > { %v1885_v19 = vpop.f32.mrb[56].mxu1 }
 0x4ba   : > { %v8241_v20 = vadd.f32 %v2009_v61, %v1885_v19  ;;  %v6842_v22 = vpop.f32.mrb[57].mxu1 }
 0x4bd   : > { %v1890_v23 = vpop.f32.mrb[58].mxu1 }
 0x4be   : > { %v8243_v24 = vadd.f32 %v2014_v0, %v1890_v23  ;;  %v6845_v26 = vpop.f32.mrb[59].mxu1  ;;  %v2520_v23 = vpop.permute.xlu1 %2519 }
 0x4c1   : > { %v1895_v28 = vpop.f32.mrb[60].mxu1 }
 0x4c2   : > { %v8245_v29 = vadd.f32 %v2019_v6, %v1895_v28  ;;  %v6848_v9 = vpop.f32.mrb[61].mxu1 }
 0x4c5   : > { %v1900_v30 = vpop.f32.mrb[62].mxu1 }
 0x4c6   : > { %v8247_v31 = vadd.f32 %v2024_v12, %v1900_v30  ;;  %v6851_v15 = vpop.f32.mrb[63].mxu1 }
 0x4c9   : > { %v6887_v33 = vpop.f32.mrb[64].mxu1 }
 0x4ca   : > { %v2100_v34 = vpop.f32.mrb[65].mxu1 }
 0x4cb   : > { %v6888_v35 = vpop.f32.mrb[66].mxu1  ;;  %6898 = vmatmul.mubr.msk.f32.vlgmr.msra.gmra.mrb[68].mxu0 %vm1779_vm8, %v2100_v34 }
 0x4cc   : > { %v2103_v21 = vpop.f32.mrb[67].mxu1  ;;  %6900 = vmatprep.mubr.msk.f32.mxu0 %vm7612_vm5, %v7613_v25 }
 0x4cf   : > { %6901 = vmatmul.mubr.msk.f32.gmra.mrb[70].mxu0 %vm1779_vm8, %v2103_v21 }
 0x4d0   : > { %6903 = vmatprep.mubr.msk.f32.mxu0 %vm7612_vm5, %v7613_v25 }
 0x4d1   : > { %v6891_v36 = vpop.f32.mrb[68].mxu1 }
 0x4d2   : > { %v2116_v38 = vpop.f32.mrb[69].mxu1 }
 0x4d3   : > { %v6892_v39 = vpop.f32.mrb[70].mxu1  ;;  %6904 = vmatmul.mubr.msk.f32.gmra.mrb[72].mxu0 %vm1779_vm8, %v6887_v33 }
 0x4d4   : > { %v2119_v27 = vpop.f32.mrb[71].mxu1  ;;  %6906 = vmatprep.mubr.msk.f32.mxu0 %vm7612_vm5, %v7613_v25 }
 0x4d7   : > { %6907 = vmatmul.mubr.msk.f32.gmra.mrb[74].mxu0 %vm1779_vm8, %v6888_v35 }
 0x4d8   : > { %6909 = vmatprep.mubr.msk.f32.mxu0 %vm7612_vm5, %v7613_v25 }
 0x4d9   : > { %v6928_v40 = vpop.f32.mrb[72].mxu1 }
 0x4da   : > { %v2336_v41 = vpop.f32.mrb[73].mxu1 }
 0x4db   : > { %6910 = vmatmul.mubr.msk.f32.gmra.mrb[76].mxu0 %vm1779_vm8, %v2116_v38  ;;  %v6929_v42 = vpop.f32.mrb[74].mxu1  ;;  %6939 = vmatmul.mubr.msk.f32.vlgmr.msra.gmra.mrb[80].mxu1 %vm1779_vm8, %v2336_v41 }
 0x4dc   : > { %v2339_v32 = vpop.f32.mrb[75].mxu1  ;;  %6912 = vmatprep.mubr.msk.f32.mxu0 %vm7612_vm5, %v7613_v25  ;;  %6941 = vmatprep.mubr.msk.f32.mxu1 %vm7612_vm5, %v7613_v25 }
 0x4df   : > { %6913 = vmatmul.mubr.msk.f32.gmra.mrb[78].mxu0 %vm1779_vm8, %v2119_v27  ;;  %6942 = vmatmul.mubr.msk.f32.gmra.mrb[82].mxu1 %vm1779_vm8, %v2339_v32 }
 0x4e0   : > { %6915 = vmatprep.mubr.msk.f32.mxu0 %vm7612_vm5, %v7613_v25  ;;  %6944 = vmatprep.mubr.msk.f32.mxu1 %vm7612_vm5, %v7613_v25 }
 0x4e1   : > { %v6932_v43 = vpop.f32.mrb[76].mxu1 }
 0x4e2   : > { %v2352_v45 = vpop.f32.mrb[77].mxu1 }
 0x4e3   : > { %6916 = vmatmul.mubr.msk.f32.gmra.mrb[80].mxu0 %vm1779_vm8, %v6891_v36  ;;  %6945 = vmatmul.mubr.msk.f32.gmra.mrb[84].mxu1 %vm1779_vm8, %v6928_v40  ;;  %v6933_v46 = vpop.f32.mrb[78].mxu1  ;;  %v2530_v36 = vpop.permute.xlu1 %2529 }
 0x4e4   : > { %6947 = vmatprep.mubr.msk.f32.mxu1 %vm7612_vm5, %v7613_v25  ;;  %v2355_v37 = vpop.f32.mrb[79].mxu1  ;;  %6967 = vmatprep.mubr.msk.bf16.mxu0 %vm7612_vm5, %v7613_v25 }
 0x4e7   : > { %6948 = vmatmul.mubr.msk.f32.gmra.mrb[86].mxu1 %vm1779_vm8, %v6929_v42 }
 0x4e8   : > { %6950 = vmatprep.mubr.msk.f32.mxu1 %vm7612_vm5, %v7613_v25 }
 0x4eb   : > { %6951 = vmatmul.mubr.msk.f32.gmra.mrb[88].mxu1 %vm1779_vm8, %v2352_v45 }
 0x4ec   : > { %6953 = vmatprep.mubr.msk.f32.mxu1 %vm7612_vm5, %v7613_v25 }
 0x4ef   : > { %6954 = vmatmul.mubr.msk.f32.gmra.mrb[90].mxu1 %vm1779_vm8, %v2355_v37 }
 0x4f0   : > { %6956 = vmatprep.mubr.msk.f32.mxu1 %vm7612_vm5, %v7613_v25 }
 0x4f3   : > { %6957 = vmatmul.mubr.msk.f32.gmra.mrb[92].mxu1 %vm1779_vm8, %v6932_v43 }
 0x59e   : > { %v2223_v47 = vpop.f32.mrb[68].mxu0 }
 0x59f   : > { %v2257_v44 = vadd.f32 %v2223_v47, %v8235_v1  ;;  %v6899_v48 = vpop.f32.mrb[69].mxu0  ;;  %v2540_v47 = vpop.permute.xlu1 %2539 }
 0x5a2   : > { %v2228_v49 = vpop.f32.mrb[70].mxu0 }
 0x5a3   : > { %v2258_v50 = vadd.f32 %v2228_v49, %v8237_v7  ;;  %v6902_v51 = vpop.f32.mrb[71].mxu0  ;;  %v2515_v7 = vpop.permute.xlu0 %2514 }
 0x5a6   : > { %v2233_v18 = vpop.f32.mrb[72].mxu0 }
 0x5a7   : > { %v2259_v52 = vadd.f32 %v2233_v18, %v8239_v14  ;;  %v6905_v53 = vpop.f32.mrb[73].mxu0  ;;  %v2525_v9 = vpop.permute.xlu0 %2524  ;;  %v2561_v18 = vld [vmem:[%s9048_s7] sm:$0xf] }
 0x5aa   : > { %v2238_v54 = vpop.f32.mrb[74].mxu0 }
 0x5ab   : > { %v2260_v55 = vadd.f32 %v2238_v54, %v8241_v20  ;;  %v6908_v56 = vpop.f32.mrb[75].mxu0  ;;  %v2535_v41 = vpop.permute.xlu0 %2534 }
 0x5ae   : > { %v2243_v57 = vpop.f32.mrb[76].mxu0  ;;  %v2459_v58 = vpop.f32.mrb[80].mxu1 }
 0x5af   : > { %v2261_v59 = vadd.f32 %v2243_v57, %v8243_v24  ;;  %v2493_v60 = vadd.f32 %v2459_v58, %v2257_v44  ;;  %v6911_v13 = vpop.f32.mrb[77].mxu0  ;;  %v6940_v61 = vpop.f32.mrb[81].mxu1  ;;  %v6050_v57 = vld [vmem:[%s9048_s7 + $0x4] sm:$0xf] }
 0x5b1   : > { %v2542_v1 = vadd.f32 %v2510_v62, %v2493_v60  ;;  %v6052_v62 = vld [vmem:[%s9048_s7 + $0x8] sm:$0xf] }
 0x5b2   : > { %v2248_v63 = vpop.f32.mrb[78].mxu0  ;;  %v2464_v0 = vpop.f32.mrb[82].mxu1 }
 0x5b3   : > { %v2262_v3 = vadd.f32 %v2248_v63, %v8245_v29  ;;  %v2494_v4 = vadd.f32 %v2464_v0, %v2258_v50  ;;  %v6914_v5 = vpop.f32.mrb[79].mxu0  ;;  %v6943_v6 = vpop.f32.mrb[83].mxu1  ;;  %v2549_v12 = vmax.f32 %v2542_v1, 0.0 }
 0x5b4   : > { %v6054_v5 = vld [vmem:[%s9048_s7 + $0xc] sm:$0xf] }
 0x5b5   : > { %v2543_v8 = vadd.f32 %v2515_v7, %v2494_v4 }
 0x5b6   : > { %v2253_v10 = vpop.f32.mrb[80].mxu0  ;;  %v2469_v11 = vpop.f32.mrb[84].mxu1 }
 0x5b7   : > { %v2550_v14 = vmax.f32 %v2543_v8, 0.0  ;;  %v2263_v16 = vadd.f32 %v2253_v10, %v8247_v31  ;;  %v2495_v17 = vadd.f32 %v2469_v11, %v2259_v52  ;;  %v6917_v19 = vpop.f32.mrb[81].mxu0  ;;  %v6946_v20 = vpop.f32.mrb[85].mxu1 }
 0x5b9   : > { %v8296_v22 = vpack.c.bf16 %v2550_v14, %v2549_v12  ;;  %v2544_v26 = vadd.f32 %v2520_v23, %v2495_v17  ;;  %v6056_v12 = vld [vmem:[%s9048_s7 + $0x10] sm:$0xf] }
 0x5ba   : > { %v2474_v24 = vpop.f32.mrb[86].mxu1 }
 0x5bb   : > { %v2496_v28 = vadd.f32 %v2474_v24, %v2260_v55  ;;  %2615 = vrot.lane.b32.xlu0 %v8296_v22, %s7615_s27  ;;  %v6949_v29 = vpop.f32.mrb[87].mxu1  ;;  %6960 = vmatpush3.bf16.msra.mxu0 %v8296_v22  ;;  %v2551_v15 = vmax.f32 %v2544_v26, 0.0 }
 0x5bc   : > { %6961 = vmatprep.subr.bf16.mxu0 %v7613_v25 }
 0x5bd   : > { %v2545_v30 = vadd.f32 %v2525_v9, %v2496_v28  ;;  %v6060_v9 = vld [vmem:[%s9048_s7 + $0x18] sm:$0xf] }
 0x5be   : > { %v2479_v31 = vpop.f32.mrb[88].mxu1 }
 0x5bf   : > { %v2552_v33 = vmax.f32 %v2545_v30, 0.0  ;;  %v2497_v34 = vadd.f32 %v2479_v31, %v2261_v59  ;;  %v6952_v35 = vpop.f32.mrb[89].mxu1  ;;  %v7542_v30 = vld [vmem:[%s9050_s9] sm:$0xff]   ;;  %v7544_v31 = vld [vmem:[%s9050_s9 + $0x8c] sm:$0xff]  }
 0x5c0   : > { %7045 = vmatprep.mubr.msk.bf16.mxu1 %vm3008_vm9, %v7542_v30 }
 0x5c1   : > { %v2557_v21 = vpack.c.bf16 %v2552_v33, %v2551_v15  ;;  %v2546_v39 = vadd.f32 %v2530_v36, %v2497_v34  ;;  %v2560_v15 = vld [vmem:[%s9049_s8] sm:$0xff] }
 0x5c2   : > { %v2484_v38 = vpop.f32.mrb[90].mxu1 }
 0x5c3   : > { %v2498_v27 = vadd.f32 %v2484_v38, %v2262_v3  ;;  %2617 = vrot.lane.b32.xlu1 %v2557_v21, %s7615_s27  ;;  %v6955_v40 = vpop.f32.mrb[91].mxu1  ;;  %6962 = vmatpush3.bf16.msra.mxu0 %v2557_v21  ;;  %v2553_v43 = vmax.f32 %v2546_v39, 0.0 }
 0x5c4   : > { %6963 = vmatprep.subr.bf16.mxu0 %v7613_v25  ;;  %v7545_v40 = vld [vmem:[%s9050_s9 + $0x94] sm:$0xff]  }
 0x5c5   : > { %v2547_v42 = vadd.f32 %v2535_v41, %v2498_v27  ;;  %v7543_v27 = vld [vmem:[%s9050_s9 + $0x8] sm:$0xff]   ;;  %v7546_v41 = vld [vmem:[%s9050_s9 + $0x10] sm:$0xff]  }
 0x5c6   : > { %v2489_v32 = vpop.f32.mrb[92].mxu1 }
 0x5c7   : > { %v2554_v45 = vmax.f32 %v2547_v42, 0.0  ;;  %v2499_v46 = vadd.f32 %v2489_v32, %v2263_v16  ;;  %v6958_v37 = vpop.f32.mrb[93].mxu1  ;;  %v7550_v42 = vld [vmem:[%s9050_s9 + $0x9c] sm:$0xff]   ;;  %v7547_v32 = vld [vmem:[%s9050_s9 + $0x18] ss:$0 sps:$4 sm:$0xff]  }
 0x5c8   : > { %v7551_v37 = vld [vmem:[%s9050_s9 + $0x2c] sm:$0xff]  }
 0x5c9   : > { %v2558_v44 = vpack.c.bf16 %v2554_v45, %v2553_v43  ;;  %v2548_v48 = vadd.f32 %v2540_v47, %v2499_v46  ;;  %v7552_v43 = vld [vmem:[%s9050_s9 + $0xa4] ss:$0 sps:$4 sm:$0xff]   ;;  %v7548_v45 = vld [vmem:[%s9050_s9 + $0x1c] sm:$0xff]   ;;  %v7553_v47 = vld [vmem:[%s9050_s9 + $0x34] ss:$0 sps:$4 sm:$0xff]  }
 0x5ca   : > { %v7549_v46 = vld [vmem:[%s9050_s9 + $0x24] sm:$0xff]  }
 0x5cb   : > { %v2555_v49 = vmax.f32 %v2548_v48, 0.0  ;;  %2619 = vrot.lane.b32.xlu0 %v2558_v44, %s7615_s27  ;;  %6964 = vmatpush3.bf16.msra.mxu0 %v2558_v44  ;;  %v7555_v48 = vld [vmem:[%s9050_s9 + $0x40] sm:$0xff]  }
 0x5cc   : > { %6965 = vmatprep.subr.bf16.mxu0 %v7613_v25 }
 0x5cd   : > { %v2559_v50 = vpack.c.bf16 %v2555_v49, %v2555_v49  ;;  %v7556_v49 = vld [vmem:[%s9050_s9 + $0x48] sm:$0xff]  }
 0x5cf   : > { %2675 = vrot.lane.b32.xlu0 %v8296_v22, %s7616_s29  ;;  %2621 = vrot.lane.b32.xlu1 %v2559_v50, %s7615_s27  ;;  %v2566_v51 = vsel %vm803_vm2, %v2559_v50, 0 }
 0x5d0   : > { %6966 = vmatpush3.bf16.msra.mxu0 %v2566_v51  ;;  %v7558_v51 = vld [vmem:[%s9050_s9 + $0x54] sm:$0xff]  }
 0x5d1   : > { %6971 = vmatprep.subr.bf16.mxu0 %v7613_v25 }
 0x5d3   : > { %2679 = vrot.lane.b32.xlu0 %v2558_v44, %s7616_s29  ;;  %2677 = vrot.lane.b32.xlu1 %v2557_v21, %s7616_s29 }
 0x5d4   : > { %6968 = vmatmul.mubr.msk.bf16.vlgmr.msra.gmra.mrb[84].mxu0 %vm1592_vm7, %v2561_v18  ;;  %v7559_v18 = vld [vmem:[%s9050_s9 + $0x5c] sm:$0xff]  }
 0x5d5   : > { %6979 = vmatprep.mubr.msk.bf16.mxu0 %vm7612_vm5, %v7613_v25 }
 0x5d7   : > { %2735 = vrot.lane.b32.xlu0 %v8296_v22, %s7617_s18  ;;  %2681 = vrot.lane.b32.xlu1 %v2559_v50, %s7616_s29 }
 0x5db   : > { %2739 = vrot.lane.b32.xlu0 %v2558_v44, %s7617_s18  ;;  %2737 = vrot.lane.b32.xlu1 %v2557_v21, %s7617_s18 }
 0x5df   : > { %2795 = vrot.lane.b32.xlu0 %v8296_v22, %s7618_s19  ;;  %2741 = vrot.lane.b32.xlu1 %v2559_v50, %s7617_s18 }
 0x5e3   : > { %2799 = vrot.lane.b32.xlu0 %v2558_v44, %s7618_s19  ;;  %2797 = vrot.lane.b32.xlu1 %v2557_v21, %s7618_s19 }
 0x5e7   : > { %2855 = vrot.lane.b32.xlu0 %v8296_v22, %s7619_s1  ;;  %2801 = vrot.lane.b32.xlu1 %v2559_v50, %s7618_s19 }
 0x5eb   : > { %2859 = vrot.lane.b32.xlu0 %v2558_v44, %s7619_s1  ;;  %2857 = vrot.lane.b32.xlu1 %v2557_v21, %s7619_s1 }
 0x5ef   : > { %2915 = vrot.lane.b32.xlu0 %v8296_v22, %s7620_s20  ;;  %2861 = vrot.lane.b32.xlu1 %v2559_v50, %s7619_s1  ;;  %v6058_v22 = vld [vmem:[%s9048_s7 + $0x14] sm:$0xf]  ;;  %s6312_s1 = sshll.u32 %s9069_s25, 5 }
 0x5f0   : > { %s548_s22 = scalar_lea.vmem %s9058_s17, %s6312_s1 }
 0x5f3   : > { %2919 = vrot.lane.b32.xlu0 %v2558_v44, %s7620_s20  ;;  %2917 = vrot.lane.b32.xlu1 %v2557_v21, %s7620_s20  ;;  %v7554_v44 = vld [vmem:[%s9050_s9 + $0x38] sm:$0xff]  }
 0x5f7   : > { %2921 = vrot.lane.b32.xlu1 %v2559_v50, %s7620_s20  ;;  %v7557_v50 = vld [vmem:[%s9050_s9 + $0x50] ss:$0 sps:$4 sm:$0xff]  }
 0x62d   : > { %v2616_v52 = vpop.permute.xlu0 %2615 }
 0x62e   : > { %6972 = vmatpush3.bf16.msra.mxu0 %v2616_v52  ;;  %v7560_v52 = vld [vmem:[%s9050_s9 + $0x64] sm:$0xff]  }
 0x62f   : > { %6973 = vmatprep.subr.bf16.mxu0 %v7613_v25 }
 0x635   : > { %v2618_v53 = vpop.permute.xlu1 %2617 }
 0x636   : > { %6974 = vmatpush3.bf16.msra.mxu0 %v2618_v53  ;;  %v7561_v53 = vld [vmem:[%s9050_s9 + $0x6c] ss:$0 sps:$4 sm:$0xff]  }
 0x637   : > { %6975 = vmatprep.subr.bf16.mxu0 %v7613_v25 }
 0x63d   : > { %v2620_v54 = vpop.permute.xlu0 %2619 }
 0x63e   : > { %6976 = vmatpush3.bf16.msra.mxu0 %v2620_v54  ;;  %v7562_v54 = vld [vmem:[%s9050_s9 + $0x70] sm:$0xff]  }
 0x63f   : > { %6977 = vmatprep.subr.bf16.mxu0 %v7613_v25 }
 0x641   : > { %v2622_v55 = vpop.permute.xlu1 %2621  ;;  %v2676_v58 = vpop.permute.xlu0 %2675 }
 0x642   : > { %v2630_v56 = vsel %vm803_vm2, %v2622_v55, 0  ;;  %v7563_v55 = vld [vmem:[%s9050_s9 + $0x78] sm:$0xff]  }
 0x643   : > { %6978 = vmatpush3.bf16.msra.mxu0 %v2630_v56  ;;  %v7564_v56 = vld [vmem:[%s9050_s9 + $0x80] sm:$0xff]  }
 0x644   : > { %6983 = vmatprep.subr.bf16.mxu0 %v7613_v25 }
 0x645   : > { %v2678_v59 = vpop.permute.xlu1 %2677  ;;  %v2680_v60 = vpop.permute.xlu0 %2679 }
 0x646   : > { %6980 = vmatmul.mubr.msk.bf16.vlgmr.msra.gmra.mrb[84].mxu0 %vm1592_vm7, %v6050_v57  ;;  %v7565_v57 = vld [vmem:[%s9050_s9 + $0x88] ss:$0 sps:$4 sm:$0xff]  }
 0x647   : > { %6984 = vmatpush3.bf16.msra.mxu0 %v2676_v58  ;;  %6991 = vmatprep.mubr.msk.bf16.mxu0 %vm7612_vm5, %v7613_v25  ;;  %v7566_v58 = vld [vmem:[%s9050_s9 + $0xa8] sm:$0xff]  }
 0x648   : > { %6985 = vmatprep.subr.bf16.mxu0 %v7613_v25 }
 0x649   : > { %v2682_v13 = vpop.permute.xlu1 %2681  ;;  %v2736_v63 = vpop.permute.xlu0 %2735 }
 0x64a   : > { %v2690_v61 = vsel %vm803_vm2, %v2682_v13, 0  ;;  %v7569_v13 = vld [vmem:[%s9050_s9 + $0xc0] ss:$0 sps:$4 sm:$0xff]  }
 0x64b   : > { %6986 = vmatpush3.bf16.msra.mxu0 %v2678_v59  ;;  %v7567_v59 = vld [vmem:[%s9050_s9 + $0xb0] sm:$0xff]  }
 0x64c   : > { %6987 = vmatprep.subr.bf16.mxu0 %v7613_v25 }
 0x64d   : > { %v2738_v0 = vpop.permute.xlu1 %2737  ;;  %v2740_v1 = vpop.permute.xlu0 %2739 }
 0x64f   : > { %6988 = vmatpush3.bf16.msra.mxu0 %v2680_v60  ;;  %v7568_v60 = vld [vmem:[%s9050_s9 + $0xb8] sm:$0xff]  }
 0x650   : > { %6989 = vmatprep.subr.bf16.mxu0 %v7613_v25 }
 0x651   : > { %v2742_v3 = vpop.permute.xlu1 %2741  ;;  %v2796_v6 = vpop.permute.xlu0 %2795 }
 0x652   : > { %v2750_v4 = vsel %vm803_vm2, %v2742_v3, 0 }
 0x653   : > { %6990 = vmatpush3.bf16.msra.mxu0 %v2690_v61 }
 0x654   : > { %6995 = vmatprep.subr.bf16.mxu0 %v7613_v25 }
 0x655   : > { %v2798_v7 = vpop.permute.xlu1 %2797  ;;  %v2800_v8 = vpop.permute.xlu0 %2799 }
 0x656   : > { %6992 = vmatmul.mubr.msk.bf16.vlgmr.msra.gmra.mrb[84].mxu0 %vm1592_vm7, %v6052_v62 }
 0x657   : > { %6996 = vmatpush3.bf16.msra.mxu0 %v2736_v63  ;;  %7003 = vmatprep.mubr.msk.bf16.mxu0 %vm7612_vm5, %v7613_v25 }
 0x658   : > { %6997 = vmatprep.subr.bf16.mxu0 %v7613_v25 }
 0x659   : > { %v2802_v10 = vpop.permute.xlu1 %2801  ;;  %v2856_v14 = vpop.permute.xlu0 %2855 }
 0x65a   : > { %v2810_v11 = vsel %vm803_vm2, %v2802_v10, 0 }
 0x65b   : > { %6998 = vmatpush3.bf16.msra.mxu0 %v2738_v0 }
 0x65c   : > { %6999 = vmatprep.subr.bf16.mxu0 %v7613_v25 }
 0x65d   : > { %v2858_v16 = vpop.permute.xlu1 %2857  ;;  %v2860_v17 = vpop.permute.xlu0 %2859 }
 0x65f   : > { %7000 = vmatpush3.bf16.msra.mxu0 %v2740_v1 }
 0x660   : > { %7001 = vmatprep.subr.bf16.mxu0 %v7613_v25 }
 0x661   : > { %v2862_v19 = vpop.permute.xlu1 %2861  ;;  %v2916_v23 = vpop.permute.xlu0 %2915 }
 0x662   : > { %v2870_v20 = vsel %vm803_vm2, %v2862_v19, 0 }
 0x663   : > { %7002 = vmatpush3.bf16.msra.mxu0 %v2750_v4 }
 0x664   : > { %7007 = vmatprep.subr.bf16.mxu0 %v7613_v25 }
 0x665   : > { %v2918_v24 = vpop.permute.xlu1 %2917  ;;  %v2920_v26 = vpop.permute.xlu0 %2919 }
 0x666   : > { %7004 = vmatmul.mubr.msk.bf16.vlgmr.msra.gmra.mrb[84].mxu0 %vm1592_vm7, %v6054_v5 }
 0x667   : > { %7008 = vmatpush3.bf16.msra.mxu0 %v2796_v6  ;;  %7015 = vmatprep.mubr.msk.bf16.mxu0 %vm7612_vm5, %v7613_v25 }
 0x668   : > { %7009 = vmatprep.subr.bf16.mxu0 %v7613_v25 }
 0x669   : > { %v2922_v28 = vpop.permute.xlu1 %2921 }
 0x66a   : > { %v2930_v29 = vsel %vm803_vm2, %v2922_v28, 0 }
 0x66b   : > { %7010 = vmatpush3.bf16.msra.mxu0 %v2798_v7 }
 0x66c   : > { %7011 = vmatprep.subr.bf16.mxu0 %v7613_v25 }
 0x66f   : > { %7012 = vmatpush3.bf16.msra.mxu0 %v2800_v8 }
 0x670   : > { %7013 = vmatprep.subr.bf16.mxu0 %v7613_v25 }
 0x673   : > { %7014 = vmatpush3.bf16.msra.mxu0 %v2810_v11 }
 0x674   : > { %7019 = vmatprep.subr.bf16.mxu0 %v7613_v25 }
 0x676   : > { %7016 = vmatmul.mubr.msk.bf16.vlgmr.msra.gmra.mrb[84].mxu0 %vm1592_vm7, %v6056_v12 }
 0x677   : > { %7020 = vmatpush3.bf16.msra.mxu0 %v2856_v14  ;;  %7027 = vmatprep.mubr.msk.bf16.mxu0 %vm7612_vm5, %v7613_v25 }
 0x678   : > { %7021 = vmatprep.subr.bf16.mxu0 %v7613_v25 }
 0x67b   : > { %7022 = vmatpush3.bf16.msra.mxu0 %v2858_v16 }
 0x67c   : > { %7023 = vmatprep.subr.bf16.mxu0 %v7613_v25 }
 0x67f   : > { %7024 = vmatpush3.bf16.msra.mxu0 %v2860_v17 }
 0x680   : > { %7025 = vmatprep.subr.bf16.mxu0 %v7613_v25 }
 0x683   : > { %7026 = vmatpush3.bf16.msra.mxu0 %v2870_v20 }
 0x684   : > { %7031 = vmatprep.subr.bf16.mxu0 %v7613_v25 }
 0x686   : > { %7028 = vmatmul.mubr.msk.bf16.vlgmr.msra.gmra.mrb[84].mxu0 %vm1592_vm7, %v6058_v22 }
 0x687   : > { %7032 = vmatpush3.bf16.msra.mxu0 %v2916_v23  ;;  %7039 = vmatprep.mubr.msk.bf16.mxu0 %vm7612_vm5, %v7613_v25 }
 0x688   : > { %7033 = vmatprep.subr.bf16.mxu0 %v7613_v25 }
 0x68b   : > { %7034 = vmatpush3.bf16.msra.mxu0 %v2918_v24 }
 0x68c   : > { %7035 = vmatprep.subr.bf16.mxu0 %v7613_v25 }
 0x68f   : > { %7036 = vmatpush3.bf16.msra.mxu0 %v2920_v26 }
 0x690   : > { %7037 = vmatprep.subr.bf16.mxu0 %v7613_v25 }
 0x693   : > { %7038 = vmatpush3.bf16.msra.mxu0 %v2930_v29 }
 0x696   : > { %7040 = vmatmul.mubr.msk.bf16.vlgmr.msra.gmra.mrb[84].mxu0 %vm1592_vm7, %v6060_v9 }
 0x697   : > { %7095 = vmatprep.mubr.msk.bf16.mxu0 %vm3008_vm9, %v7544_v31 }
 0x769   : > { %v2966_v33 = vpop.f32.mrb[84].mxu0 }
 0x76a   : > { %v7427_v34 = vadd.f32 %v2966_v33, %v2560_v15  ;;  %v7041_v35 = vpop.f32.mrb[85].mxu0 }
 0x76b   : > { %v2969_v21 = vpop.f32.mrb[86].mxu0 }
 0x76c   : > { %v2973_v36 = vpack.c.bf16 %v7427_v34, %v7427_v34  ;;  %v7042_v38 = vpop.f32.mrb[87].mxu0 }
 0x76e   : > { %7472 = vmatprep.subr.msk.bf16.mxu1 %vm803_vm2, %v2973_v36  ;;  %7477 = vmatprep.subr.msk.bf16.mxu0 %vm803_vm2, %v2973_v36  ;;  %v3022_v39 = vsel %vm803_vm2, %v2973_v36, 0 }
 0x76f   : > { %7044 = vmatpush3.bf16.msra.mxu1 %v3022_v39  ;;  %7094 = vmatpush3.bf16.msra.mxu0 %v3022_v39 }
 0x770   : > { %7473 = vmatprep.subr.msk.bf16.mxu1 %vm803_vm2, %v2973_v36 }
 0x772   : > { %7046 = vmatmul.mubr.msk.bf16.vlgmr.msra.gmra.mrb[96].mxu1 %vm3008_vm9, %v7543_v27  ;;  %7096 = vmatmul.mubr.msk.bf16.vlgmr.msra.gmra.mrb[88].mxu0 %vm3008_vm9, %v7545_v40 }
 0x773   : > { %7054 = vmatpush3.bf16.msra.mxu1 %v3022_v39  ;;  %7049 = vmatprep.mubr.msk.bf16.mxu1 %vm3008_vm9, %v7546_v41 }
 0x774   : > { %7474 = vmatprep.subr.msk.bf16.mxu1 %vm803_vm2, %v2973_v36  ;;  %7099 = vmatprep.mubr.msk.bf16.mxu0 %vm3008_vm9, %v7550_v42 }
 0x77a   : > { %7050 = vmatmul.mubr.msk.bf16.gmra.mrb[100].mxu1 %vm3008_vm9, %v7547_v32  ;;  %7100 = vmatmul.mubr.msk.bf16.gmra.mrb[92].mxu0 %vm3008_vm9, %v7552_v43 }
 0x77b   : > { %7055 = vmatprep.mubr.msk.bf16.mxu1 %vm3008_vm9, %v7548_v45 }
 0x782   : > { %7056 = vmatmul.mubr.msk.bf16.vlgmr.msra.gmra.mrb[104].mxu1 %vm3008_vm9, %v7549_v46 }
 0x783   : > { %7064 = vmatpush3.bf16.msra.mxu1 %v3022_v39  ;;  %7059 = vmatprep.mubr.msk.bf16.mxu1 %vm3008_vm9, %v7551_v37 }
 0x784   : > { %7475 = vmatprep.subr.msk.bf16.mxu1 %vm803_vm2, %v2973_v36 }
 0x78a   : > { %7060 = vmatmul.mubr.msk.bf16.gmra.mrb[108].mxu1 %vm3008_vm9, %v7553_v47 }
 0x78b   : > { %7065 = vmatprep.mubr.msk.bf16.mxu1 %vm3008_vm9, %v7554_v44 }
 0x792   : > { %7066 = vmatmul.mubr.msk.bf16.vlgmr.msra.gmra.mrb[112].mxu1 %vm3008_vm9, %v7555_v48 }
 0x793   : > { %7074 = vmatpush3.bf16.msra.mxu1 %v3022_v39  ;;  %7069 = vmatprep.mubr.msk.bf16.mxu1 %vm3008_vm9, %v7556_v49 }
 0x794   : > { %7476 = vmatprep.subr.msk.bf16.mxu1 %vm803_vm2, %v2973_v36 }
 0x79a   : > { %7070 = vmatmul.mubr.msk.bf16.gmra.mrb[116].mxu1 %vm3008_vm9, %v7557_v50 }
 0x79b   : > { %7075 = vmatprep.mubr.msk.bf16.mxu1 %vm3008_vm9, %v7558_v51 }
 0x7a2   : > { %7076 = vmatmul.mubr.msk.bf16.vlgmr.msra.gmra.mrb[120].mxu1 %vm3008_vm9, %v7559_v18 }
 0x7a3   : > { %7084 = vmatpush3.bf16.msra.mxu1 %v3022_v39  ;;  %7079 = vmatprep.mubr.msk.bf16.mxu1 %vm3008_vm9, %v7560_v52 }
 0x7a4   : > { %7478 = vmatprep.subr.msk.bf16.mxu1 %vm803_vm2, %v2973_v36 }
 0x7aa   : > { %7080 = vmatmul.mubr.msk.bf16.gmra.mrb[124].mxu1 %vm3008_vm9, %v7561_v53 }
 0x7ab   : > { %7085 = vmatprep.mubr.msk.bf16.mxu1 %vm3008_vm9, %v7562_v54 }
 0x7b2   : > { %7086 = vmatmul.mubr.msk.bf16.vlgmr.msra.gmra.mrb[128].mxu1 %vm3008_vm9, %v7563_v55 }
 0x7b3   : > { %7104 = vmatpush3.bf16.msra.mxu1 %v3022_v39  ;;  %7089 = vmatprep.mubr.msk.bf16.mxu1 %vm3008_vm9, %v7564_v56  ;;  %v4997_v56 = vld [vmem:[%s9054_s13] sm:$0xff] }
 0x7ba   : > { %7090 = vmatmul.mubr.msk.bf16.gmra.mrb[132].mxu1 %vm3008_vm9, %v7565_v57  ;;  %v4998_v57 = vld [vmem:[%s9054_s13 + $0x8] sm:$0xff] }
 0x7bb   : > { %7105 = vmatprep.mubr.msk.bf16.mxu1 %vm3008_vm9, %v7566_v58  ;;  %v4999_v58 = vld [vmem:[%s9054_s13 + $0x10] sm:$0xff] }
 0x7c2   : > { %7106 = vmatmul.mubr.msk.bf16.vlgmr.msra.gmra.mrb[136].mxu1 %vm3008_vm9, %v7567_v59  ;;  %v5000_v59 = vld [vmem:[%s9054_s13 + $0x18] sm:$0xff] }
 0x7c3   : > { %7109 = vmatprep.mubr.msk.bf16.mxu1 %vm3008_vm9, %v7568_v60  ;;  %v5001_v60 = vld [vmem:[%s9054_s13 + $0x20] sm:$0xff] }
 0x7ca   : > { %7110 = vmatmul.mubr.msk.bf16.gmra.mrb[140].mxu1 %vm3008_vm9, %v7569_v13  ;;  %v7570_v13 = vld [vmem:[%s9052_s11 + $0x1c] sm:$0xff]  }
 0x7cb   : > { %7137 = vmatprep.mubr.msk.bf16.mxu1 %vm1592_vm7, %v7570_v13 }
 0x845   : > { %v7047_v61 = vpop.f32.mrb[96].mxu1  ;;  %v7097_v62 = vpop.f32.mrb[88].mxu0 }
 0x846   : > { %3103 = vperm.xlu0 %7506, %v7047_v61   ;;  %v3058_v63 = vpop.f32.mrb[97].mxu1  ;;  %v3828_v0 = vpop.f32.mrb[89].mxu0  ;;  %v5002_v61 = vld [vmem:[%s9054_s13 + $0x28] sm:$0xff] }
 0x847   : > { %v7048_v1 = vpop.f32.mrb[98].mxu1  ;;  %v7098_v3 = vpop.f32.mrb[90].mxu0 }
 0x848   : > { %3108 = vperm.xlu1 %7507, %v7048_v1   ;;  %v3061_v4 = vpop.f32.mrb[99].mxu1  ;;  %v3831_v5 = vpop.f32.mrb[91].mxu0  ;;  %v5759_v1 = vld [vmem:[%s9057_s16 + $0x8] sm:$0xff] }
 0x84a   : > { %3873 = vperm.xlu0 %7506, %v7097_v62   ;;  %v7571_v62 = vld [vmem:[%s9052_s11] sm:$0xff]  }
 0x84b   : > { %7121 = vmatprep.mubr.msk.bf16.mxu0 %vm1592_vm7, %v7571_v62 }
 0x84c   : > { %3878 = vperm.xlu1 %7507, %v7098_v3   ;;  %v5760_v3 = vld [vmem:[%s9057_s16 + $0x10] sm:$0xff] }
 0x84d   : > { %v7051_v6 = vpop.f32.mrb[100].mxu1  ;;  %v8506_v7 = vpop.f32.mrb[92].mxu0 }
 0x84e   : > { %3093 = vperm.xlu0 %7506, %v3058_v63   ;;  %v3074_v8 = vpop.f32.mrb[101].mxu1  ;;  %v3844_v10 = vpop.f32.mrb[93].mxu0  ;;  %v5003_v63 = vld [vmem:[%s9054_s13 + $0x30] sm:$0xff] }
 0x84f   : > { %v7052_v11 = vpop.f32.mrb[102].mxu1  ;;  %v7102_v12 = vpop.f32.mrb[94].mxu0 }
 0x850   : > { %3098 = vperm.xlu1 %7507, %v3061_v4   ;;  %v3077_v14 = vpop.f32.mrb[103].mxu1  ;;  %v8508_v16 = vpop.f32.mrb[95].mxu0  ;;  %v5761_v4 = vld [vmem:[%s9057_s16 + $0x18] sm:$0xf] }
 0x852   : > { %3863 = vperm.xlu0 %7506, %v3828_v0   ;;  %v5758_v0 = vld [vmem:[%s9057_s16] sm:$0xff] }
 0x854   : > { %3868 = vperm.xlu1 %7507, %v3831_v5  }
 0x855   : > { %v7057_v17 = vpop.f32.mrb[104].mxu1 }
 0x856   : > { %3123 = vperm.xlu0 %7506, %v7051_v6   ;;  %v3212_v19 = vpop.f32.mrb[105].mxu1 }
 0x857   : > { %v7058_v20 = vpop.f32.mrb[106].mxu1 }
 0x858   : > { %3118 = vperm.xlu1 %7507, %v3077_v14   ;;  %v3215_v22 = vpop.f32.mrb[107].mxu1 }
 0x85a   : > { %3113 = vperm.xlu0 %7506, %v3074_v8  }
 0x85c   : > { %3262 = vperm.xlu1 %7507, %v7058_v20  }
 0x85d   : > { %v7061_v23 = vpop.f32.mrb[108].mxu1 }
 0x85e   : > { %3883 = vperm.xlu0 %7506, %v3844_v10   ;;  %v3228_v24 = vpop.f32.mrb[109].mxu1 }
 0x85f   : > { %v7062_v26 = vpop.f32.mrb[110].mxu1 }
 0x860   : > { %3252 = vperm.xlu1 %7507, %v3215_v22   ;;  %v3231_v28 = vpop.f32.mrb[111].mxu1 }
 0x862   : > { %3257 = vperm.xlu0 %7506, %v7057_v17  }
 0x864   : > { %3277 = vperm.xlu1 %7507, %v7061_v23  }
 0x865   : > { %v7067_v29 = vpop.f32.mrb[112].mxu1 }
 0x866   : > { %3247 = vperm.xlu0 %7506, %v3212_v19   ;;  %v3366_v9 = vpop.f32.mrb[113].mxu1 }
 0x867   : > { %v7068_v30 = vpop.f32.mrb[114].mxu1 }
 0x868   : > { %3272 = vperm.xlu1 %7507, %v3231_v28   ;;  %v3369_v31 = vpop.f32.mrb[115].mxu1 }
 0x86a   : > { %3267 = vperm.xlu0 %7506, %v3228_v24  }
 0x86c   : > { %3416 = vperm.xlu1 %7507, %v7068_v30  }
 0x86d   : > { %v7071_v15 = vpop.f32.mrb[116].mxu1 }
 0x86e   : > { %3411 = vperm.xlu0 %7506, %v7067_v29   ;;  %v3382_v33 = vpop.f32.mrb[117].mxu1 }
 0x86f   : > { %v7072_v34 = vpop.f32.mrb[118].mxu1 }
 0x870   : > { %3406 = vperm.xlu1 %7507, %v3369_v31   ;;  %v3385_v35 = vpop.f32.mrb[119].mxu1 }
 0x872   : > { %3401 = vperm.xlu0 %7506, %v3366_v9  }
 0x874   : > { %3421 = vperm.xlu1 %7507, %v3382_v33   ;;  %v2974_v33 = vlaneseq }
 0x875   : > { %v7077_v21 = vpop.f32.mrb[120].mxu1 }
 0x876   : > { %v3520_v36 = vpop.f32.mrb[121].mxu1  ;;  %3431 = vperm.xlu0 %7506, %v7071_v15  }
 0x877   : > { %v7078_v38 = vpop.f32.mrb[122].mxu1 }
 0x878   : > { %3570 = vperm.xlu1 %7507, %v7078_v38   ;;  %v3523_v39 = vpop.f32.mrb[123].mxu1 }
 0x87a   : > { %3426 = vperm.xlu0 %7506, %v3385_v35  }
 0x87c   : > { %3560 = vperm.xlu1 %7507, %v3523_v39  }
 0x87d   : > { %v7081_v27 = vpop.f32.mrb[124].mxu1 }
 0x87e   : > { %3565 = vperm.xlu0 %7506, %v7077_v21   ;;  %v3536_v40 = vpop.f32.mrb[125].mxu1  ;;  %v8583_v21 = vand.u32 127, %v2974_v33 }
 0x87f   : > { %v7082_v41 = vpop.f32.mrb[126].mxu1 }
 0x880   : > { %3585 = vperm.xlu1 %7507, %v7081_v27   ;;  %v3539_v42 = vpop.f32.mrb[127].mxu1  ;;  %vm3088_vm10 = vcmp.eq.s32.totalorder %v8583_v21, 0  ;;  %vm3242_vm11 = vcmp.eq.s32.totalorder %v8583_v21, 1  ;;  %vm3396_vm12 = vcmp.eq.s32.totalorder %v8583_v21, 2  ;;  %vm3550_vm13 = vcmp.eq.s32.totalorder %v8583_v21, 3 }
 0x881   : > { %v8591_v27 = vsel %vm3088_vm10, 1.0, %v7613_v25  ;;  %vm3704_vm14 = vcmp.eq.s32.totalorder %v8583_v21, 4  ;;  %vm3858_vm15 = vcmp.eq.s32.totalorder %v8583_v21, 5  ;;  %vm4012_vm1 = vcmp.eq.s32.totalorder %v8583_v21, 6 }
 0x882   : > { %3555 = vperm.xlu0 %7506, %v3520_v36   ;;  %v8634_v13 = vsel %vm3704_vm14, 1.0, %v7613_v25  ;;  %v8666_v21 = vsel %vm4012_vm1, 1.0, %v7613_v25 }
 0x884   : > { %3580 = vperm.xlu1 %7507, %v3539_v42  }
 0x885   : > { %v7087_v32 = vpop.f32.mrb[128].mxu1 }
 0x886   : > { %3575 = vperm.xlu0 %7506, %v3536_v40   ;;  %v3674_v43 = vpop.f32.mrb[129].mxu1 }
 0x887   : > { %v7088_v45 = vpop.f32.mrb[130].mxu1 }
 0x888   : > { %3719 = vperm.xlu1 %7507, %v7087_v32   ;;  %v3677_v46 = vpop.f32.mrb[131].mxu1  ;;  %v2978_v32 = vld [vmem:[%s9051_s10 + $0x10] sm:$0xff] }
 0x88a   : > { %3709 = vperm.xlu0 %7506, %v3674_v43   ;;  %v8602_v43 = vsel %vm3242_vm11, 1.0, %v7613_v25 }
 0x88c   : > { %3714 = vperm.xlu1 %7507, %v3677_v46  }
 0x88d   : > { %v7091_v37 = vpop.f32.mrb[132].mxu1 }
 0x88e   : > { %3724 = vperm.xlu0 %7506, %v7088_v45   ;;  %v3690_v47 = vpop.f32.mrb[133].mxu1 }
 0x88f   : > { %v7092_v44 = vpop.f32.mrb[134].mxu1 }
 0x890   : > { %3729 = vperm.xlu1 %7507, %v3690_v47   ;;  %v3693_v48 = vpop.f32.mrb[135].mxu1  ;;  %v2976_v47 = vld [vmem:[%s9051_s10] sm:$0xff]  ;;  %v8613_v44 = vsel %vm3396_vm12, 1.0, %v7613_v25 }
 0x892   : > { %3734 = vperm.xlu0 %7506, %v3693_v48  }
 0x895   : > { %v7107_v49 = vpop.f32.mrb[136].mxu1 }
 0x896   : > { %v3982_v50 = vpop.f32.mrb[137].mxu1  ;;  %4027 = vperm.xlu1 %7507, %v7107_v49  }
 0x897   : > { %v7108_v51 = vpop.f32.mrb[138].mxu1 }
 0x898   : > { %4032 = vperm.xlu0 %7506, %v7108_v51   ;;  %v3985_v18 = vpop.f32.mrb[139].mxu1 }
 0x89a   : > { %4017 = vperm.xlu1 %7507, %v3982_v50  }
 0x89c   : > { %4022 = vperm.xlu0 %7506, %v3985_v18  }
 0x89d   : > { %v7111_v52 = vpop.f32.mrb[140].mxu1 }
 0x89e   : > { %3888 = vperm.xlu1 %7507, %v8508_v16   ;;  %v3998_v53 = vpop.f32.mrb[141].mxu1 }
 0x89f   : > { %v7112_v54 = vpop.f32.mrb[142].mxu1 }
 0x8a0   : > { %3739 = vperm.xlu0 %7506, %v7091_v37   ;;  %v4001_v55 = vpop.f32.mrb[143].mxu1  ;;  %v2979_v54 = vld [vmem:[%s9051_s10 + $0x18] sm:$0xff] }
 0x8a2   : > { %4037 = vperm.xlu1 %7507, %v3998_v53  }
 0x8a4   : > { %4042 = vperm.xlu0 %7506, %v4001_v55  }
 0x8a6   : > { %3893 = vperm.xlu1 %7507, %v8506_v7  }
 0x8a8   : > { %4047 = vperm.xlu0 %7506, %v7111_v52   ;;  %v8621_v52 = vsel %vm3550_vm13, 1.0, %v7613_v25 }
 0x8aa   : > { %5006 = vperm.xlu1 %7507, %v4997_v56  }
 0x8ac   : > { %5011 = vperm.xlu0 %7506, %v4998_v57  }
 0x8ae   : > { %5016 = vperm.xlu1 %7507, %v4999_v58  }
 0x8b0   : > { %5021 = vperm.xlu0 %7506, %v5000_v59  }
 0x8b2   : > { %5026 = vperm.xlu1 %7507, %v5001_v60  }
 0x8b4   : > { %5031 = vperm.xlu0 %7506, %v5002_v61   ;;  %v8637_v61 = vsel %vm3858_vm15, 1.0, %v7613_v25 }
 0x8b6   : > { %5036 = vperm.xlu1 %7507, %v5003_v63  }
 0x8b8   : > { %5764 = vperm.xlu0 %7506, %v5758_v0  }
 0x8ba   : > { %5769 = vperm.xlu1 %7507, %v5759_v1  }
 0x8bc   : > { %5774 = vperm.xlu0 %7506, %v5760_v3  }
 0x8be   : > { %5779 = vperm.xlu1 %7507, %v5761_v4  }
 0x8c5   : > { %v3104_v5 = vpop.permute.xlu0 %3103 }
 0x8c6   : > { %v3128_v42 = vmul.f32 %v8591_v27, %v3104_v5 }
 0x8c7   : > { %v3109_v6 = vpop.permute.xlu1 %3108 }
 0x8c8   : > { %v3135_v49 = vadd.f32 %v3128_v42, %v2978_v32  ;;  %v3129_v18 = vmul.f32 %v8591_v27, %v3109_v6 }
 0x8c9   : > { %v8553_v7 = vpop.permute.xlu0 %3873 }
 0x8ca   : > { %v3136_v1 = vadd.f32 %v3129_v18, %v2979_v54 }
 0x8cb   : > { %v8555_v8 = vpop.permute.xlu1 %3878 }
 0x8cd   : > { %v3094_v10 = vpop.permute.xlu0 %3093 }
 0x8ce   : > { %v3126_v46 = vmul.f32 %v8591_v27, %v3094_v10 }
 0x8cf   : > { %v8557_v11 = vpop.permute.xlu1 %3098 }
 0x8d0   : > { %v3133_v55 = vadd.f32 %v3126_v46, %v2976_v47  ;;  %v3127_v42 = vmul.f32 %v8591_v27, %v8557_v11  ;;  %v3899_v11 = vmul.f32 %v8637_v61, %v8555_v8  ;;  %v2980_v8 = vld [vmem:[%s9051_s10 + $0x20] sm:$0xff] }
 0x8d1   : > { %v8559_v12 = vpop.permute.xlu0 %3863 }
 0x8d3   : > { %v8561_v14 = vpop.permute.xlu1 %3868 }
 0x8d5   : > { %v8563_v16 = vpop.permute.xlu0 %3123 }
 0x8d7   : > { %v8565_v17 = vpop.permute.xlu1 %3118 }
 0x8d9   : > { %v8567_v19 = vpop.permute.xlu0 %3113 }
 0x8db   : > { %v3263_v20 = vpop.permute.xlu1 %3262 }
 0x8dc   : > { %v3283_v59 = vmul.f32 %v8602_v43, %v3263_v20  ;;  %v3898_v20 = vmul.f32 %v8637_v61, %v8553_v7  ;;  %v2977_v7 = vld [vmem:[%s9051_s10 + $0x8] sm:$0xff] }
 0x8dd   : > { %v8569_v22 = vpop.permute.xlu0 %3883 }
 0x8df   : > { %v8571_v23 = vpop.permute.xlu1 %3252 }
 0x8e1   : > { %v3258_v24 = vpop.permute.xlu0 %3257 }
 0x8e2   : > { %v3282_v37 = vmul.f32 %v8602_v43, %v3258_v24  ;;  %v3290_v24 = vadd.f32 %v3283_v59, %v3136_v1 }
 0x8e3   : > { %v8573_v26 = vpop.permute.xlu1 %3277 }
 0x8e4   : > { %v3289_v56 = vadd.f32 %v3282_v37, %v3135_v49 }
 0x8e5   : > { %v3248_v28 = vpop.permute.xlu0 %3247 }
 0x8e6   : > { %v3280_v50 = vmul.f32 %v8602_v43, %v3248_v28 }
 0x8e7   : > { %v8575_v29 = vpop.permute.xlu1 %3272 }
 0x8e8   : > { %v3287_v62 = vadd.f32 %v3280_v50, %v3133_v55 }
 0x8e9   : > { %v8577_v9 = vpop.permute.xlu0 %3267 }
 0x8eb   : > { %v3417_v30 = vpop.permute.xlu1 %3416 }
 0x8ec   : > { %v3437_v4 = vmul.f32 %v8613_v44, %v3417_v30  ;;  %v3896_v30 = vmul.f32 %v8637_v61, %v8559_v12  ;;  %v3134_v12 = vadd.f32 %v3127_v42, %v2977_v7 }
 0x8ed   : > { %v3412_v31 = vpop.permute.xlu0 %3411 }
 0x8ee   : > { %v3436_v51 = vmul.f32 %v8613_v44, %v3412_v31  ;;  %v3444_v46 = vadd.f32 %v3437_v4, %v3290_v24  ;;  %v3132_v24 = vmul.f32 %v8591_v27, %v8563_v16  ;;  %v3286_v16 = vmul.f32 %v8602_v43, %v8573_v26 }
 0x8ef   : > { %v8579_v15 = vpop.permute.xlu1 %3406 }
 0x8f0   : > { %v3443_v63 = vadd.f32 %v3436_v51, %v3289_v56  ;;  %v3435_v18 = vmul.f32 %v8613_v44, %v8579_v15 }
 0x8f1   : > { %v3402_v34 = vpop.permute.xlu0 %3401 }
 0x8f2   : > { %v3434_v57 = vmul.f32 %v8613_v44, %v3402_v34 }
 0x8f3   : > { %v8581_v35 = vpop.permute.xlu1 %3421 }
 0x8f4   : > { %v3441_v5 = vadd.f32 %v3434_v57, %v3287_v62 }
 0x8f5   : > { %v8585_v36 = vpop.permute.xlu0 %3431 }
 0x8f7   : > { %v3571_v38 = vpop.permute.xlu1 %3570 }
 0x8f8   : > { %v3591_v31 = vmul.f32 %v8621_v52, %v3571_v38  ;;  %v3281_v38 = vmul.f32 %v8602_v43, %v8571_v23 }
 0x8f9   : > { %v8588_v39 = vpop.permute.xlu0 %3426 }
 0x8fa   : > { %v3598_v49 = vadd.f32 %v3591_v31, %v3444_v46  ;;  %v3288_v56 = vadd.f32 %v3281_v38, %v3134_v12 }
 0x8fb   : > { %v8593_v40 = vpop.permute.xlu1 %3560 }
 0x8fc   : > { %v3589_v57 = vmul.f32 %v8621_v52, %v8593_v40  ;;  %v3442_v62 = vadd.f32 %v3435_v18, %v3288_v56  ;;  %v3284_v40 = vmul.f32 %v8602_v43, %v8577_v9 }
 0x8fd   : > { %v3566_v41 = vpop.permute.xlu0 %3565 }
 0x8fe   : > { %v3590_v58 = vmul.f32 %v8621_v52, %v3566_v41  ;;  %v3596_v1 = vadd.f32 %v3589_v57, %v3442_v62 }
 0x8ff   : > { %v8604_v45 = vpop.permute.xlu1 %3585 }
 0x900   : > { %v3597_v6 = vadd.f32 %v3590_v58, %v3443_v63  ;;  %v3130_v58 = vmul.f32 %v8591_v27, %v8567_v19  ;;  %v3131_v63 = vmul.f32 %v8591_v27, %v8565_v17  ;;  %v2981_v19 = vld [vmem:[%s9051_s10 + $0x28] sm:$0xff]  ;;  %v3897_v17 = vmul.f32 %v8637_v61, %v8561_v14 }
 0x901   : > { %v3556_v48 = vpop.permute.xlu0 %3555  ;;  %v3594_v12 = vmul.f32 %v8621_v52, %v8604_v45 }
 0x902   : > { %v3588_v0 = vmul.f32 %v8621_v52, %v3556_v48  ;;  %v3137_v4 = vadd.f32 %v3130_v58, %v2980_v8 }
 0x903   : > { %v8623_v53 = vpop.permute.xlu1 %3580 }
 0x904   : > { %v3595_v33 = vadd.f32 %v3588_v0, %v3441_v5  ;;  %v3285_v5 = vmul.f32 %v8602_v43, %v8575_v29  ;;  %v3291_v31 = vadd.f32 %v3284_v40, %v3137_v4  ;;  %v2982_v29 = vld [vmem:[%s9051_s10 + $0x30] sm:$0xff] }
 0x905   : > { %v8631_v60 = vpop.permute.xlu0 %3575 }
 0x907   : > { %v3720_v3 = vpop.permute.xlu1 %3719 }
 0x908   : > { %v3744_v10 = vmul.f32 %v8634_v13, %v3720_v3 }
 0x909   : > { %v3710_v28 = vpop.permute.xlu0 %3709 }
 0x90a   : > { %v3751_v34 = vadd.f32 %v3744_v10, %v3597_v6  ;;  %v3742_v41 = vmul.f32 %v8634_v13, %v3710_v28  ;;  %v3438_v6 = vmul.f32 %v8613_v44, %v8581_v35  ;;  %v3138_v28 = vadd.f32 %v3131_v63, %v2981_v19 }
 0x90b   : > { %v3715_v32 = vpop.permute.xlu1 %3714  ;;  %v3592_v35 = vmul.f32 %v8621_v52, %v8631_v60 }
 0x90c   : > { %v3749_v37 = vadd.f32 %v3742_v41, %v3595_v33  ;;  %v3905_v47 = vadd.f32 %v3898_v20, %v3751_v34  ;;  %v3743_v15 = vmul.f32 %v8634_v13, %v3715_v32  ;;  %v3439_v33 = vmul.f32 %v8613_v44, %v8588_v39 }
 0x90d   : > { %v3725_v48 = vpop.permute.xlu0 %3724  ;;  %v3292_v27 = vadd.f32 %v3285_v5, %v3138_v28  ;;  %v3445_v32 = vadd.f32 %v3438_v6, %v3291_v31  ;;  %v3593_v39 = vmul.f32 %v8621_v52, %v8623_v53  ;;  %v7572_v6 = vld [vmem:[%s9052_s11 + $0x24] sm:$0xff]   ;;  %v7577_v28 = vld [vmem:[%s9052_s11 + $0x18] ss:$0 sps:$4 sm:$0xff]  }
 0x90e   : > { %v3745_v50 = vmul.f32 %v8634_v13, %v3725_v48  ;;  %v3903_v51 = vadd.f32 %v3896_v30, %v3749_v37  ;;  %v3750_v9 = vadd.f32 %v3743_v15, %v3596_v1  ;;  %v3440_v48 = vmul.f32 %v8613_v44, %v8585_v36 }
 0x90f   : > { %v3730_v55 = vpop.permute.xlu1 %3729  ;;  %v3446_v38 = vadd.f32 %v3439_v33, %v3292_v27  ;;  %v3599_v26 = vadd.f32 %v3592_v35, %v3445_v32  ;;  %v3900_v36 = vmul.f32 %v8637_v61, %v8569_v22 }
 0x910   : > { %v3752_v54 = vadd.f32 %v3745_v50, %v3598_v49  ;;  %v3746_v46 = vmul.f32 %v8634_v13, %v3730_v55  ;;  %v3904_v7 = vadd.f32 %v3897_v17, %v3750_v9  ;;  %v7574_v17 = vld [vmem:[%s9052_s11 + $0x2c] sm:$0xff]  }
 0x911   : > { %v3735_v59 = vpop.permute.xlu0 %3734  ;;  %v6190_v9 = vld [vmem:[%s9053_s12 + $0x8] sm:$0x7f] }
 0x912   : > { %v3906_v23 = vadd.f32 %v3899_v11, %v3752_v54  ;;  %v3747_v43 = vmul.f32 %v8634_v13, %v3735_v59  ;;  %v3600_v54 = vadd.f32 %v3593_v39, %v3446_v38  ;;  %v3753_v55 = vadd.f32 %v3746_v46, %v3599_v26  ;;  %v7579_v38 = vld [vmem:[%s9052_s11 + $0x40] sm:$0xff]   ;;  %v7581_v26 = vld [vmem:[%s9052_s11 + $0x50] ss:$0 sps:$4 sm:$0xff]  }
 0x914   : > { %v3754_v58 = vadd.f32 %v3747_v43, %v3600_v54  ;;  %v3907_v62 = vadd.f32 %v3900_v36, %v3753_v55  ;;  %v7582_v43 = vld [vmem:[%s9052_s11 + $0x54] sm:$0xff]  }
 0x915   : > { %v4028_v0 = vpop.permute.xlu1 %4027 }
 0x916   : > { %v4052_v3 = vmul.f32 %v8666_v21, %v4028_v0 }
 0x917   : > { %v4033_v10 = vpop.permute.xlu0 %4032 }
 0x918   : > { %v4053_v20 = vmul.f32 %v8666_v21, %v4033_v10  ;;  %v4059_v14 = vadd.f32 %v4052_v3, %v3905_v47  ;;  %v3139_v47 = vadd.f32 %v3132_v24, %v2982_v29  ;;  %v7573_v10 = vld [vmem:[%s9052_s11 + $0x8] sm:$0xff]   ;;  %v7575_v24 = vld [vmem:[%s9052_s11 + $0x34] ss:$0 sps:$4 sm:$0xff]  }
 0x919   : > { %v4018_v34 = vpop.permute.xlu1 %4017 }
 0x91a   : > { %v4060_v41 = vadd.f32 %v4053_v20, %v3906_v23  ;;  %v4050_v42 = vmul.f32 %v8666_v21, %v4018_v34  ;;  %v3293_v53 = vadd.f32 %v3286_v16, %v3139_v47  ;;  %v7576_v20 = vld [vmem:[%s9052_s11 + $0x10] sm:$0xff]   ;;  %v4172_v16 = vld [vmem:[%s9053_s12] sm:$0x7f] }
 0x91b   : > { %v4023_v30 = vpop.permute.xlu0 %4022 }
 0x91c   : > { %v8702_v37 = vpack.c.bf16 %v4060_v41, %v4059_v14  ;;  %v4051_v60 = vmul.f32 %v8666_v21, %v4023_v30  ;;  %v4057_v50 = vadd.f32 %v4050_v42, %v3903_v51  ;;  %v3447_v44 = vadd.f32 %v3440_v48, %v3293_v53  ;;  %v7578_v48 = vld [vmem:[%s9052_s11 + $0x38] sm:$0xff]   ;;  %v6222_v53 = vld [vmem:[%s9053_s12 + $0x10] sm:$0x7f] }
 0x91d   : > { %v3889_v49 = vpop.permute.xlu1 %3888 }
 0x91e   : > { %v4058_v11 = vadd.f32 %v4051_v60, %v3904_v7  ;;  %v3901_v57 = vmul.f32 %v8637_v61, %v3889_v49  ;;  %v3601_v45 = vadd.f32 %v3594_v12, %v3447_v44  ;;  %v7580_v49 = vld [vmem:[%s9052_s11 + $0x48] sm:$0xff]  }
 0x91f   : > { %v3740_v18 = vpop.permute.xlu0 %3739 }
 0x920   : > { %v8710_v56 = vpack.c.bf16 %v4058_v11, %v4057_v50  ;;  %v3748_v51 = vmul.f32 %v8634_v13, %v3740_v18  ;;  %v3908_v8 = vadd.f32 %v3901_v57, %v3754_v58  ;;  %v7584_v50 = vld [vmem:[%s9052_s11 + $0x64] sm:$0xff]   ;;  %v7585_v11 = vld [vmem:[%s9052_s11 + $0x6c] ss:$0 sps:$4 sm:$0xff]  }
 0x921   : > { %v4038_v23 = vpop.permute.xlu1 %4037 }
 0x922   : > { %v4054_v59 = vmul.f32 %v8666_v21, %v4038_v23  ;;  %7113 = vmatprep.subr.bf16.mxu0 %v8710_v56  ;;  %7129 = vmatprep.subr.bf16.mxu1 %v8710_v56  ;;  %v3755_v15 = vadd.f32 %v3748_v51, %v3601_v45 }
 0x923   : > { %7114 = vmatpush3.bf16.msra.mxu0 %v8710_v56  ;;  %7130 = vmatpush3.bf16.msra.mxu1 %v8710_v56  ;;  %v4043_v52 = vpop.permute.xlu0 %4042 }
 0x924   : > { %v4055_v22 = vmul.f32 %v8666_v21, %v4043_v52  ;;  %7115 = vmatprep.subr.bf16.mxu0 %v8702_v37  ;;  %7131 = vmatprep.subr.bf16.mxu1 %v8702_v37  ;;  %v4061_v63 = vadd.f32 %v4054_v59, %v3907_v62 }
 0x925   : > { %v3894_v13 = vpop.permute.xlu1 %3893 }
 0x926   : > { %v4062_v40 = vadd.f32 %v4055_v22, %v3908_v8  ;;  %v3902_v0 = vmul.f32 %v8637_v61, %v3894_v13 }
 0x927   : > { %7116 = vmatpush3.bf16.msra.mxu0 %v8702_v37  ;;  %7132 = vmatpush3.bf16.msra.mxu1 %v8702_v37  ;;  %v4048_v19 = vpop.permute.xlu0 %4047 }
 0x928   : > { %v8727_v1 = vpack.c.bf16 %v4062_v40, %v4061_v63  ;;  %v3909_v3 = vadd.f32 %v3902_v0, %v3755_v15  ;;  %v4056_v4 = vmul.f32 %v8666_v21, %v4048_v19 }
 0x92a   : > { %v4063_v5 = vadd.f32 %v4056_v4, %v3909_v3  ;;  %7117 = vmatprep.subr.bf16.mxu0 %v8727_v1  ;;  %7133 = vmatprep.subr.bf16.mxu1 %v8727_v1 }
 0x92b   : > { %7118 = vmatpush3.bf16.msra.mxu0 %v8727_v1  ;;  %7134 = vmatpush3.bf16.msra.mxu1 %v8727_v1 }
 0x92c   : > { %v8734_v61 = vpack.c.bf16 %v4063_v5, %v4063_v5 }
 0x92e   : > { %7479 = vmatprep.subr.msk.bf16.mxu0 %vm803_vm2, %v8734_v61  ;;  %7480 = vmatprep.subr.msk.bf16.mxu1 %vm803_vm2, %v8734_v61  ;;  %v8742_v21 = vsel %vm803_vm2, %v8734_v61, 0 }
 0x92f   : > { %7120 = vmatpush3.bf16.msra.mxu0 %v8742_v21  ;;  %7136 = vmatpush3.bf16.msra.mxu1 %v8742_v21 }
 0x930   : > { %7145 = vmatprep.subr.mxu0 %v7613_v25  ;;  %7425 = vmatprep.subr.mxu1 %v7613_v25 }
 0x932   : > { %7138 = vmatmul.mubr.msk.bf16.vlgmr.msra.gmra.mrb[144].mxu1 %vm1592_vm7, %v7572_v6  ;;  %7122 = vmatmul.mubr.msk.bf16.vlgmr.msra.gmra.mrb[96].mxu0 %vm1592_vm7, %v7573_v10 }
 0x933   : > { %7146 = vmatpush3.msk.msra.mxu0 %vm4299_vm3, %v6190_v9  ;;  %7141 = vmatprep.mubr.msk.bf16.mxu1 %vm1592_vm7, %v7574_v17 }
 0x934   : > { %7191 = vmatprep.subr.bf16.mxu0 %v8710_v56  ;;  %7125 = vmatprep.mubr.msk.bf16.mxu0 %vm1592_vm7, %v7576_v20 }
 0x935   : > { %7426 = vmatpush3.msk.msra.mxu1 %vm4299_vm3, %v6190_v9 }
 0x936   : > { %7168 = vmatprep.subr.mxu1 %v7613_v25 }
 0x93a   : > { %7142 = vmatmul.mubr.msk.bf16.gmra.mrb[148].mxu1 %vm1592_vm7, %v7575_v24  ;;  %7126 = vmatmul.mubr.msk.bf16.gmra.mrb[100].mxu0 %vm1592_vm7, %v7577_v28 }
 0x93b   : > { %7147 = vmatprep.mubr.msk.f32.mxu0 %vm7612_vm5, %v7613_v25  ;;  %7165 = vmatprep.mubr.msk.f32.mxu1 %vm7612_vm5, %v7613_v25 }
 0xa05   : > { %v7139_v31 = vpop.f32.mrb[144].mxu1  ;;  %v7123_v33 = vpop.f32.mrb[96].mxu0 }
 0xa06   : > { %v4245_v34 = vpop.f32.mrb[145].mxu1  ;;  %v4142_v29 = vpop.f32.mrb[97].mxu0 }
 0xa07   : > { %7148 = vmatmul.mubr.msk.f32.vlgmr.msra.gmra.mrb[82].mxu0 %vm4277_vm4, %v4245_v34  ;;  %v7140_v35 = vpop.f32.mrb[146].mxu1  ;;  %v7124_v14 = vpop.f32.mrb[98].mxu0 }
 0xa08   : > { %7192 = vmatpush3.bf16.msra.mxu0 %v8710_v56  ;;  %v4248_v41 = vpop.f32.mrb[147].mxu1  ;;  %7150 = vmatprep.mubr.msk.f32.mxu0 %vm7612_vm5, %v7613_v25  ;;  %v4145_v42 = vpop.f32.mrb[99].mxu0 }
 0xa09   : > { %7193 = vmatprep.subr.bf16.mxu0 %v8702_v37 }
 0xa0b   : > { %7151 = vmatmul.mubr.msk.f32.gmra.mrb[104].mxu0 %vm4277_vm4, %v4248_v41 }
 0xa0c   : > { %7194 = vmatpush3.bf16.msra.mxu0 %v8702_v37  ;;  %7153 = vmatprep.mubr.msk.f32.mxu0 %vm7612_vm5, %v7613_v25 }
 0xa0d   : > { %7195 = vmatprep.subr.bf16.mxu0 %v8727_v1  ;;  %v7143_v27 = vpop.f32.mrb[148].mxu1  ;;  %v7127_v32 = vpop.f32.mrb[100].mxu0 }
 0xa0e   : > { %7166 = vmatmul.mubr.msk.f32.vlgmr.msra.gmra.mrb[94].mxu1 %vm4277_vm4, %v7143_v27  ;;  %v4261_v39 = vpop.f32.mrb[149].mxu1  ;;  %v4158_v30 = vpop.f32.mrb[101].mxu0 }
 0xa0f   : > { %7154 = vmatmul.mubr.msk.f32.gmra.mrb[106].mxu0 %vm4277_vm4, %v7139_v31  ;;  %7169 = vmatpush3.msk.msra.mxu1 %vm4299_vm3, %v4172_v16  ;;  %v7144_v46 = vpop.f32.mrb[150].mxu1  ;;  %v7128_v7 = vpop.f32.mrb[102].mxu0 }
 0xa10   : > { %7196 = vmatpush3.bf16.msra.mxu0 %v8727_v1  ;;  %7156 = vmatprep.mubr.msk.f32.mxu0 %vm7612_vm5, %v7613_v25  ;;  %v4264_v60 = vpop.f32.mrb[151].mxu1  ;;  %v4161_v47 = vpop.f32.mrb[103].mxu0 }
 0xa11   : > { %7481 = vmatprep.subr.msk.bf16.mxu0 %vm803_vm2, %v8734_v61  ;;  %7170 = vmatprep.mubr.msk.f32.mxu1 %vm7612_vm5, %v7613_v25 }
 0xa12   : > { %7171 = vmatmul.mubr.msk.f32.vlgmr.msra.gmra.mrb[152].mxu1 %vm4277_vm4, %v4142_v29  ;;  %7207 = vmatprep.subr.mxu1 %v7613_v25 }
 0xa13   : > { %7157 = vmatmul.mubr.msk.f32.gmra.mrb[108].mxu0 %vm4277_vm4, %v7140_v35  ;;  %7173 = vmatprep.mubr.msk.f32.mxu1 %vm7612_vm5, %v7613_v25 }
 0xa14   : > { %7198 = vmatpush3.bf16.msra.mxu0 %v8742_v21  ;;  %7159 = vmatprep.mubr.msk.f32.mxu0 %vm7612_vm5, %v7613_v25 }
 0xa15   : > { %7230 = vmatprep.subr.bf16.mxu0 %v8710_v56  ;;  %7208 = vmatpush3.msk.msra.mxu1 %vm4299_vm3, %v6222_v53 }
 0xa16   : > { %7174 = vmatmul.mubr.msk.f32.gmra.mrb[154].mxu1 %vm4277_vm4, %v4145_v42  ;;  %7246 = vmatprep.subr.mxu1 %v7613_v25 }
 0xa17   : > { %7160 = vmatmul.mubr.msk.f32.gmra.mrb[110].mxu0 %vm4277_vm4, %v4261_v39  ;;  %7176 = vmatprep.mubr.msk.f32.mxu1 %vm7612_vm5, %v7613_v25 }
 0xa18   : > { %7162 = vmatprep.mubr.msk.f32.mxu0 %vm7612_vm5, %v7613_v25 }
 0xa1a   : > { %7177 = vmatmul.mubr.msk.f32.gmra.mrb[156].mxu1 %vm4277_vm4, %v7123_v33 }
 0xa1b   : > { %7163 = vmatmul.mubr.msk.f32.gmra.mrb[112].mxu0 %vm4277_vm4, %v4264_v60  ;;  %7179 = vmatprep.mubr.msk.f32.mxu1 %vm7612_vm5, %v7613_v25 }
 0xa1c   : > { %7199 = vmatprep.mubr.msk.bf16.mxu0 %vm1592_vm7, %v7578_v48  ;;  %v7587_v48 = vld [vmem:[%s9055_s14 + $0x20] sm:$0xff]  }
 0xa1e   : > { %7180 = vmatmul.mubr.msk.f32.gmra.mrb[158].mxu1 %vm4277_vm4, %v7124_v14 }
 0xa1f   : > { %7200 = vmatmul.mubr.msk.bf16.vlgmr.msra.gmra.mrb[116].mxu0 %vm1592_vm7, %v7579_v38  ;;  %7182 = vmatprep.mubr.msk.f32.mxu1 %vm7612_vm5, %v7613_v25 }
 0xa20   : > { %7231 = vmatpush3.bf16.msra.mxu0 %v8710_v56  ;;  %7203 = vmatprep.mubr.msk.bf16.mxu0 %vm1592_vm7, %v7580_v49 }
 0xa21   : > { %7232 = vmatprep.subr.bf16.mxu0 %v8702_v37 }
 0xa22   : > { %7183 = vmatmul.mubr.msk.f32.gmra.mrb[160].mxu1 %vm4277_vm4, %v4158_v30 }
 0xa23   : > { %7185 = vmatprep.mubr.msk.f32.mxu1 %vm7612_vm5, %v7613_v25 }
 0xa24   : > { %7233 = vmatpush3.bf16.msra.mxu0 %v8702_v37  ;;  %v7583_v37 = vld [vmem:[%s9052_s11 + $0x5c] sm:$0xff]  }
 0xa25   : > { %7234 = vmatprep.subr.bf16.mxu0 %v8727_v1 }
 0xa26   : > { %7186 = vmatmul.mubr.msk.f32.gmra.mrb[162].mxu1 %vm4277_vm4, %v4161_v47  ;;  %v7586_v47 = vld [vmem:[%s9055_s14] sm:$0xff]  }
 0xa27   : > { %7188 = vmatprep.mubr.msk.f32.mxu1 %vm7612_vm5, %v7613_v25  ;;  %7204 = vmatmul.mubr.msk.bf16.gmra.mrb[120].mxu0 %vm1592_vm7, %v7581_v26 }
 0xa28   : > { %7235 = vmatpush3.bf16.msra.mxu0 %v8727_v1  ;;  %7238 = vmatprep.mubr.msk.bf16.mxu0 %vm1592_vm7, %v7582_v43 }
 0xa29   : > { %7482 = vmatprep.subr.msk.bf16.mxu0 %vm803_vm2, %v8734_v61  ;;  %v6246_v61 = vld [vmem:[%s9053_s12 + $0x18] sm:$0x7f] }
 0xa2a   : > { %7189 = vmatmul.mubr.msk.f32.gmra.mrb[164].mxu1 %vm4277_vm4, %v7127_v32 }
 0xa2b   : > { %7209 = vmatprep.mubr.msk.f32.mxu1 %vm7612_vm5, %v7613_v25 }
 0xa2c   : > { %7237 = vmatpush3.bf16.msra.mxu0 %v8742_v21 }
 0xa2f   : > { %7239 = vmatmul.mubr.msk.bf16.vlgmr.msra.gmra.mrb[124].mxu0 %vm1592_vm7, %v7583_v37 }
 0xa30   : > { %7242 = vmatprep.mubr.msk.bf16.mxu0 %vm1592_vm7, %v7584_v50 }
 0xa37   : > { %7243 = vmatmul.mubr.msk.bf16.gmra.mrb[128].mxu0 %vm1592_vm7, %v7585_v11 }
 0xa38   : > { %7277 = vmatprep.mubr.msk.bf16.mxu0 %vm1592_vm7, %v7586_v47 }
 0xada   : > { %v4369_v12 = vpop.f32.mrb[82].mxu0 }
 0xadb   : > { %v7149_v18 = vpop.f32.mrb[83].mxu0 }
 0xade   : > { %v4374_v54 = vpop.f32.mrb[104].mxu0 }
 0xadf   : > { %v7152_v55 = vpop.f32.mrb[105].mxu0 }
 0xae1   : > { %v4399_v56 = vpop.f32.mrb[94].mxu1 }
 0xae2   : > { %v4379_v57 = vpop.f32.mrb[106].mxu0  ;;  %v7167_v36 = vpop.f32.mrb[95].mxu1 }
 0xae3   : > { %v7155_v44 = vpop.f32.mrb[107].mxu0 }
 0xae5   : > { %v4493_v23 = vpop.f32.mrb[152].mxu1 }
 0xae6   : > { %v4384_v58 = vpop.f32.mrb[108].mxu0  ;;  %v8882_v51 = vadd.f32 %v4493_v23, %v4369_v12  ;;  %v7172_v59 = vpop.f32.mrb[153].mxu1 }
 0xae7   : > { %v7158_v45 = vpop.f32.mrb[109].mxu0 }
 0xae9   : > { %v4498_v52 = vpop.f32.mrb[154].mxu1 }
 0xaea   : > { %v4389_v8 = vpop.f32.mrb[110].mxu0  ;;  %v8884_v62 = vadd.f32 %v4498_v52, %v4374_v54  ;;  %v7175_v22 = vpop.f32.mrb[155].mxu1 }
 0xaeb   : > { %v7161_v13 = vpop.f32.mrb[111].mxu0 }
 0xaed   : > { %v4503_v15 = vpop.f32.mrb[156].mxu1 }
 0xaee   : > { %v4394_v63 = vpop.f32.mrb[112].mxu0  ;;  %v8886_v40 = vadd.f32 %v4503_v15, %v4379_v57  ;;  %v7178_v0 = vpop.f32.mrb[157].mxu1 }
 0xaef   : > { %v7164_v19 = vpop.f32.mrb[113].mxu0 }
 0xaf1   : > { %v4508_v1 = vpop.f32.mrb[158].mxu1 }
 0xaf2   : > { %v8888_v3 = vadd.f32 %v4508_v1, %v4384_v58  ;;  %v7201_v4 = vpop.f32.mrb[116].mxu0  ;;  %v7181_v5 = vpop.f32.mrb[159].mxu1 }
 0xaf3   : > { %v4599_v21 = vpop.f32.mrb[117].mxu0 }
 0xaf4   : > { %7210 = vmatmul.mubr.msk.f32.vlgmr.msra.gmra.mrb[166].mxu1 %vm4277_vm4, %v4599_v21  ;;  %v7202_v6 = vpop.f32.mrb[118].mxu0 }
 0xaf5   : > { %v4602_v10 = vpop.f32.mrb[119].mxu0  ;;  %7212 = vmatprep.mubr.msk.f32.mxu1 %vm7612_vm5, %v7613_v25  ;;  %v4513_v17 = vpop.f32.mrb[160].mxu1  ;;  %7247 = vmatpush3.msk.msra.mxu1 %vm4299_vm3, %v6246_v61 }
 0xaf6   : > { %v4514_v9 = vadd.f32 %v4513_v17, %v4389_v8  ;;  %v7184_v20 = vpop.f32.mrb[161].mxu1 }
 0xaf8   : > { %7213 = vmatmul.mubr.msk.f32.gmra.mrb[168].mxu1 %vm4277_vm4, %v4602_v10 }
 0xaf9   : > { %7215 = vmatprep.mubr.msk.f32.mxu1 %vm7612_vm5, %v7613_v25  ;;  %v4518_v24 = vpop.f32.mrb[162].mxu1 }
 0xafa   : > { %v4519_v28 = vadd.f32 %v4518_v24, %v4394_v63  ;;  %v7187_v31 = vpop.f32.mrb[163].mxu1  ;;  %v7205_v33 = vpop.f32.mrb[120].mxu0 }
 0xafb   : > { %v4615_v34 = vpop.f32.mrb[121].mxu0 }
 0xafc   : > { %7216 = vmatmul.mubr.msk.f32.gmra.mrb[170].mxu1 %vm4277_vm4, %v7201_v4  ;;  %v7206_v29 = vpop.f32.mrb[122].mxu0 }
 0xafd   : > { %7218 = vmatprep.mubr.msk.f32.mxu1 %vm7612_vm5, %v7613_v25  ;;  %v4523_v35 = vpop.f32.mrb[164].mxu1  ;;  %v4618_v14 = vpop.f32.mrb[123].mxu0 }
 0xafe   : > { %v4524_v41 = vadd.f32 %v4523_v35, %v4399_v56  ;;  %v7190_v42 = vpop.f32.mrb[165].mxu1 }
 0xb00   : > { %7219 = vmatmul.mubr.msk.f32.gmra.mrb[172].mxu1 %vm4277_vm4, %v7202_v6 }
 0xb01   : > { %7221 = vmatprep.mubr.msk.f32.mxu1 %vm7612_vm5, %v7613_v25 }
 0xb02   : > { %v7240_v16 = vpop.f32.mrb[124].mxu0 }
 0xb03   : > { %v4834_v27 = vpop.f32.mrb[125].mxu0 }
 0xb04   : > { %7222 = vmatmul.mubr.msk.f32.gmra.mrb[174].mxu1 %vm4277_vm4, %v4615_v34  ;;  %v7241_v32 = vpop.f32.mrb[126].mxu0 }
 0xb05   : > { %7224 = vmatprep.mubr.msk.f32.mxu1 %vm7612_vm5, %v7613_v25  ;;  %v4837_v39 = vpop.f32.mrb[127].mxu0 }
 0xb08   : > { %7225 = vmatmul.mubr.msk.f32.gmra.mrb[176].mxu1 %vm4277_vm4, %v4618_v14 }
 0xb09   : > { %7227 = vmatprep.mubr.msk.f32.mxu1 %vm7612_vm5, %v7613_v25 }
 0xb0a   : > { %v7244_v30 = vpop.f32.mrb[128].mxu0 }
 0xb0b   : > { %v4850_v46 = vpop.f32.mrb[129].mxu0 }
 0xb0c   : > { %7228 = vmatmul.mubr.msk.f32.gmra.mrb[178].mxu1 %vm4277_vm4, %v7205_v33  ;;  %v7245_v7 = vpop.f32.mrb[130].mxu0 }
 0xb0d   : > { %7248 = vmatprep.mubr.msk.f32.mxu1 %vm7612_vm5, %v7613_v25  ;;  %v4853_v60 = vpop.f32.mrb[131].mxu0 }
 0xb10   : > { %7249 = vmatmul.mubr.msk.f32.vlgmr.msra.gmra.mrb[180].mxu1 %vm4277_vm4, %v4834_v27 }
 0xb11   : > { %7251 = vmatprep.mubr.msk.f32.mxu1 %vm7612_vm5, %v7613_v25 }
 0xb14   : > { %7252 = vmatmul.mubr.msk.f32.gmra.mrb[182].mxu1 %vm4277_vm4, %v4837_v39 }
 0xb15   : > { %7254 = vmatprep.mubr.msk.f32.mxu1 %vm7612_vm5, %v7613_v25 }
 0xb18   : > { %7255 = vmatmul.mubr.msk.f32.gmra.mrb[184].mxu1 %vm4277_vm4, %v7240_v16 }
 0xb19   : > { %7257 = vmatprep.mubr.msk.f32.mxu1 %vm7612_vm5, %v7613_v25 }
 0xb1c   : > { %7258 = vmatmul.mubr.msk.f32.gmra.mrb[186].mxu1 %vm4277_vm4, %v7241_v32 }
 0xb1d   : > { %7260 = vmatprep.mubr.msk.f32.mxu1 %vm7612_vm5, %v7613_v25 }
 0xb20   : > { %7261 = vmatmul.mubr.msk.f32.gmra.mrb[188].mxu1 %vm4277_vm4, %v4850_v46 }
 0xb21   : > { %7263 = vmatprep.mubr.msk.f32.mxu1 %vm7612_vm5, %v7613_v25 }
 0xb24   : > { %7264 = vmatmul.mubr.msk.f32.gmra.mrb[190].mxu1 %vm4277_vm4, %v4853_v60 }
 0xb25   : > { %7266 = vmatprep.mubr.msk.f32.mxu1 %vm7612_vm5, %v7613_v25 }
 0xb28   : > { %7267 = vmatmul.mubr.msk.f32.gmra.mrb[192].mxu1 %vm4277_vm4, %v7244_v30 }
 0xb29   : > { %7321 = vmatprep.mubr.msk.bf16.mxu1 %vm1592_vm7, %v7587_v48 }
 0xbc7   : > { %v4721_v38 = vpop.f32.mrb[166].mxu1 }
 0xbc8   : > { %v4755_v49 = vadd.f32 %v4721_v38, %v8882_v51  ;;  %v7211_v26 = vpop.f32.mrb[167].mxu1 }
 0xbcb   : > { %v4726_v43 = vpop.f32.mrb[168].mxu1 }
 0xbcc   : > { %v4756_v25 = vadd.f32 %v4726_v43, %v8884_v62  ;;  %v7214_v37 = vpop.f32.mrb[169].mxu1  ;;  %v5007_v62 = vpop.permute.xlu1 %5006 }
 0xbcd   : > { %v7588_v37 = vld [vmem:[%s9055_s14 + $0x8] sm:$0x3f]  }
 0xbcf   : > { %v4731_v50 = vpop.f32.mrb[170].mxu1 }
 0xbd0   : > { %v4757_v11 = vadd.f32 %v4731_v50, %v8886_v40  ;;  %v7217_v53 = vpop.f32.mrb[171].mxu1  ;;  %v5012_v40 = vpop.permute.xlu0 %5011  ;;  %v7589_v50 = vld [vmem:[%s9055_s14 + $0x28] sm:$0x3f]  }
 0xbd1   : > { %v5017_v21 = vpop.permute.xlu1 %5016  ;;  %v7592_v53 = vld [vmem:[%s9055_s14 + $0x30] sm:$0xff]  }
 0xbd3   : > { %v4736_v12 = vpop.f32.mrb[172].mxu1 }
 0xbd4   : > { %v4758_v18 = vadd.f32 %v4736_v12, %v8888_v3  ;;  %v7220_v54 = vpop.f32.mrb[173].mxu1  ;;  %v5022_v20 = vpop.permute.xlu0 %5021  ;;  %v7591_v12 = vld [vmem:[%s9055_s14 + $0x18] sm:$0x3f]  }
 0xbd5   : > { %v5027_v14 = vpop.permute.xlu1 %5026  ;;  %v6267_v54 = vld [vmem:[%s9056_s15 + $0x10] sm:$0xff] }
 0xbd7   : > { %v4741_v55 = vpop.f32.mrb[174].mxu1 }
 0xbd8   : > { %v4759_v56 = vadd.f32 %v4741_v55, %v4514_v9  ;;  %v7223_v57 = vpop.f32.mrb[175].mxu1  ;;  %v5032_v32 = vpop.permute.xlu0 %5031  ;;  %v6268_v55 = vld [vmem:[%s9056_s15 + $0x18] sm:$0x3f] }
 0xbd9   : > { %v5037_v48 = vpop.permute.xlu1 %5036  ;;  %v5129_v57 = vld [vmem:[%s9056_s15] sm:$0xff] }
 0xbdb   : > { %v4746_v36 = vpop.f32.mrb[176].mxu1 }
 0xbdc   : > { %v4760_v44 = vadd.f32 %v4746_v36, %v4519_v28  ;;  %v7226_v23 = vpop.f32.mrb[177].mxu1  ;;  %v5130_v36 = vld [vmem:[%s9056_s15 + $0x8] sm:$0x3f] }
 0xbdf   : > { %v4751_v58 = vpop.f32.mrb[178].mxu1 }
 0xbe0   : > { %v4761_v51 = vadd.f32 %v4751_v58, %v4524_v41  ;;  %v7229_v59 = vpop.f32.mrb[179].mxu1 }
 0xbe3   : > { %v4956_v45 = vpop.f32.mrb[180].mxu1 }
 0xbe4   : > { %v4990_v52 = vadd.f32 %v4956_v45, %v4755_v49  ;;  %v7250_v8 = vpop.f32.mrb[181].mxu1 }
 0xbe6   : > { %v5039_v13 = vadd.f32 %v5007_v62, %v4990_v52 }
 0xbe7   : > { %v4961_v22 = vpop.f32.mrb[182].mxu1 }
 0xbe8   : > { %v4991_v15 = vadd.f32 %v4961_v22, %v4756_v25  ;;  %v7253_v63 = vpop.f32.mrb[183].mxu1  ;;  %v5046_v1 = vmax.f32 %v5039_v13, 0.0  ;;  %v6287_v22 = vld [vmem:[%s9056_s15 + $0x20] sm:$0xff]  ;;  %v6288_v13 = vld [vmem:[%s9056_s15 + $0x28] sm:$0x3f] }
 0xbea   : > { %v5040_v0 = vadd.f32 %v5012_v40, %v4991_v15 }
 0xbeb   : > { %v4966_v19 = vpop.f32.mrb[184].mxu1 }
 0xbec   : > { %v5047_v3 = vmax.f32 %v5040_v0, 0.0  ;;  %v4992_v4 = vadd.f32 %v4966_v19, %v4757_v11  ;;  %v7256_v5 = vpop.f32.mrb[185].mxu1  ;;  %v7590_v11 = vld [vmem:[%s9055_s14 + $0x10] sm:$0xff]  }
 0xbee   : > { %v5053_v61 = vpack.c.bf16 %v5047_v3, %v5046_v1  ;;  %v5041_v10 = vadd.f32 %v5017_v21, %v4992_v4  ;;  %v7413_v1 = vpack.c.bf16 %v6288_v13, %v6287_v22  ;;  %v6303_v21 = vld [vmem:[%s9056_s15 + $0x38] sm:$0x3f] }
 0xbef   : > { %v4971_v6 = vpop.f32.mrb[186].mxu1 }
 0xbf0   : > { %v4993_v17 = vadd.f32 %v4971_v6, %v4758_v18  ;;  %7269 = vmatprep.subr.bf16.mxu0 %v5053_v61  ;;  %7313 = vmatprep.subr.bf16.mxu1 %v5053_v61  ;;  %v7259_v9 = vpop.f32.mrb[187].mxu1  ;;  %v5048_v31 = vmax.f32 %v5041_v10, 0.0  ;;  %v7593_v18 = vld [vmem:[%s9055_s14 + $0x38] sm:$0x3f]   ;;  %v5770_v10 = vpop.permute.xlu1 %5769 }
 0xbf1   : > { %7270 = vmatpush3.bf16.msra.mxu0 %v5053_v61  ;;  %7314 = vmatpush3.bf16.msra.mxu1 %v5053_v61 }
 0xbf2   : > { %v5042_v24 = vadd.f32 %v5022_v20, %v4993_v17  ;;  %v5765_v17 = vpop.permute.xlu0 %5764 }
 0xbf3   : > { %v4976_v28 = vpop.f32.mrb[188].mxu1 }
 0xbf4   : > { %v5049_v33 = vmax.f32 %v5042_v24, 0.0  ;;  %v4994_v34 = vadd.f32 %v4976_v28, %v4759_v56  ;;  %v7262_v29 = vpop.f32.mrb[189].mxu1  ;;  %v7401_v56 = vpack.c.bf16 %v6268_v55, %v6267_v54  ;;  %v5780_v2 = vpop.permute.xlu1 %5779 }
 0xbf6   : > { %v5054_v35 = vpack.c.bf16 %v5049_v33, %v5048_v31  ;;  %v5043_v42 = vadd.f32 %v5027_v14, %v4994_v34  ;;  %v5775_v33 = vpop.permute.xlu0 %5774 }
 0xbf7   : > { %v4981_v41 = vpop.f32.mrb[190].mxu1 }
 0xbf8   : > { %v4995_v16 = vadd.f32 %v4981_v41, %v4760_v44  ;;  %7271 = vmatprep.subr.bf16.mxu0 %v5054_v35  ;;  %7315 = vmatprep.subr.bf16.mxu1 %v5054_v35  ;;  %v7265_v27 = vpop.f32.mrb[191].mxu1  ;;  %v5050_v46 = vmax.f32 %v5043_v42, 0.0  ;;  %v7407_v44 = vpack.c.bf16 %v5130_v36, %v5129_v57 }
 0xbf9   : > { %7272 = vmatpush3.bf16.msra.mxu0 %v5054_v35  ;;  %7316 = vmatpush3.bf16.msra.mxu1 %v5054_v35 }
 0xbfa   : > { %v5044_v39 = vadd.f32 %v5032_v32, %v4995_v16 }
 0xbfb   : > { %v4986_v30 = vpop.f32.mrb[192].mxu1 }
 0xbfc   : > { %v5051_v7 = vmax.f32 %v5044_v39, 0.0  ;;  %v4996_v60 = vadd.f32 %v4986_v30, %v4761_v51  ;;  %v7268_v47 = vpop.f32.mrb[193].mxu1 }
 0xbfe   : > { %v5055_v38 = vpack.c.bf16 %v5051_v7, %v5050_v46  ;;  %v5045_v49 = vadd.f32 %v5037_v48, %v4996_v60 }
 0xc00   : > { %v5052_v26 = vmax.f32 %v5045_v49, 0.0  ;;  %7273 = vmatprep.subr.bf16.mxu0 %v5055_v38  ;;  %7317 = vmatprep.subr.bf16.mxu1 %v5055_v38 }
 0xc01   : > { %7274 = vmatpush3.bf16.msra.mxu0 %v5055_v38  ;;  %7318 = vmatpush3.bf16.msra.mxu1 %v5055_v38 }
 0xc02   : > { %v5056_v43 = vpack.c.bf16 %v5052_v26, %v5052_v26 }
 0xc04   : > { %7483 = vmatprep.subr.msk.bf16.mxu0 %vm803_vm2, %v5056_v43  ;;  %7485 = vmatprep.subr.msk.bf16.mxu1 %vm803_vm2, %v5056_v43  ;;  %v5078_v25 = vsel %vm803_vm2, %v5056_v43, 0 }
 0xc05   : > { %7276 = vmatpush3.bf16.msra.mxu0 %v5078_v25  ;;  %7320 = vmatpush3.bf16.msra.mxu1 %v5078_v25 }
 0xc06   : > { %7281 = vmatprep.subr.bf16.mxu0 %v5053_v61  ;;  %7335 = vmatprep.subr.bf16.mxu1 %v5053_v61 }
 0xc08   : > { %7278 = vmatmul.mubr.msk.bf16.vlgmr.msra.gmra.mrb[132].mxu0 %vm1592_vm7, %v7588_v37  ;;  %7322 = vmatmul.mubr.msk.bf16.vlgmr.msra.gmra.mrb[196].mxu1 %vm1592_vm7, %v7589_v50 }
 0xc09   : > { %7282 = vmatpush3.bf16.msra.mxu0 %v5053_v61  ;;  %7336 = vmatpush3.bf16.msra.mxu1 %v5053_v61  ;;  %v6302_v61 = vld [vmem:[%s9056_s15 + $0x30] sm:$0xff] }
 0xc0a   : > { %7283 = vmatprep.subr.bf16.mxu0 %v5054_v35  ;;  %7337 = vmatprep.subr.bf16.mxu1 %v5054_v35  ;;  %v7419_v6 = vpack.c.bf16 %v6303_v21, %v6302_v61 }
 0xc0b   : > { %7289 = vmatprep.mubr.msk.bf16.mxu0 %vm1592_vm7, %v7590_v11  ;;  %7343 = vmatprep.mubr.msk.bf16.mxu1 %vm1592_vm7, %v7592_v53 }
 0xc0d   : > { %7284 = vmatpush3.bf16.msra.mxu0 %v5054_v35  ;;  %7338 = vmatpush3.bf16.msra.mxu1 %v5054_v35 }
 0xc0e   : > { %7285 = vmatprep.subr.bf16.mxu0 %v5055_v38  ;;  %7339 = vmatprep.subr.bf16.mxu1 %v5055_v38 }
 0xc11   : > { %7286 = vmatpush3.bf16.msra.mxu0 %v5055_v38  ;;  %7340 = vmatpush3.bf16.msra.mxu1 %v5055_v38 }
 0xc12   : > { %7484 = vmatprep.subr.msk.bf16.mxu0 %vm803_vm2, %v5056_v43  ;;  %7486 = vmatprep.subr.msk.bf16.mxu1 %vm803_vm2, %v5056_v43  ;;  %vm5793_vm2 = vcmask 224256  }
 0xc15   : > { %7288 = vmatpush3.bf16.msra.mxu0 %v5078_v25  ;;  %7342 = vmatpush3.bf16.msra.mxu1 %v5078_v25 }
 0xc16   : > { %7403 = vmatprep.subr.msk.bf16.mxu0 %vm8032_vm6, %v7401_v56 }
 0xc18   : > { %7290 = vmatmul.mubr.msk.bf16.vlgmr.msra.gmra.mrb[136].mxu0 %vm1592_vm7, %v7591_v12  ;;  %7344 = vmatmul.mubr.msk.bf16.vlgmr.msra.gmra.mrb[200].mxu1 %vm1592_vm7, %v7593_v18 }
 0xc19   : > { %7406 = vmatpush3.bf16.msk.msra.mxu0 %vm8032_vm6, %v7401_v56 }
 0xc1a   : > { %7409 = vmatprep.subr.msk.bf16.mxu0 %vm8032_vm6, %v7407_v44 }
 0xcdb   : > { %v7279_v23 = vpop.f32.mrb[132].mxu0  ;;  %v7323_v58 = vpop.f32.mrb[196].mxu1 }
 0xcdc   : > { %v5114_v51 = vpop.f32.mrb[133].mxu0  ;;  %v5459_v59 = vpop.f32.mrb[197].mxu1 }
 0xcdd   : > { %v7280_v45 = vpop.f32.mrb[134].mxu0  ;;  %v7324_v52 = vpop.f32.mrb[198].mxu1 }
 0xcde   : > { %v5117_v8 = vpop.f32.mrb[135].mxu0  ;;  %v5462_v62 = vpop.f32.mrb[199].mxu1 }
 0xceb   : > { %v7291_v15 = vpop.f32.mrb[136].mxu0  ;;  %v7345_v63 = vpop.f32.mrb[200].mxu1 }
 0xcec   : > { %v5186_v40 = vpop.f32.mrb[137].mxu0  ;;  %v5636_v0 = vpop.f32.mrb[201].mxu1 }
 0xced   : > { %v7292_v19 = vpop.f32.mrb[138].mxu0  ;;  %7297 = vmatprep.mubr.msk.f32.mxu0 %vm1779_vm8, %v5186_v40  ;;  %v7346_v3 = vpop.f32.mrb[202].mxu1 }
 0xcee   : > { %v5189_v4 = vpop.f32.mrb[139].mxu0  ;;  %v5639_v5 = vpop.f32.mrb[203].mxu1 }
 0xcef   : > { %7298 = vmatmul.mubr.msk.f32.vlgmr.msra.gmra.mrb[114].mxu0 %vm1779_vm8, %v5189_v4 }
 0xcf0   : > { %7300 = vmatprep.mubr.msk.f32.mxu0 %vm1779_vm8, %v7291_v15  ;;  %7412 = vmatpush3.bf16.msk.msra.mxu0 %vm8032_vm6, %v7407_v44 }
 0xcf1   : > { %7415 = vmatprep.subr.msk.bf16.mxu0 %vm8032_vm6, %v7413_v1 }
 0xcf3   : > { %7301 = vmatmul.mubr.msk.f32.gmra.mrb[140].mxu0 %vm1779_vm8, %v7292_v19 }
 0xcf4   : > { %7307 = vmatprep.mubr.msk.f32.mxu0 %vm1779_vm8, %v5114_v51 }
 0xcf7   : > { %7308 = vmatmul.mubr.msk.f32.vlgmr.msra.gmra.mrb[114].mxu0 %vm1779_vm8, %v5117_v8 }
 0xcf8   : > { %7310 = vmatprep.mubr.msk.f32.mxu0 %vm1779_vm8, %v7279_v23  ;;  %7418 = vmatpush3.bf16.msk.msra.mxu0 %vm8032_vm6, %v7413_v1 }
 0xcf9   : > { %7421 = vmatprep.subr.msk.bf16.mxu0 %vm8032_vm6, %v7419_v6 }
 0xcfb   : > { %7311 = vmatmul.mubr.msk.f32.gmra.mrb[140].mxu0 %vm1779_vm8, %v7280_v45 }
 0xcfc   : > { %7329 = vmatprep.mubr.msk.f32.mxu0 %vm1779_vm8, %v5459_v59 }
 0xcff   : > { %7330 = vmatmul.mubr.msk.f32.vlgmr.msra.gmra.mrb[114].mxu0 %vm1779_vm8, %v5462_v62 }
 0xd00   : > { %7332 = vmatprep.mubr.msk.f32.mxu0 %vm1779_vm8, %v7323_v58  ;;  %7424 = vmatpush3.bf16.msk.msra.mxu0 %vm8032_vm6, %v7419_v6 }
 0xd03   : > { %7333 = vmatmul.mubr.msk.f32.gmra.mrb[140].mxu0 %vm1779_vm8, %v7324_v52 }
 0xd04   : > { %7351 = vmatprep.mubr.msk.f32.mxu0 %vm1779_vm8, %v5636_v0 }
 0xd07   : > { %7352 = vmatmul.mubr.msk.f32.vlgmr.msra.gmra.mrb[114].mxu0 %vm1779_vm8, %v5639_v5 }
 0xd08   : > { %7354 = vmatprep.mubr.msk.f32.mxu0 %vm1779_vm8, %v7345_v63 }
 0xd0b   : > { %7355 = vmatmul.mubr.msk.f32.gmra.mrb[140].mxu0 %vm1779_vm8, %v7346_v3 }
 0xdda   : > { %v7353_v9 = vpop.f32.mrb[114].mxu0 }
 0xddb   : > { %v5783_v20 = vadd.f32 %v7353_v9, %v5770_v10  ;;  %v5735_v24 = vpop.f32.mrb[115].mxu0 }
 0xddc   : > { %v5782_v28 = vadd.f32 %v5765_v17, %v5735_v24 }
 0xddd   : > { %7594 = vtanh.f32 %v5783_v20 }
 0xdde   : > { %7596 = vtanh.f32 %v5782_v28  ;;  %v7356_v31 = vpop.f32.mrb[140].mxu0 }
 0xddf   : > { %v5785_v34 = vadd.f32 %v7356_v31, %v5780_v2  ;;  %v5745_v29 = vpop.f32.mrb[141].mxu0 }
 0xde0   : > { %v5784_v35 = vadd.f32 %v5775_v33, %v5745_v29 }
 0xde1   : > { %7598 = vtanh.f32 %v5785_v34 }
 0xde2   : > { %7600 = vtanh.f32 %v5784_v35 }
 0xde7   : > { %v7595_v14 = vpop.eup %7594 }
 0xde8   : > { %v7597_v41 = vpop.eup %7596  ;;  %5791 = vst.msk [vmem:[%s548_s22 + $0x8] sm:$0xff] %vm590_vm0, %v7595_v14 }
 0xde9   : > { %5790 = vst.msk [vmem:[%s548_s22] sm:$0xff] %vm590_vm0, %v7597_v41 }
 0xdeb   : > { %v7599_v42 = vpop.eup %7598 }
 0xdec   : > { %v7601_v16 = vpop.eup %7600  ;;  %5794 = vst.msk [vmem:[%s548_s22 + $0x18] sm:$0xf] %vm5793_vm2, %v7599_v42 }
 0xded   : > { %5792 = vst.msk [vmem:[%s548_s22 + $0x10] sm:$0xff] %vm590_vm0, %v7601_v16 }
 0xdee PF: > { %s27_s24 = sadd.s32 1, %s7608_s24  }
 0xdef   : > { %p24_p4 = scmp.ge.s32.totalorder %s27_s24, 4  }
 0xdf1   :  { %26 = sbr.rel (!%p24_p4) target bundleno = 3 (0x3), region = 154 }

</bundles_post_ra>
